<compile_context>
chip_gen: v6e
topology: v6e:2x2x1
jax: 0.10.0
libtpu: 0.0.40
codegen_flags: <defaults>
</compile_context>

<pallas_src>
import jax
import jax.numpy as jnp
from jax import lax
from jax.experimental import pallas as pl
from jax.experimental.pallas import tpu as pltpu

MAX_DRAWS = 64   # cap on draws per sample (exact for lambda <~ 45)
UNROLL = 8       # draws per fori_loop step (loop is also fully unrolled)
LANES = 128      # TPU lane width


def _round_up(n, m):
    return ((n + m - 1) // m) * m


def _mix32(x):
    """splitmix32-style finalizer; decorrelates per-element PRNG streams."""
    x = x ^ (x >> jnp.uint32(16))
    x = x * jnp.uint32(0x7FEB352D)
    x = x ^ (x >> jnp.uint32(15))
    x = x * jnp.uint32(0x846CA68B)
    x = x ^ (x >> jnp.uint32(16))
    return x


def _poisson_regression_kernel(seed_ref, x_ref, w_ref, out_ref):
    d_aug, ts, lanes = x_ref.shape          # static block shape

    # ---- Linear layer (bias folded in as the last, all-ones feature). ----
    # out_features == 1 and D is small: a VPU multiply+accumulate over the
    # feature axis; the MXU would be ~idle for an (N, D) x (D, 1) GEMV anyway.
    z = x_ref[0] * w_ref[0]
    for d in range(1, d_aug):
        z = z + x_ref[d] * w_ref[d]         # (TS, 128), lane-dense
    lam = jnp.exp(z)                        # Poisson rate per sample
    thresh = jnp.exp(-lam)                  # Knuth threshold L = exp(-lambda)

    # ---- Per-element PRNG state = hash(seed, global sample index). ----
    # Global index folds in the tile id, so tiles get independent streams.
    tile = pl.program_id(0)
    row = lax.broadcasted_iota(jnp.uint32, z.shape, 0)
    col = lax.broadcasted_iota(jnp.uint32, z.shape, 1)
    base = (tile * (ts * lanes)).astype(jnp.uint32)
    gidx = base + row * jnp.uint32(lanes) + col
    seed = seed_ref[0].astype(jnp.uint32)
    state = _mix32(gidx ^ (seed * jnp.uint32(0x9E3779B9)))
    state = state | jnp.uint32(1)           # xorshift32 state must be nonzero

    # ---- Poisson sampling: branchless Knuth product form. ----
    # count = #{k >= 1 : prod_{i<=k} u_i > exp(-lambda)} ~ Poisson(lambda).
    # The product is monotone non-increasing, so once it drops below the
    # threshold every later compare is false; no per-draw log needed.
    prod = jnp.ones_like(lam)
    count = jnp.zeros(lam.shape, dtype=jnp.int32)

    def chunk(_, carry):
        state, prod, count = carry
        for _ in range(UNROLL):
            # xorshift32 (shifts/xors only -> cheap VPU ops).
            state = state ^ (state << jnp.uint32(13))
            state = state ^ (state >> jnp.uint32(17))
            state = state ^ (state << jnp.uint32(5))
            # uniform in (0, 1]: 23 mantissa bits -> [1, 2) via exponent OR +
            # bitcast, then reflect (no int->float convert in the hot loop).
            f12 = lax.bitcast_convert_type(
                (state >> jnp.uint32(9)) | jnp.uint32(0x3F800000), jnp.float32)
            u = jnp.float32(2.0) - f12
            prod = prod * u                 # running product of uniforms
            count = count + (prod > thresh).astype(jnp.int32)
        return state, prod, count

    # Static trip count, fully unrolled so the LLO scheduler sees all draws.
    _, _, count = lax.fori_loop(0, MAX_DRAWS // UNROLL, chunk,
                                (state, prod, count), unroll=True)
    # TODO(synk): samples are truncated at MAX_DRAWS; rates lambda >~ 45 need a
    # transformed-rejection sampler (as torch.poisson uses) for exactness.

    out_ref[...] = count.astype(jnp.float32)   # lane-dense, unmasked store


def poisson_regression(x, weight, bias, seed, *, sublanes_per_tile=32):
    """x: [N, D] f32; weight: [1, D] (torch Linear layout); bias: [1].

    Returns float32 [N, 1] Poisson samples with rate exp(x @ weight.T + bias).
    """
    x = jnp.asarray(x, jnp.float32)
    weight = jnp.asarray(weight, jnp.float32).reshape(1, -1)
    bias = jnp.asarray(bias, jnp.float32).reshape(1, 1)
    N, D = x.shape
    d_aug = D + 1

    # Fold the bias in as an extra all-ones feature.
    x_aug = jnp.concatenate([x, jnp.ones((N, 1), jnp.float32)], axis=1)
    w_aug = jnp.concatenate([weight, bias], axis=1)[0]          # (D+1,)

    # Lane-dense sample layout: pad N and fold it into (rows, 128) slabs.
    n_pad0 = _round_up(N, LANES)
    rows = n_pad0 // LANES
    ts = sublanes_per_tile if rows >= sublanes_per_tile else rows
    n_pad = _round_up(n_pad0, ts * LANES)
    rows = n_pad // LANES

    x_aug = jnp.pad(x_aug, ((0, n_pad - N), (0, 0)))
    # x3[d, r, c] == x_aug[r*128 + c, d]  (samples on sublane x lane)
    x3 = x_aug.T.reshape(d_aug, rows, LANES)
    # Each weight splatted across the 128 lanes (tiny: (D+1)*128 f32 in VMEM).
    w_b = jnp.broadcast_to(w_aug[:, None], (d_aug, LANES))

    seed_arr = jnp.asarray([seed], dtype=jnp.int32)
    grid = (rows // ts,)

    grid_spec = pltpu.PrefetchScalarGridSpec(
        num_scalar_prefetch=1,                       # seed lands in SMEM
        grid=grid,
        in_specs=[
            pl.BlockSpec((d_aug, ts, LANES), lambda i, seed_ref: (0, i, 0)),
            pl.BlockSpec((d_aug, LANES), lambda i, seed_ref: (0, 0)),
        ],
        out_specs=pl.BlockSpec((ts, LANES), lambda i, seed_ref: (i, 0)),
    )

    out = pl.pallas_call(
        _poisson_regression_kernel,
        out_shape=jax.ShapeDtypeStruct((rows, LANES), jnp.float32),
        grid_spec=grid_spec,
        compiler_params=pltpu.CompilerParams(
            # Independent row tiles: pipelined, and sharded across the two
            # TensorCores on v7x.  Per-tile VMEM is tens of KiB, so the
            # default scoped-VMEM limit is fine on v5e/v6e/v7x alike.
            dimension_semantics=("parallel",),
        ),
    )(seed_arr, x3, w_b)

    return out.reshape(n_pad)[:N].reshape(N, 1)


if __name__ == "__main__":
    # Small shapes consistent with the module: batch=8, input_dim=16 -> 1.
    N, D = 8, 16

    key = jax.random.PRNGKey(0)
    kx, kw, kb = jax.random.split(key, 3)

    x = jax.random.normal(kx, (N, D), dtype=jnp.float32)

    # torch-style nn.Linear init: U(-1/sqrt(D), 1/sqrt(D)).
    bound = 1.0 / (D ** 0.5)
    weight = jax.random.uniform(kw, (1, D), dtype=jnp.float32,
                                minval=-bound, maxval=bound)
    bias = jax.random.uniform(kb, (1,), dtype=jnp.float32,
                              minval=-bound, maxval=bound)

    out = poisson_regression(x, weight, bias, seed=0)
    out = jax.block_until_ready(out)

    assert out.shape == (N, 1) and out.dtype == jnp.float32
    # Poisson samples are non-negative integers stored as floats.
    assert bool(jnp.all(out >= 0)) and bool(jnp.all(out == jnp.round(out)))
    print("KERNEL_OK")
</pallas_src>

<mosaic_0001>
module attributes {stable_mosaic.version = 11 : i64} {
  func.func @_poisson_regression_kernel(%arg0: i32, %arg1: memref<1xi32, #tpu.memory_space<smem>>, %arg2: memref<17x1x128xf32, #tpu.memory_space<vmem>>, %arg3: memref<17x128xf32, #tpu.memory_space<vmem>>, %arg4: memref<1x128xf32, #tpu.memory_space<vmem>>) attributes {dimension_semantics = [#tpu.dimension_semantics<parallel>], iteration_bounds = array<i64: 1>, scalar_prefetch = 1 : i64, scratch_operands = 0 : i64, tpu.core_type = #tpu.core_type<tc>, window_params = [{transform_indices = @transform_0, window_bounds = array<i64: 17, 1, 128>}, {pipeline_mode = #tpu.pipeline_mode<synchronous>, transform_indices = @transform_1, window_bounds = array<i64: 17, 128>}, {transform_indices = @transform_2, window_bounds = array<i64: 1, 128>}]} {
    %c0 = arith.constant 0 : index
    %c0_0 = arith.constant 0 : index
    %c0_1 = arith.constant 0 : index
    %0 = vector.load %arg2[%c0, %c0_0, %c0_1] : memref<17x1x128xf32, #tpu.memory_space<vmem>>, vector<1x1x128xf32>
    %1 = vector.shape_cast %0 : vector<1x1x128xf32> to vector<1x128xf32>
    %c0_2 = arith.constant 0 : index
    %c0_3 = arith.constant 0 : index
    %2 = vector.load %arg3[%c0_2, %c0_3] : memref<17x128xf32, #tpu.memory_space<vmem>>, vector<1x128xf32>
    %3 = vector.shape_cast %2 : vector<1x128xf32> to vector<128xf32>
    %4 = vector.shape_cast %3 : vector<128xf32> to vector<1x128xf32>
    %5 = arith.mulf %1, %4 : vector<1x128xf32>
    %c1 = arith.constant 1 : index
    %c0_4 = arith.constant 0 : index
    %c0_5 = arith.constant 0 : index
    %6 = vector.load %arg2[%c1, %c0_4, %c0_5] : memref<17x1x128xf32, #tpu.memory_space<vmem>>, vector<1x1x128xf32>
    %7 = vector.shape_cast %6 : vector<1x1x128xf32> to vector<1x128xf32>
    %c1_6 = arith.constant 1 : index
    %c0_7 = arith.constant 0 : index
    %8 = vector.load %arg3[%c1_6, %c0_7] : memref<17x128xf32, #tpu.memory_space<vmem>>, vector<1x128xf32>
    %9 = vector.shape_cast %8 : vector<1x128xf32> to vector<128xf32>
    %10 = vector.shape_cast %9 : vector<128xf32> to vector<1x128xf32>
    %11 = arith.mulf %7, %10 : vector<1x128xf32>
    %12 = arith.addf %5, %11 : vector<1x128xf32>
    %c2 = arith.constant 2 : index
    %c0_8 = arith.constant 0 : index
    %c0_9 = arith.constant 0 : index
    %13 = vector.load %arg2[%c2, %c0_8, %c0_9] : memref<17x1x128xf32, #tpu.memory_space<vmem>>, vector<1x1x128xf32>
    %14 = vector.shape_cast %13 : vector<1x1x128xf32> to vector<1x128xf32>
    %c2_10 = arith.constant 2 : index
    %c0_11 = arith.constant 0 : index
    %15 = vector.load %arg3[%c2_10, %c0_11] : memref<17x128xf32, #tpu.memory_space<vmem>>, vector<1x128xf32>
    %16 = vector.shape_cast %15 : vector<1x128xf32> to vector<128xf32>
    %17 = vector.shape_cast %16 : vector<128xf32> to vector<1x128xf32>
    %18 = arith.mulf %14, %17 : vector<1x128xf32>
    %19 = arith.addf %12, %18 : vector<1x128xf32>
    %c3 = arith.constant 3 : index
    %c0_12 = arith.constant 0 : index
    %c0_13 = arith.constant 0 : index
    %20 = vector.load %arg2[%c3, %c0_12, %c0_13] : memref<17x1x128xf32, #tpu.memory_space<vmem>>, vector<1x1x128xf32>
    %21 = vector.shape_cast %20 : vector<1x1x128xf32> to vector<1x128xf32>
    %c3_14 = arith.constant 3 : index
    %c0_15 = arith.constant 0 : index
    %22 = vector.load %arg3[%c3_14, %c0_15] : memref<17x128xf32, #tpu.memory_space<vmem>>, vector<1x128xf32>
    %23 = vector.shape_cast %22 : vector<1x128xf32> to vector<128xf32>
    %24 = vector.shape_cast %23 : vector<128xf32> to vector<1x128xf32>
    %25 = arith.mulf %21, %24 : vector<1x128xf32>
    %26 = arith.addf %19, %25 : vector<1x128xf32>
    %c4 = arith.constant 4 : index
    %c0_16 = arith.constant 0 : index
    %c0_17 = arith.constant 0 : index
    %27 = vector.load %arg2[%c4, %c0_16, %c0_17] : memref<17x1x128xf32, #tpu.memory_space<vmem>>, vector<1x1x128xf32>
    %28 = vector.shape_cast %27 : vector<1x1x128xf32> to vector<1x128xf32>
    %c4_18 = arith.constant 4 : index
    %c0_19 = arith.constant 0 : index
    %29 = vector.load %arg3[%c4_18, %c0_19] : memref<17x128xf32, #tpu.memory_space<vmem>>, vector<1x128xf32>
    %30 = vector.shape_cast %29 : vector<1x128xf32> to vector<128xf32>
    %31 = vector.shape_cast %30 : vector<128xf32> to vector<1x128xf32>
    %32 = arith.mulf %28, %31 : vector<1x128xf32>
    %33 = arith.addf %26, %32 : vector<1x128xf32>
    %c5 = arith.constant 5 : index
    %c0_20 = arith.constant 0 : index
    %c0_21 = arith.constant 0 : index
    %34 = vector.load %arg2[%c5, %c0_20, %c0_21] : memref<17x1x128xf32, #tpu.memory_space<vmem>>, vector<1x1x128xf32>
    %35 = vector.shape_cast %34 : vector<1x1x128xf32> to vector<1x128xf32>
    %c5_22 = arith.constant 5 : index
    %c0_23 = arith.constant 0 : index
    %36 = vector.load %arg3[%c5_22, %c0_23] : memref<17x128xf32, #tpu.memory_space<vmem>>, vector<1x128xf32>
    %37 = vector.shape_cast %36 : vector<1x128xf32> to vector<128xf32>
    %38 = vector.shape_cast %37 : vector<128xf32> to vector<1x128xf32>
    %39 = arith.mulf %35, %38 : vector<1x128xf32>
    %40 = arith.addf %33, %39 : vector<1x128xf32>
    %c6 = arith.constant 6 : index
    %c0_24 = arith.constant 0 : index
    %c0_25 = arith.constant 0 : index
    %41 = vector.load %arg2[%c6, %c0_24, %c0_25] : memref<17x1x128xf32, #tpu.memory_space<vmem>>, vector<1x1x128xf32>
    %42 = vector.shape_cast %41 : vector<1x1x128xf32> to vector<1x128xf32>
    %c6_26 = arith.constant 6 : index
    %c0_27 = arith.constant 0 : index
    %43 = vector.load %arg3[%c6_26, %c0_27] : memref<17x128xf32, #tpu.memory_space<vmem>>, vector<1x128xf32>
    %44 = vector.shape_cast %43 : vector<1x128xf32> to vector<128xf32>
    %45 = vector.shape_cast %44 : vector<128xf32> to vector<1x128xf32>
    %46 = arith.mulf %42, %45 : vector<1x128xf32>
    %47 = arith.addf %40, %46 : vector<1x128xf32>
    %c7 = arith.constant 7 : index
    %c0_28 = arith.constant 0 : index
    %c0_29 = arith.constant 0 : index
    %48 = vector.load %arg2[%c7, %c0_28, %c0_29] : memref<17x1x128xf32, #tpu.memory_space<vmem>>, vector<1x1x128xf32>
    %49 = vector.shape_cast %48 : vector<1x1x128xf32> to vector<1x128xf32>
    %c7_30 = arith.constant 7 : index
    %c0_31 = arith.constant 0 : index
    %50 = vector.load %arg3[%c7_30, %c0_31] : memref<17x128xf32, #tpu.memory_space<vmem>>, vector<1x128xf32>
    %51 = vector.shape_cast %50 : vector<1x128xf32> to vector<128xf32>
    %52 = vector.shape_cast %51 : vector<128xf32> to vector<1x128xf32>
    %53 = arith.mulf %49, %52 : vector<1x128xf32>
    %54 = arith.addf %47, %53 : vector<1x128xf32>
    %c8 = arith.constant 8 : index
    %c0_32 = arith.constant 0 : index
    %c0_33 = arith.constant 0 : index
    %55 = vector.load %arg2[%c8, %c0_32, %c0_33] : memref<17x1x128xf32, #tpu.memory_space<vmem>>, vector<1x1x128xf32>
    %56 = vector.shape_cast %55 : vector<1x1x128xf32> to vector<1x128xf32>
    %c8_34 = arith.constant 8 : index
    %c0_35 = arith.constant 0 : index
    %57 = vector.load %arg3[%c8_34, %c0_35] : memref<17x128xf32, #tpu.memory_space<vmem>>, vector<1x128xf32>
    %58 = vector.shape_cast %57 : vector<1x128xf32> to vector<128xf32>
    %59 = vector.shape_cast %58 : vector<128xf32> to vector<1x128xf32>
    %60 = arith.mulf %56, %59 : vector<1x128xf32>
    %61 = arith.addf %54, %60 : vector<1x128xf32>
    %c9 = arith.constant 9 : index
    %c0_36 = arith.constant 0 : index
    %c0_37 = arith.constant 0 : index
    %62 = vector.load %arg2[%c9, %c0_36, %c0_37] : memref<17x1x128xf32, #tpu.memory_space<vmem>>, vector<1x1x128xf32>
    %63 = vector.shape_cast %62 : vector<1x1x128xf32> to vector<1x128xf32>
    %c9_38 = arith.constant 9 : index
    %c0_39 = arith.constant 0 : index
    %64 = vector.load %arg3[%c9_38, %c0_39] : memref<17x128xf32, #tpu.memory_space<vmem>>, vector<1x128xf32>
    %65 = vector.shape_cast %64 : vector<1x128xf32> to vector<128xf32>
    %66 = vector.shape_cast %65 : vector<128xf32> to vector<1x128xf32>
    %67 = arith.mulf %63, %66 : vector<1x128xf32>
    %68 = arith.addf %61, %67 : vector<1x128xf32>
    %c10 = arith.constant 10 : index
    %c0_40 = arith.constant 0 : index
    %c0_41 = arith.constant 0 : index
    %69 = vector.load %arg2[%c10, %c0_40, %c0_41] : memref<17x1x128xf32, #tpu.memory_space<vmem>>, vector<1x1x128xf32>
    %70 = vector.shape_cast %69 : vector<1x1x128xf32> to vector<1x128xf32>
    %c10_42 = arith.constant 10 : index
    %c0_43 = arith.constant 0 : index
    %71 = vector.load %arg3[%c10_42, %c0_43] : memref<17x128xf32, #tpu.memory_space<vmem>>, vector<1x128xf32>
    %72 = vector.shape_cast %71 : vector<1x128xf32> to vector<128xf32>
    %73 = vector.shape_cast %72 : vector<128xf32> to vector<1x128xf32>
    %74 = arith.mulf %70, %73 : vector<1x128xf32>
    %75 = arith.addf %68, %74 : vector<1x128xf32>
    %c11 = arith.constant 11 : index
    %c0_44 = arith.constant 0 : index
    %c0_45 = arith.constant 0 : index
    %76 = vector.load %arg2[%c11, %c0_44, %c0_45] : memref<17x1x128xf32, #tpu.memory_space<vmem>>, vector<1x1x128xf32>
    %77 = vector.shape_cast %76 : vector<1x1x128xf32> to vector<1x128xf32>
    %c11_46 = arith.constant 11 : index
    %c0_47 = arith.constant 0 : index
    %78 = vector.load %arg3[%c11_46, %c0_47] : memref<17x128xf32, #tpu.memory_space<vmem>>, vector<1x128xf32>
    %79 = vector.shape_cast %78 : vector<1x128xf32> to vector<128xf32>
    %80 = vector.shape_cast %79 : vector<128xf32> to vector<1x128xf32>
    %81 = arith.mulf %77, %80 : vector<1x128xf32>
    %82 = arith.addf %75, %81 : vector<1x128xf32>
    %c12 = arith.constant 12 : index
    %c0_48 = arith.constant 0 : index
    %c0_49 = arith.constant 0 : index
    %83 = vector.load %arg2[%c12, %c0_48, %c0_49] : memref<17x1x128xf32, #tpu.memory_space<vmem>>, vector<1x1x128xf32>
    %84 = vector.shape_cast %83 : vector<1x1x128xf32> to vector<1x128xf32>
    %c12_50 = arith.constant 12 : index
    %c0_51 = arith.constant 0 : index
    %85 = vector.load %arg3[%c12_50, %c0_51] : memref<17x128xf32, #tpu.memory_space<vmem>>, vector<1x128xf32>
    %86 = vector.shape_cast %85 : vector<1x128xf32> to vector<128xf32>
    %87 = vector.shape_cast %86 : vector<128xf32> to vector<1x128xf32>
    %88 = arith.mulf %84, %87 : vector<1x128xf32>
    %89 = arith.addf %82, %88 : vector<1x128xf32>
    %c13 = arith.constant 13 : index
    %c0_52 = arith.constant 0 : index
    %c0_53 = arith.constant 0 : index
    %90 = vector.load %arg2[%c13, %c0_52, %c0_53] : memref<17x1x128xf32, #tpu.memory_space<vmem>>, vector<1x1x128xf32>
    %91 = vector.shape_cast %90 : vector<1x1x128xf32> to vector<1x128xf32>
    %c13_54 = arith.constant 13 : index
    %c0_55 = arith.constant 0 : index
    %92 = vector.load %arg3[%c13_54, %c0_55] : memref<17x128xf32, #tpu.memory_space<vmem>>, vector<1x128xf32>
    %93 = vector.shape_cast %92 : vector<1x128xf32> to vector<128xf32>
    %94 = vector.shape_cast %93 : vector<128xf32> to vector<1x128xf32>
    %95 = arith.mulf %91, %94 : vector<1x128xf32>
    %96 = arith.addf %89, %95 : vector<1x128xf32>
    %c14 = arith.constant 14 : index
    %c0_56 = arith.constant 0 : index
    %c0_57 = arith.constant 0 : index
    %97 = vector.load %arg2[%c14, %c0_56, %c0_57] : memref<17x1x128xf32, #tpu.memory_space<vmem>>, vector<1x1x128xf32>
    %98 = vector.shape_cast %97 : vector<1x1x128xf32> to vector<1x128xf32>
    %c14_58 = arith.constant 14 : index
    %c0_59 = arith.constant 0 : index
    %99 = vector.load %arg3[%c14_58, %c0_59] : memref<17x128xf32, #tpu.memory_space<vmem>>, vector<1x128xf32>
    %100 = vector.shape_cast %99 : vector<1x128xf32> to vector<128xf32>
    %101 = vector.shape_cast %100 : vector<128xf32> to vector<1x128xf32>
    %102 = arith.mulf %98, %101 : vector<1x128xf32>
    %103 = arith.addf %96, %102 : vector<1x128xf32>
    %c15 = arith.constant 15 : index
    %c0_60 = arith.constant 0 : index
    %c0_61 = arith.constant 0 : index
    %104 = vector.load %arg2[%c15, %c0_60, %c0_61] : memref<17x1x128xf32, #tpu.memory_space<vmem>>, vector<1x1x128xf32>
    %105 = vector.shape_cast %104 : vector<1x1x128xf32> to vector<1x128xf32>
    %c15_62 = arith.constant 15 : index
    %c0_63 = arith.constant 0 : index
    %106 = vector.load %arg3[%c15_62, %c0_63] : memref<17x128xf32, #tpu.memory_space<vmem>>, vector<1x128xf32>
    %107 = vector.shape_cast %106 : vector<1x128xf32> to vector<128xf32>
    %108 = vector.shape_cast %107 : vector<128xf32> to vector<1x128xf32>
    %109 = arith.mulf %105, %108 : vector<1x128xf32>
    %110 = arith.addf %103, %109 : vector<1x128xf32>
    %c16 = arith.constant 16 : index
    %c0_64 = arith.constant 0 : index
    %c0_65 = arith.constant 0 : index
    %111 = vector.load %arg2[%c16, %c0_64, %c0_65] : memref<17x1x128xf32, #tpu.memory_space<vmem>>, vector<1x1x128xf32>
    %112 = vector.shape_cast %111 : vector<1x1x128xf32> to vector<1x128xf32>
    %c16_66 = arith.constant 16 : index
    %c0_67 = arith.constant 0 : index
    %113 = vector.load %arg3[%c16_66, %c0_67] : memref<17x128xf32, #tpu.memory_space<vmem>>, vector<1x128xf32>
    %114 = vector.shape_cast %113 : vector<1x128xf32> to vector<128xf32>
    %115 = vector.shape_cast %114 : vector<128xf32> to vector<1x128xf32>
    %116 = arith.mulf %112, %115 : vector<1x128xf32>
    %117 = arith.addf %110, %116 : vector<1x128xf32>
    %118 = math.exp %117 : vector<1x128xf32>
    %cst = arith.constant 0.000000e+00 : f32
    %119 = vector.broadcast %cst : f32 to vector<1x128xf32>
    %120 = arith.subf %119, %118 : vector<1x128xf32>
    %121 = math.exp %120 : vector<1x128xf32>
    %122 = tpu.iota {dimensions = array<i32: 0>} : vector<1x128xi32>
    %123 = tpu.iota {dimensions = array<i32: 1>} : vector<1x128xi32>
    %c128_i32 = arith.constant 128 : i32
    %124 = arith.muli %arg0, %c128_i32 : i32
    %c128_i32_68 = arith.constant 128 : i32
    %125 = vector.broadcast %c128_i32_68 : i32 to vector<1x128xi32>
    %126 = arith.muli %122, %125 : vector<1x128xi32>
    %127 = vector.broadcast %124 : i32 to vector<1x128xi32>
    %128 = arith.addi %127, %126 : vector<1x128xi32>
    %129 = arith.addi %128, %123 : vector<1x128xi32>
    %c0_69 = arith.constant 0 : index
    %130 = memref.load %arg1[%c0_69] : memref<1xi32, #tpu.memory_space<smem>>
    %c-1640531527_i32 = arith.constant -1640531527 : i32
    %131 = arith.muli %130, %c-1640531527_i32 : i32
    %132 = vector.broadcast %131 : i32 to vector<1x128xi32>
    %133 = arith.xori %129, %132 : vector<1x128xi32>
    %c16_i32 = arith.constant 16 : i32
    %134 = vector.broadcast %c16_i32 : i32 to vector<1x128xi32>
    %135 = arith.shrui %133, %134 : vector<1x128xi32>
    %136 = arith.xori %133, %135 : vector<1x128xi32>
    %c2146121005_i32 = arith.constant 2146121005 : i32
    %137 = vector.broadcast %c2146121005_i32 : i32 to vector<1x128xi32>
    %138 = arith.muli %136, %137 : vector<1x128xi32>
    %c15_i32 = arith.constant 15 : i32
    %139 = vector.broadcast %c15_i32 : i32 to vector<1x128xi32>
    %140 = arith.shrui %138, %139 : vector<1x128xi32>
    %141 = arith.xori %138, %140 : vector<1x128xi32>
    %c-2073254261_i32 = arith.constant -2073254261 : i32
    %142 = vector.broadcast %c-2073254261_i32 : i32 to vector<1x128xi32>
    %143 = arith.muli %141, %142 : vector<1x128xi32>
    %c16_i32_70 = arith.constant 16 : i32
    %144 = vector.broadcast %c16_i32_70 : i32 to vector<1x128xi32>
    %145 = arith.shrui %143, %144 : vector<1x128xi32>
    %146 = arith.xori %143, %145 : vector<1x128xi32>
    %c1_i32 = arith.constant 1 : i32
    %147 = vector.broadcast %c1_i32 : i32 to vector<1x128xi32>
    %148 = arith.ori %146, %147 : vector<1x128xi32>
    %cst_71 = arith.constant 1.000000e+00 : f32
    %149 = vector.broadcast %cst_71 : f32 to vector<1x128xf32>
    %c0_i32 = arith.constant 0 : i32
    %150 = vector.broadcast %c0_i32 : i32 to vector<1x128xi32>
    %c0_i32_72 = arith.constant 0 : i32
    %c13_i32 = arith.constant 13 : i32
    %151 = vector.broadcast %c13_i32 : i32 to vector<1x128xi32>
    %152 = arith.shli %148, %151 : vector<1x128xi32>
    %153 = arith.xori %148, %152 : vector<1x128xi32>
    %c17_i32 = arith.constant 17 : i32
    %154 = vector.broadcast %c17_i32 : i32 to vector<1x128xi32>
    %155 = arith.shrui %153, %154 : vector<1x128xi32>
    %156 = arith.xori %153, %155 : vector<1x128xi32>
    %c5_i32 = arith.constant 5 : i32
    %157 = vector.broadcast %c5_i32 : i32 to vector<1x128xi32>
    %158 = arith.shli %156, %157 : vector<1x128xi32>
    %159 = arith.xori %156, %158 : vector<1x128xi32>
    %c9_i32 = arith.constant 9 : i32
    %160 = vector.broadcast %c9_i32 : i32 to vector<1x128xi32>
    %161 = arith.shrui %159, %160 : vector<1x128xi32>
    %c1065353216_i32 = arith.constant 1065353216 : i32
    %162 = vector.broadcast %c1065353216_i32 : i32 to vector<1x128xi32>
    %163 = arith.ori %161, %162 : vector<1x128xi32>
    %164 = tpu.bitcast %163 : vector<1x128xi32> -> vector<1x128xf32>
    %cst_73 = arith.constant 2.000000e+00 : f32
    %165 = vector.broadcast %cst_73 : f32 to vector<1x128xf32>
    %166 = arith.subf %165, %164 : vector<1x128xf32>
    %167 = arith.mulf %149, %166 : vector<1x128xf32>
    %168 = arith.cmpf ogt, %167, %121 : vector<1x128xf32>
    %169 = arith.extui %168 : vector<1x128xi1> to vector<1x128xi32>
    %170 = arith.addi %150, %169 : vector<1x128xi32>
    %c13_i32_74 = arith.constant 13 : i32
    %171 = vector.broadcast %c13_i32_74 : i32 to vector<1x128xi32>
    %172 = arith.shli %159, %171 : vector<1x128xi32>
    %173 = arith.xori %159, %172 : vector<1x128xi32>
    %c17_i32_75 = arith.constant 17 : i32
    %174 = vector.broadcast %c17_i32_75 : i32 to vector<1x128xi32>
    %175 = arith.shrui %173, %174 : vector<1x128xi32>
    %176 = arith.xori %173, %175 : vector<1x128xi32>
    %c5_i32_76 = arith.constant 5 : i32
    %177 = vector.broadcast %c5_i32_76 : i32 to vector<1x128xi32>
    %178 = arith.shli %176, %177 : vector<1x128xi32>
    %179 = arith.xori %176, %178 : vector<1x128xi32>
    %c9_i32_77 = arith.constant 9 : i32
    %180 = vector.broadcast %c9_i32_77 : i32 to vector<1x128xi32>
    %181 = arith.shrui %179, %180 : vector<1x128xi32>
    %c1065353216_i32_78 = arith.constant 1065353216 : i32
    %182 = vector.broadcast %c1065353216_i32_78 : i32 to vector<1x128xi32>
    %183 = arith.ori %181, %182 : vector<1x128xi32>
    %184 = tpu.bitcast %183 : vector<1x128xi32> -> vector<1x128xf32>
    %cst_79 = arith.constant 2.000000e+00 : f32
    %185 = vector.broadcast %cst_79 : f32 to vector<1x128xf32>
    %186 = arith.subf %185, %184 : vector<1x128xf32>
    %187 = arith.mulf %167, %186 : vector<1x128xf32>
    %188 = arith.cmpf ogt, %187, %121 : vector<1x128xf32>
    %189 = arith.extui %188 : vector<1x128xi1> to vector<1x128xi32>
    %190 = arith.addi %170, %189 : vector<1x128xi32>
    %c13_i32_80 = arith.constant 13 : i32
    %191 = vector.broadcast %c13_i32_80 : i32 to vector<1x128xi32>
    %192 = arith.shli %179, %191 : vector<1x128xi32>
    %193 = arith.xori %179, %192 : vector<1x128xi32>
    %c17_i32_81 = arith.constant 17 : i32
    %194 = vector.broadcast %c17_i32_81 : i32 to vector<1x128xi32>
    %195 = arith.shrui %193, %194 : vector<1x128xi32>
    %196 = arith.xori %193, %195 : vector<1x128xi32>
    %c5_i32_82 = arith.constant 5 : i32
    %197 = vector.broadcast %c5_i32_82 : i32 to vector<1x128xi32>
    %198 = arith.shli %196, %197 : vector<1x128xi32>
    %199 = arith.xori %196, %198 : vector<1x128xi32>
    %c9_i32_83 = arith.constant 9 : i32
    %200 = vector.broadcast %c9_i32_83 : i32 to vector<1x128xi32>
    %201 = arith.shrui %199, %200 : vector<1x128xi32>
    %c1065353216_i32_84 = arith.constant 1065353216 : i32
    %202 = vector.broadcast %c1065353216_i32_84 : i32 to vector<1x128xi32>
    %203 = arith.ori %201, %202 : vector<1x128xi32>
    %204 = tpu.bitcast %203 : vector<1x128xi32> -> vector<1x128xf32>
    %cst_85 = arith.constant 2.000000e+00 : f32
    %205 = vector.broadcast %cst_85 : f32 to vector<1x128xf32>
    %206 = arith.subf %205, %204 : vector<1x128xf32>
    %207 = arith.mulf %187, %206 : vector<1x128xf32>
    %208 = arith.cmpf ogt, %207, %121 : vector<1x128xf32>
    %209 = arith.extui %208 : vector<1x128xi1> to vector<1x128xi32>
    %210 = arith.addi %190, %209 : vector<1x128xi32>
    %c13_i32_86 = arith.constant 13 : i32
    %211 = vector.broadcast %c13_i32_86 : i32 to vector<1x128xi32>
    %212 = arith.shli %199, %211 : vector<1x128xi32>
    %213 = arith.xori %199, %212 : vector<1x128xi32>
    %c17_i32_87 = arith.constant 17 : i32
    %214 = vector.broadcast %c17_i32_87 : i32 to vector<1x128xi32>
    %215 = arith.shrui %213, %214 : vector<1x128xi32>
    %216 = arith.xori %213, %215 : vector<1x128xi32>
    %c5_i32_88 = arith.constant 5 : i32
    %217 = vector.broadcast %c5_i32_88 : i32 to vector<1x128xi32>
    %218 = arith.shli %216, %217 : vector<1x128xi32>
    %219 = arith.xori %216, %218 : vector<1x128xi32>
    %c9_i32_89 = arith.constant 9 : i32
    %220 = vector.broadcast %c9_i32_89 : i32 to vector<1x128xi32>
    %221 = arith.shrui %219, %220 : vector<1x128xi32>
    %c1065353216_i32_90 = arith.constant 1065353216 : i32
    %222 = vector.broadcast %c1065353216_i32_90 : i32 to vector<1x128xi32>
    %223 = arith.ori %221, %222 : vector<1x128xi32>
    %224 = tpu.bitcast %223 : vector<1x128xi32> -> vector<1x128xf32>
    %cst_91 = arith.constant 2.000000e+00 : f32
    %225 = vector.broadcast %cst_91 : f32 to vector<1x128xf32>
    %226 = arith.subf %225, %224 : vector<1x128xf32>
    %227 = arith.mulf %207, %226 : vector<1x128xf32>
    %228 = arith.cmpf ogt, %227, %121 : vector<1x128xf32>
    %229 = arith.extui %228 : vector<1x128xi1> to vector<1x128xi32>
    %230 = arith.addi %210, %229 : vector<1x128xi32>
    %c13_i32_92 = arith.constant 13 : i32
    %231 = vector.broadcast %c13_i32_92 : i32 to vector<1x128xi32>
    %232 = arith.shli %219, %231 : vector<1x128xi32>
    %233 = arith.xori %219, %232 : vector<1x128xi32>
    %c17_i32_93 = arith.constant 17 : i32
    %234 = vector.broadcast %c17_i32_93 : i32 to vector<1x128xi32>
    %235 = arith.shrui %233, %234 : vector<1x128xi32>
    %236 = arith.xori %233, %235 : vector<1x128xi32>
    %c5_i32_94 = arith.constant 5 : i32
    %237 = vector.broadcast %c5_i32_94 : i32 to vector<1x128xi32>
    %238 = arith.shli %236, %237 : vector<1x128xi32>
    %239 = arith.xori %236, %238 : vector<1x128xi32>
    %c9_i32_95 = arith.constant 9 : i32
    %240 = vector.broadcast %c9_i32_95 : i32 to vector<1x128xi32>
    %241 = arith.shrui %239, %240 : vector<1x128xi32>
    %c1065353216_i32_96 = arith.constant 1065353216 : i32
    %242 = vector.broadcast %c1065353216_i32_96 : i32 to vector<1x128xi32>
    %243 = arith.ori %241, %242 : vector<1x128xi32>
    %244 = tpu.bitcast %243 : vector<1x128xi32> -> vector<1x128xf32>
    %cst_97 = arith.constant 2.000000e+00 : f32
    %245 = vector.broadcast %cst_97 : f32 to vector<1x128xf32>
    %246 = arith.subf %245, %244 : vector<1x128xf32>
    %247 = arith.mulf %227, %246 : vector<1x128xf32>
    %248 = arith.cmpf ogt, %247, %121 : vector<1x128xf32>
    %249 = arith.extui %248 : vector<1x128xi1> to vector<1x128xi32>
    %250 = arith.addi %230, %249 : vector<1x128xi32>
    %c13_i32_98 = arith.constant 13 : i32
    %251 = vector.broadcast %c13_i32_98 : i32 to vector<1x128xi32>
    %252 = arith.shli %239, %251 : vector<1x128xi32>
    %253 = arith.xori %239, %252 : vector<1x128xi32>
    %c17_i32_99 = arith.constant 17 : i32
    %254 = vector.broadcast %c17_i32_99 : i32 to vector<1x128xi32>
    %255 = arith.shrui %253, %254 : vector<1x128xi32>
    %256 = arith.xori %253, %255 : vector<1x128xi32>
    %c5_i32_100 = arith.constant 5 : i32
    %257 = vector.broadcast %c5_i32_100 : i32 to vector<1x128xi32>
    %258 = arith.shli %256, %257 : vector<1x128xi32>
    %259 = arith.xori %256, %258 : vector<1x128xi32>
    %c9_i32_101 = arith.constant 9 : i32
    %260 = vector.broadcast %c9_i32_101 : i32 to vector<1x128xi32>
    %261 = arith.shrui %259, %260 : vector<1x128xi32>
    %c1065353216_i32_102 = arith.constant 1065353216 : i32
    %262 = vector.broadcast %c1065353216_i32_102 : i32 to vector<1x128xi32>
    %263 = arith.ori %261, %262 : vector<1x128xi32>
    %264 = tpu.bitcast %263 : vector<1x128xi32> -> vector<1x128xf32>
    %cst_103 = arith.constant 2.000000e+00 : f32
    %265 = vector.broadcast %cst_103 : f32 to vector<1x128xf32>
    %266 = arith.subf %265, %264 : vector<1x128xf32>
    %267 = arith.mulf %247, %266 : vector<1x128xf32>
    %268 = arith.cmpf ogt, %267, %121 : vector<1x128xf32>
    %269 = arith.extui %268 : vector<1x128xi1> to vector<1x128xi32>
    %270 = arith.addi %250, %269 : vector<1x128xi32>
    %c13_i32_104 = arith.constant 13 : i32
    %271 = vector.broadcast %c13_i32_104 : i32 to vector<1x128xi32>
    %272 = arith.shli %259, %271 : vector<1x128xi32>
    %273 = arith.xori %259, %272 : vector<1x128xi32>
    %c17_i32_105 = arith.constant 17 : i32
    %274 = vector.broadcast %c17_i32_105 : i32 to vector<1x128xi32>
    %275 = arith.shrui %273, %274 : vector<1x128xi32>
    %276 = arith.xori %273, %275 : vector<1x128xi32>
    %c5_i32_106 = arith.constant 5 : i32
    %277 = vector.broadcast %c5_i32_106 : i32 to vector<1x128xi32>
    %278 = arith.shli %276, %277 : vector<1x128xi32>
    %279 = arith.xori %276, %278 : vector<1x128xi32>
    %c9_i32_107 = arith.constant 9 : i32
    %280 = vector.broadcast %c9_i32_107 : i32 to vector<1x128xi32>
    %281 = arith.shrui %279, %280 : vector<1x128xi32>
    %c1065353216_i32_108 = arith.constant 1065353216 : i32
    %282 = vector.broadcast %c1065353216_i32_108 : i32 to vector<1x128xi32>
    %283 = arith.ori %281, %282 : vector<1x128xi32>
    %284 = tpu.bitcast %283 : vector<1x128xi32> -> vector<1x128xf32>
    %cst_109 = arith.constant 2.000000e+00 : f32
    %285 = vector.broadcast %cst_109 : f32 to vector<1x128xf32>
    %286 = arith.subf %285, %284 : vector<1x128xf32>
    %287 = arith.mulf %267, %286 : vector<1x128xf32>
    %288 = arith.cmpf ogt, %287, %121 : vector<1x128xf32>
    %289 = arith.extui %288 : vector<1x128xi1> to vector<1x128xi32>
    %290 = arith.addi %270, %289 : vector<1x128xi32>
    %c13_i32_110 = arith.constant 13 : i32
    %291 = vector.broadcast %c13_i32_110 : i32 to vector<1x128xi32>
    %292 = arith.shli %279, %291 : vector<1x128xi32>
    %293 = arith.xori %279, %292 : vector<1x128xi32>
    %c17_i32_111 = arith.constant 17 : i32
    %294 = vector.broadcast %c17_i32_111 : i32 to vector<1x128xi32>
    %295 = arith.shrui %293, %294 : vector<1x128xi32>
    %296 = arith.xori %293, %295 : vector<1x128xi32>
    %c5_i32_112 = arith.constant 5 : i32
    %297 = vector.broadcast %c5_i32_112 : i32 to vector<1x128xi32>
    %298 = arith.shli %296, %297 : vector<1x128xi32>
    %299 = arith.xori %296, %298 : vector<1x128xi32>
    %c9_i32_113 = arith.constant 9 : i32
    %300 = vector.broadcast %c9_i32_113 : i32 to vector<1x128xi32>
    %301 = arith.shrui %299, %300 : vector<1x128xi32>
    %c1065353216_i32_114 = arith.constant 1065353216 : i32
    %302 = vector.broadcast %c1065353216_i32_114 : i32 to vector<1x128xi32>
    %303 = arith.ori %301, %302 : vector<1x128xi32>
    %304 = tpu.bitcast %303 : vector<1x128xi32> -> vector<1x128xf32>
    %cst_115 = arith.constant 2.000000e+00 : f32
    %305 = vector.broadcast %cst_115 : f32 to vector<1x128xf32>
    %306 = arith.subf %305, %304 : vector<1x128xf32>
    %307 = arith.mulf %287, %306 : vector<1x128xf32>
    %308 = arith.cmpf ogt, %307, %121 : vector<1x128xf32>
    %309 = arith.extui %308 : vector<1x128xi1> to vector<1x128xi32>
    %310 = arith.addi %290, %309 : vector<1x128xi32>
    %c1_i32_116 = arith.constant 1 : i32
    %c13_i32_117 = arith.constant 13 : i32
    %311 = vector.broadcast %c13_i32_117 : i32 to vector<1x128xi32>
    %312 = arith.shli %299, %311 : vector<1x128xi32>
    %313 = arith.xori %299, %312 : vector<1x128xi32>
    %c17_i32_118 = arith.constant 17 : i32
    %314 = vector.broadcast %c17_i32_118 : i32 to vector<1x128xi32>
    %315 = arith.shrui %313, %314 : vector<1x128xi32>
    %316 = arith.xori %313, %315 : vector<1x128xi32>
    %c5_i32_119 = arith.constant 5 : i32
    %317 = vector.broadcast %c5_i32_119 : i32 to vector<1x128xi32>
    %318 = arith.shli %316, %317 : vector<1x128xi32>
    %319 = arith.xori %316, %318 : vector<1x128xi32>
    %c9_i32_120 = arith.constant 9 : i32
    %320 = vector.broadcast %c9_i32_120 : i32 to vector<1x128xi32>
    %321 = arith.shrui %319, %320 : vector<1x128xi32>
    %c1065353216_i32_121 = arith.constant 1065353216 : i32
    %322 = vector.broadcast %c1065353216_i32_121 : i32 to vector<1x128xi32>
    %323 = arith.ori %321, %322 : vector<1x128xi32>
    %324 = tpu.bitcast %323 : vector<1x128xi32> -> vector<1x128xf32>
    %cst_122 = arith.constant 2.000000e+00 : f32
    %325 = vector.broadcast %cst_122 : f32 to vector<1x128xf32>
    %326 = arith.subf %325, %324 : vector<1x128xf32>
    %327 = arith.mulf %307, %326 : vector<1x128xf32>
    %328 = arith.cmpf ogt, %327, %121 : vector<1x128xf32>
    %329 = arith.extui %328 : vector<1x128xi1> to vector<1x128xi32>
    %330 = arith.addi %310, %329 : vector<1x128xi32>
    %c13_i32_123 = arith.constant 13 : i32
    %331 = vector.broadcast %c13_i32_123 : i32 to vector<1x128xi32>
    %332 = arith.shli %319, %331 : vector<1x128xi32>
    %333 = arith.xori %319, %332 : vector<1x128xi32>
    %c17_i32_124 = arith.constant 17 : i32
    %334 = vector.broadcast %c17_i32_124 : i32 to vector<1x128xi32>
    %335 = arith.shrui %333, %334 : vector<1x128xi32>
    %336 = arith.xori %333, %335 : vector<1x128xi32>
    %c5_i32_125 = arith.constant 5 : i32
    %337 = vector.broadcast %c5_i32_125 : i32 to vector<1x128xi32>
    %338 = arith.shli %336, %337 : vector<1x128xi32>
    %339 = arith.xori %336, %338 : vector<1x128xi32>
    %c9_i32_126 = arith.constant 9 : i32
    %340 = vector.broadcast %c9_i32_126 : i32 to vector<1x128xi32>
    %341 = arith.shrui %339, %340 : vector<1x128xi32>
    %c1065353216_i32_127 = arith.constant 1065353216 : i32
    %342 = vector.broadcast %c1065353216_i32_127 : i32 to vector<1x128xi32>
    %343 = arith.ori %341, %342 : vector<1x128xi32>
    %344 = tpu.bitcast %343 : vector<1x128xi32> -> vector<1x128xf32>
    %cst_128 = arith.constant 2.000000e+00 : f32
    %345 = vector.broadcast %cst_128 : f32 to vector<1x128xf32>
    %346 = arith.subf %345, %344 : vector<1x128xf32>
    %347 = arith.mulf %327, %346 : vector<1x128xf32>
    %348 = arith.cmpf ogt, %347, %121 : vector<1x128xf32>
    %349 = arith.extui %348 : vector<1x128xi1> to vector<1x128xi32>
    %350 = arith.addi %330, %349 : vector<1x128xi32>
    %c13_i32_129 = arith.constant 13 : i32
    %351 = vector.broadcast %c13_i32_129 : i32 to vector<1x128xi32>
    %352 = arith.shli %339, %351 : vector<1x128xi32>
    %353 = arith.xori %339, %352 : vector<1x128xi32>
    %c17_i32_130 = arith.constant 17 : i32
    %354 = vector.broadcast %c17_i32_130 : i32 to vector<1x128xi32>
    %355 = arith.shrui %353, %354 : vector<1x128xi32>
    %356 = arith.xori %353, %355 : vector<1x128xi32>
    %c5_i32_131 = arith.constant 5 : i32
    %357 = vector.broadcast %c5_i32_131 : i32 to vector<1x128xi32>
    %358 = arith.shli %356, %357 : vector<1x128xi32>
    %359 = arith.xori %356, %358 : vector<1x128xi32>
    %c9_i32_132 = arith.constant 9 : i32
    %360 = vector.broadcast %c9_i32_132 : i32 to vector<1x128xi32>
    %361 = arith.shrui %359, %360 : vector<1x128xi32>
    %c1065353216_i32_133 = arith.constant 1065353216 : i32
    %362 = vector.broadcast %c1065353216_i32_133 : i32 to vector<1x128xi32>
    %363 = arith.ori %361, %362 : vector<1x128xi32>
    %364 = tpu.bitcast %363 : vector<1x128xi32> -> vector<1x128xf32>
    %cst_134 = arith.constant 2.000000e+00 : f32
    %365 = vector.broadcast %cst_134 : f32 to vector<1x128xf32>
    %366 = arith.subf %365, %364 : vector<1x128xf32>
    %367 = arith.mulf %347, %366 : vector<1x128xf32>
    %368 = arith.cmpf ogt, %367, %121 : vector<1x128xf32>
    %369 = arith.extui %368 : vector<1x128xi1> to vector<1x128xi32>
    %370 = arith.addi %350, %369 : vector<1x128xi32>
    %c13_i32_135 = arith.constant 13 : i32
    %371 = vector.broadcast %c13_i32_135 : i32 to vector<1x128xi32>
    %372 = arith.shli %359, %371 : vector<1x128xi32>
    %373 = arith.xori %359, %372 : vector<1x128xi32>
    %c17_i32_136 = arith.constant 17 : i32
    %374 = vector.broadcast %c17_i32_136 : i32 to vector<1x128xi32>
    %375 = arith.shrui %373, %374 : vector<1x128xi32>
    %376 = arith.xori %373, %375 : vector<1x128xi32>
    %c5_i32_137 = arith.constant 5 : i32
    %377 = vector.broadcast %c5_i32_137 : i32 to vector<1x128xi32>
    %378 = arith.shli %376, %377 : vector<1x128xi32>
    %379 = arith.xori %376, %378 : vector<1x128xi32>
    %c9_i32_138 = arith.constant 9 : i32
    %380 = vector.broadcast %c9_i32_138 : i32 to vector<1x128xi32>
    %381 = arith.shrui %379, %380 : vector<1x128xi32>
    %c1065353216_i32_139 = arith.constant 1065353216 : i32
    %382 = vector.broadcast %c1065353216_i32_139 : i32 to vector<1x128xi32>
    %383 = arith.ori %381, %382 : vector<1x128xi32>
    %384 = tpu.bitcast %383 : vector<1x128xi32> -> vector<1x128xf32>
    %cst_140 = arith.constant 2.000000e+00 : f32
    %385 = vector.broadcast %cst_140 : f32 to vector<1x128xf32>
    %386 = arith.subf %385, %384 : vector<1x128xf32>
    %387 = arith.mulf %367, %386 : vector<1x128xf32>
    %388 = arith.cmpf ogt, %387, %121 : vector<1x128xf32>
    %389 = arith.extui %388 : vector<1x128xi1> to vector<1x128xi32>
    %390 = arith.addi %370, %389 : vector<1x128xi32>
    %c13_i32_141 = arith.constant 13 : i32
    %391 = vector.broadcast %c13_i32_141 : i32 to vector<1x128xi32>
    %392 = arith.shli %379, %391 : vector<1x128xi32>
    %393 = arith.xori %379, %392 : vector<1x128xi32>
    %c17_i32_142 = arith.constant 17 : i32
    %394 = vector.broadcast %c17_i32_142 : i32 to vector<1x128xi32>
    %395 = arith.shrui %393, %394 : vector<1x128xi32>
    %396 = arith.xori %393, %395 : vector<1x128xi32>
    %c5_i32_143 = arith.constant 5 : i32
    %397 = vector.broadcast %c5_i32_143 : i32 to vector<1x128xi32>
    %398 = arith.shli %396, %397 : vector<1x128xi32>
    %399 = arith.xori %396, %398 : vector<1x128xi32>
    %c9_i32_144 = arith.constant 9 : i32
    %400 = vector.broadcast %c9_i32_144 : i32 to vector<1x128xi32>
    %401 = arith.shrui %399, %400 : vector<1x128xi32>
    %c1065353216_i32_145 = arith.constant 1065353216 : i32
    %402 = vector.broadcast %c1065353216_i32_145 : i32 to vector<1x128xi32>
    %403 = arith.ori %401, %402 : vector<1x128xi32>
    %404 = tpu.bitcast %403 : vector<1x128xi32> -> vector<1x128xf32>
    %cst_146 = arith.constant 2.000000e+00 : f32
    %405 = vector.broadcast %cst_146 : f32 to vector<1x128xf32>
    %406 = arith.subf %405, %404 : vector<1x128xf32>
    %407 = arith.mulf %387, %406 : vector<1x128xf32>
    %408 = arith.cmpf ogt, %407, %121 : vector<1x128xf32>
    %409 = arith.extui %408 : vector<1x128xi1> to vector<1x128xi32>
    %410 = arith.addi %390, %409 : vector<1x128xi32>
    %c13_i32_147 = arith.constant 13 : i32
    %411 = vector.broadcast %c13_i32_147 : i32 to vector<1x128xi32>
    %412 = arith.shli %399, %411 : vector<1x128xi32>
    %413 = arith.xori %399, %412 : vector<1x128xi32>
    %c17_i32_148 = arith.constant 17 : i32
    %414 = vector.broadcast %c17_i32_148 : i32 to vector<1x128xi32>
    %415 = arith.shrui %413, %414 : vector<1x128xi32>
    %416 = arith.xori %413, %415 : vector<1x128xi32>
    %c5_i32_149 = arith.constant 5 : i32
    %417 = vector.broadcast %c5_i32_149 : i32 to vector<1x128xi32>
    %418 = arith.shli %416, %417 : vector<1x128xi32>
    %419 = arith.xori %416, %418 : vector<1x128xi32>
    %c9_i32_150 = arith.constant 9 : i32
    %420 = vector.broadcast %c9_i32_150 : i32 to vector<1x128xi32>
    %421 = arith.shrui %419, %420 : vector<1x128xi32>
    %c1065353216_i32_151 = arith.constant 1065353216 : i32
    %422 = vector.broadcast %c1065353216_i32_151 : i32 to vector<1x128xi32>
    %423 = arith.ori %421, %422 : vector<1x128xi32>
    %424 = tpu.bitcast %423 : vector<1x128xi32> -> vector<1x128xf32>
    %cst_152 = arith.constant 2.000000e+00 : f32
    %425 = vector.broadcast %cst_152 : f32 to vector<1x128xf32>
    %426 = arith.subf %425, %424 : vector<1x128xf32>
    %427 = arith.mulf %407, %426 : vector<1x128xf32>
    %428 = arith.cmpf ogt, %427, %121 : vector<1x128xf32>
    %429 = arith.extui %428 : vector<1x128xi1> to vector<1x128xi32>
    %430 = arith.addi %410, %429 : vector<1x128xi32>
    %c13_i32_153 = arith.constant 13 : i32
    %431 = vector.broadcast %c13_i32_153 : i32 to vector<1x128xi32>
    %432 = arith.shli %419, %431 : vector<1x128xi32>
    %433 = arith.xori %419, %432 : vector<1x128xi32>
    %c17_i32_154 = arith.constant 17 : i32
    %434 = vector.broadcast %c17_i32_154 : i32 to vector<1x128xi32>
    %435 = arith.shrui %433, %434 : vector<1x128xi32>
    %436 = arith.xori %433, %435 : vector<1x128xi32>
    %c5_i32_155 = arith.constant 5 : i32
    %437 = vector.broadcast %c5_i32_155 : i32 to vector<1x128xi32>
    %438 = arith.shli %436, %437 : vector<1x128xi32>
    %439 = arith.xori %436, %438 : vector<1x128xi32>
    %c9_i32_156 = arith.constant 9 : i32
    %440 = vector.broadcast %c9_i32_156 : i32 to vector<1x128xi32>
    %441 = arith.shrui %439, %440 : vector<1x128xi32>
    %c1065353216_i32_157 = arith.constant 1065353216 : i32
    %442 = vector.broadcast %c1065353216_i32_157 : i32 to vector<1x128xi32>
    %443 = arith.ori %441, %442 : vector<1x128xi32>
    %444 = tpu.bitcast %443 : vector<1x128xi32> -> vector<1x128xf32>
    %cst_158 = arith.constant 2.000000e+00 : f32
    %445 = vector.broadcast %cst_158 : f32 to vector<1x128xf32>
    %446 = arith.subf %445, %444 : vector<1x128xf32>
    %447 = arith.mulf %427, %446 : vector<1x128xf32>
    %448 = arith.cmpf ogt, %447, %121 : vector<1x128xf32>
    %449 = arith.extui %448 : vector<1x128xi1> to vector<1x128xi32>
    %450 = arith.addi %430, %449 : vector<1x128xi32>
    %c13_i32_159 = arith.constant 13 : i32
    %451 = vector.broadcast %c13_i32_159 : i32 to vector<1x128xi32>
    %452 = arith.shli %439, %451 : vector<1x128xi32>
    %453 = arith.xori %439, %452 : vector<1x128xi32>
    %c17_i32_160 = arith.constant 17 : i32
    %454 = vector.broadcast %c17_i32_160 : i32 to vector<1x128xi32>
    %455 = arith.shrui %453, %454 : vector<1x128xi32>
    %456 = arith.xori %453, %455 : vector<1x128xi32>
    %c5_i32_161 = arith.constant 5 : i32
    %457 = vector.broadcast %c5_i32_161 : i32 to vector<1x128xi32>
    %458 = arith.shli %456, %457 : vector<1x128xi32>
    %459 = arith.xori %456, %458 : vector<1x128xi32>
    %c9_i32_162 = arith.constant 9 : i32
    %460 = vector.broadcast %c9_i32_162 : i32 to vector<1x128xi32>
    %461 = arith.shrui %459, %460 : vector<1x128xi32>
    %c1065353216_i32_163 = arith.constant 1065353216 : i32
    %462 = vector.broadcast %c1065353216_i32_163 : i32 to vector<1x128xi32>
    %463 = arith.ori %461, %462 : vector<1x128xi32>
    %464 = tpu.bitcast %463 : vector<1x128xi32> -> vector<1x128xf32>
    %cst_164 = arith.constant 2.000000e+00 : f32
    %465 = vector.broadcast %cst_164 : f32 to vector<1x128xf32>
    %466 = arith.subf %465, %464 : vector<1x128xf32>
    %467 = arith.mulf %447, %466 : vector<1x128xf32>
    %468 = arith.cmpf ogt, %467, %121 : vector<1x128xf32>
    %469 = arith.extui %468 : vector<1x128xi1> to vector<1x128xi32>
    %470 = arith.addi %450, %469 : vector<1x128xi32>
    %c2_i32 = arith.constant 2 : i32
    %c13_i32_165 = arith.constant 13 : i32
    %471 = vector.broadcast %c13_i32_165 : i32 to vector<1x128xi32>
    %472 = arith.shli %459, %471 : vector<1x128xi32>
    %473 = arith.xori %459, %472 : vector<1x128xi32>
    %c17_i32_166 = arith.constant 17 : i32
    %474 = vector.broadcast %c17_i32_166 : i32 to vector<1x128xi32>
    %475 = arith.shrui %473, %474 : vector<1x128xi32>
    %476 = arith.xori %473, %475 : vector<1x128xi32>
    %c5_i32_167 = arith.constant 5 : i32
    %477 = vector.broadcast %c5_i32_167 : i32 to vector<1x128xi32>
    %478 = arith.shli %476, %477 : vector<1x128xi32>
    %479 = arith.xori %476, %478 : vector<1x128xi32>
    %c9_i32_168 = arith.constant 9 : i32
    %480 = vector.broadcast %c9_i32_168 : i32 to vector<1x128xi32>
    %481 = arith.shrui %479, %480 : vector<1x128xi32>
    %c1065353216_i32_169 = arith.constant 1065353216 : i32
    %482 = vector.broadcast %c1065353216_i32_169 : i32 to vector<1x128xi32>
    %483 = arith.ori %481, %482 : vector<1x128xi32>
    %484 = tpu.bitcast %483 : vector<1x128xi32> -> vector<1x128xf32>
    %cst_170 = arith.constant 2.000000e+00 : f32
    %485 = vector.broadcast %cst_170 : f32 to vector<1x128xf32>
    %486 = arith.subf %485, %484 : vector<1x128xf32>
    %487 = arith.mulf %467, %486 : vector<1x128xf32>
    %488 = arith.cmpf ogt, %487, %121 : vector<1x128xf32>
    %489 = arith.extui %488 : vector<1x128xi1> to vector<1x128xi32>
    %490 = arith.addi %470, %489 : vector<1x128xi32>
    %c13_i32_171 = arith.constant 13 : i32
    %491 = vector.broadcast %c13_i32_171 : i32 to vector<1x128xi32>
    %492 = arith.shli %479, %491 : vector<1x128xi32>
    %493 = arith.xori %479, %492 : vector<1x128xi32>
    %c17_i32_172 = arith.constant 17 : i32
    %494 = vector.broadcast %c17_i32_172 : i32 to vector<1x128xi32>
    %495 = arith.shrui %493, %494 : vector<1x128xi32>
    %496 = arith.xori %493, %495 : vector<1x128xi32>
    %c5_i32_173 = arith.constant 5 : i32
    %497 = vector.broadcast %c5_i32_173 : i32 to vector<1x128xi32>
    %498 = arith.shli %496, %497 : vector<1x128xi32>
    %499 = arith.xori %496, %498 : vector<1x128xi32>
    %c9_i32_174 = arith.constant 9 : i32
    %500 = vector.broadcast %c9_i32_174 : i32 to vector<1x128xi32>
    %501 = arith.shrui %499, %500 : vector<1x128xi32>
    %c1065353216_i32_175 = arith.constant 1065353216 : i32
    %502 = vector.broadcast %c1065353216_i32_175 : i32 to vector<1x128xi32>
    %503 = arith.ori %501, %502 : vector<1x128xi32>
    %504 = tpu.bitcast %503 : vector<1x128xi32> -> vector<1x128xf32>
    %cst_176 = arith.constant 2.000000e+00 : f32
    %505 = vector.broadcast %cst_176 : f32 to vector<1x128xf32>
    %506 = arith.subf %505, %504 : vector<1x128xf32>
    %507 = arith.mulf %487, %506 : vector<1x128xf32>
    %508 = arith.cmpf ogt, %507, %121 : vector<1x128xf32>
    %509 = arith.extui %508 : vector<1x128xi1> to vector<1x128xi32>
    %510 = arith.addi %490, %509 : vector<1x128xi32>
    %c13_i32_177 = arith.constant 13 : i32
    %511 = vector.broadcast %c13_i32_177 : i32 to vector<1x128xi32>
    %512 = arith.shli %499, %511 : vector<1x128xi32>
    %513 = arith.xori %499, %512 : vector<1x128xi32>
    %c17_i32_178 = arith.constant 17 : i32
    %514 = vector.broadcast %c17_i32_178 : i32 to vector<1x128xi32>
    %515 = arith.shrui %513, %514 : vector<1x128xi32>
    %516 = arith.xori %513, %515 : vector<1x128xi32>
    %c5_i32_179 = arith.constant 5 : i32
    %517 = vector.broadcast %c5_i32_179 : i32 to vector<1x128xi32>
    %518 = arith.shli %516, %517 : vector<1x128xi32>
    %519 = arith.xori %516, %518 : vector<1x128xi32>
    %c9_i32_180 = arith.constant 9 : i32
    %520 = vector.broadcast %c9_i32_180 : i32 to vector<1x128xi32>
    %521 = arith.shrui %519, %520 : vector<1x128xi32>
    %c1065353216_i32_181 = arith.constant 1065353216 : i32
    %522 = vector.broadcast %c1065353216_i32_181 : i32 to vector<1x128xi32>
    %523 = arith.ori %521, %522 : vector<1x128xi32>
    %524 = tpu.bitcast %523 : vector<1x128xi32> -> vector<1x128xf32>
    %cst_182 = arith.constant 2.000000e+00 : f32
    %525 = vector.broadcast %cst_182 : f32 to vector<1x128xf32>
    %526 = arith.subf %525, %524 : vector<1x128xf32>
    %527 = arith.mulf %507, %526 : vector<1x128xf32>
    %528 = arith.cmpf ogt, %527, %121 : vector<1x128xf32>
    %529 = arith.extui %528 : vector<1x128xi1> to vector<1x128xi32>
    %530 = arith.addi %510, %529 : vector<1x128xi32>
    %c13_i32_183 = arith.constant 13 : i32
    %531 = vector.broadcast %c13_i32_183 : i32 to vector<1x128xi32>
    %532 = arith.shli %519, %531 : vector<1x128xi32>
    %533 = arith.xori %519, %532 : vector<1x128xi32>
    %c17_i32_184 = arith.constant 17 : i32
    %534 = vector.broadcast %c17_i32_184 : i32 to vector<1x128xi32>
    %535 = arith.shrui %533, %534 : vector<1x128xi32>
    %536 = arith.xori %533, %535 : vector<1x128xi32>
    %c5_i32_185 = arith.constant 5 : i32
    %537 = vector.broadcast %c5_i32_185 : i32 to vector<1x128xi32>
    %538 = arith.shli %536, %537 : vector<1x128xi32>
    %539 = arith.xori %536, %538 : vector<1x128xi32>
    %c9_i32_186 = arith.constant 9 : i32
    %540 = vector.broadcast %c9_i32_186 : i32 to vector<1x128xi32>
    %541 = arith.shrui %539, %540 : vector<1x128xi32>
    %c1065353216_i32_187 = arith.constant 1065353216 : i32
    %542 = vector.broadcast %c1065353216_i32_187 : i32 to vector<1x128xi32>
    %543 = arith.ori %541, %542 : vector<1x128xi32>
    %544 = tpu.bitcast %543 : vector<1x128xi32> -> vector<1x128xf32>
    %cst_188 = arith.constant 2.000000e+00 : f32
    %545 = vector.broadcast %cst_188 : f32 to vector<1x128xf32>
    %546 = arith.subf %545, %544 : vector<1x128xf32>
    %547 = arith.mulf %527, %546 : vector<1x128xf32>
    %548 = arith.cmpf ogt, %547, %121 : vector<1x128xf32>
    %549 = arith.extui %548 : vector<1x128xi1> to vector<1x128xi32>
    %550 = arith.addi %530, %549 : vector<1x128xi32>
    %c13_i32_189 = arith.constant 13 : i32
    %551 = vector.broadcast %c13_i32_189 : i32 to vector<1x128xi32>
    %552 = arith.shli %539, %551 : vector<1x128xi32>
    %553 = arith.xori %539, %552 : vector<1x128xi32>
    %c17_i32_190 = arith.constant 17 : i32
    %554 = vector.broadcast %c17_i32_190 : i32 to vector<1x128xi32>
    %555 = arith.shrui %553, %554 : vector<1x128xi32>
    %556 = arith.xori %553, %555 : vector<1x128xi32>
    %c5_i32_191 = arith.constant 5 : i32
    %557 = vector.broadcast %c5_i32_191 : i32 to vector<1x128xi32>
    %558 = arith.shli %556, %557 : vector<1x128xi32>
    %559 = arith.xori %556, %558 : vector<1x128xi32>
    %c9_i32_192 = arith.constant 9 : i32
    %560 = vector.broadcast %c9_i32_192 : i32 to vector<1x128xi32>
    %561 = arith.shrui %559, %560 : vector<1x128xi32>
    %c1065353216_i32_193 = arith.constant 1065353216 : i32
    %562 = vector.broadcast %c1065353216_i32_193 : i32 to vector<1x128xi32>
    %563 = arith.ori %561, %562 : vector<1x128xi32>
    %564 = tpu.bitcast %563 : vector<1x128xi32> -> vector<1x128xf32>
    %cst_194 = arith.constant 2.000000e+00 : f32
    %565 = vector.broadcast %cst_194 : f32 to vector<1x128xf32>
    %566 = arith.subf %565, %564 : vector<1x128xf32>
    %567 = arith.mulf %547, %566 : vector<1x128xf32>
    %568 = arith.cmpf ogt, %567, %121 : vector<1x128xf32>
    %569 = arith.extui %568 : vector<1x128xi1> to vector<1x128xi32>
    %570 = arith.addi %550, %569 : vector<1x128xi32>
    %c13_i32_195 = arith.constant 13 : i32
    %571 = vector.broadcast %c13_i32_195 : i32 to vector<1x128xi32>
    %572 = arith.shli %559, %571 : vector<1x128xi32>
    %573 = arith.xori %559, %572 : vector<1x128xi32>
    %c17_i32_196 = arith.constant 17 : i32
    %574 = vector.broadcast %c17_i32_196 : i32 to vector<1x128xi32>
    %575 = arith.shrui %573, %574 : vector<1x128xi32>
    %576 = arith.xori %573, %575 : vector<1x128xi32>
    %c5_i32_197 = arith.constant 5 : i32
    %577 = vector.broadcast %c5_i32_197 : i32 to vector<1x128xi32>
    %578 = arith.shli %576, %577 : vector<1x128xi32>
    %579 = arith.xori %576, %578 : vector<1x128xi32>
    %c9_i32_198 = arith.constant 9 : i32
    %580 = vector.broadcast %c9_i32_198 : i32 to vector<1x128xi32>
    %581 = arith.shrui %579, %580 : vector<1x128xi32>
    %c1065353216_i32_199 = arith.constant 1065353216 : i32
    %582 = vector.broadcast %c1065353216_i32_199 : i32 to vector<1x128xi32>
    %583 = arith.ori %581, %582 : vector<1x128xi32>
    %584 = tpu.bitcast %583 : vector<1x128xi32> -> vector<1x128xf32>
    %cst_200 = arith.constant 2.000000e+00 : f32
    %585 = vector.broadcast %cst_200 : f32 to vector<1x128xf32>
    %586 = arith.subf %585, %584 : vector<1x128xf32>
    %587 = arith.mulf %567, %586 : vector<1x128xf32>
    %588 = arith.cmpf ogt, %587, %121 : vector<1x128xf32>
    %589 = arith.extui %588 : vector<1x128xi1> to vector<1x128xi32>
    %590 = arith.addi %570, %589 : vector<1x128xi32>
    %c13_i32_201 = arith.constant 13 : i32
    %591 = vector.broadcast %c13_i32_201 : i32 to vector<1x128xi32>
    %592 = arith.shli %579, %591 : vector<1x128xi32>
    %593 = arith.xori %579, %592 : vector<1x128xi32>
    %c17_i32_202 = arith.constant 17 : i32
    %594 = vector.broadcast %c17_i32_202 : i32 to vector<1x128xi32>
    %595 = arith.shrui %593, %594 : vector<1x128xi32>
    %596 = arith.xori %593, %595 : vector<1x128xi32>
    %c5_i32_203 = arith.constant 5 : i32
    %597 = vector.broadcast %c5_i32_203 : i32 to vector<1x128xi32>
    %598 = arith.shli %596, %597 : vector<1x128xi32>
    %599 = arith.xori %596, %598 : vector<1x128xi32>
    %c9_i32_204 = arith.constant 9 : i32
    %600 = vector.broadcast %c9_i32_204 : i32 to vector<1x128xi32>
    %601 = arith.shrui %599, %600 : vector<1x128xi32>
    %c1065353216_i32_205 = arith.constant 1065353216 : i32
    %602 = vector.broadcast %c1065353216_i32_205 : i32 to vector<1x128xi32>
    %603 = arith.ori %601, %602 : vector<1x128xi32>
    %604 = tpu.bitcast %603 : vector<1x128xi32> -> vector<1x128xf32>
    %cst_206 = arith.constant 2.000000e+00 : f32
    %605 = vector.broadcast %cst_206 : f32 to vector<1x128xf32>
    %606 = arith.subf %605, %604 : vector<1x128xf32>
    %607 = arith.mulf %587, %606 : vector<1x128xf32>
    %608 = arith.cmpf ogt, %607, %121 : vector<1x128xf32>
    %609 = arith.extui %608 : vector<1x128xi1> to vector<1x128xi32>
    %610 = arith.addi %590, %609 : vector<1x128xi32>
    %c13_i32_207 = arith.constant 13 : i32
    %611 = vector.broadcast %c13_i32_207 : i32 to vector<1x128xi32>
    %612 = arith.shli %599, %611 : vector<1x128xi32>
    %613 = arith.xori %599, %612 : vector<1x128xi32>
    %c17_i32_208 = arith.constant 17 : i32
    %614 = vector.broadcast %c17_i32_208 : i32 to vector<1x128xi32>
    %615 = arith.shrui %613, %614 : vector<1x128xi32>
    %616 = arith.xori %613, %615 : vector<1x128xi32>
    %c5_i32_209 = arith.constant 5 : i32
    %617 = vector.broadcast %c5_i32_209 : i32 to vector<1x128xi32>
    %618 = arith.shli %616, %617 : vector<1x128xi32>
    %619 = arith.xori %616, %618 : vector<1x128xi32>
    %c9_i32_210 = arith.constant 9 : i32
    %620 = vector.broadcast %c9_i32_210 : i32 to vector<1x128xi32>
    %621 = arith.shrui %619, %620 : vector<1x128xi32>
    %c1065353216_i32_211 = arith.constant 1065353216 : i32
    %622 = vector.broadcast %c1065353216_i32_211 : i32 to vector<1x128xi32>
    %623 = arith.ori %621, %622 : vector<1x128xi32>
    %624 = tpu.bitcast %623 : vector<1x128xi32> -> vector<1x128xf32>
    %cst_212 = arith.constant 2.000000e+00 : f32
    %625 = vector.broadcast %cst_212 : f32 to vector<1x128xf32>
    %626 = arith.subf %625, %624 : vector<1x128xf32>
    %627 = arith.mulf %607, %626 : vector<1x128xf32>
    %628 = arith.cmpf ogt, %627, %121 : vector<1x128xf32>
    %629 = arith.extui %628 : vector<1x128xi1> to vector<1x128xi32>
    %630 = arith.addi %610, %629 : vector<1x128xi32>
    %c3_i32 = arith.constant 3 : i32
    %c13_i32_213 = arith.constant 13 : i32
    %631 = vector.broadcast %c13_i32_213 : i32 to vector<1x128xi32>
    %632 = arith.shli %619, %631 : vector<1x128xi32>
    %633 = arith.xori %619, %632 : vector<1x128xi32>
    %c17_i32_214 = arith.constant 17 : i32
    %634 = vector.broadcast %c17_i32_214 : i32 to vector<1x128xi32>
    %635 = arith.shrui %633, %634 : vector<1x128xi32>
    %636 = arith.xori %633, %635 : vector<1x128xi32>
    %c5_i32_215 = arith.constant 5 : i32
    %637 = vector.broadcast %c5_i32_215 : i32 to vector<1x128xi32>
    %638 = arith.shli %636, %637 : vector<1x128xi32>
    %639 = arith.xori %636, %638 : vector<1x128xi32>
    %c9_i32_216 = arith.constant 9 : i32
    %640 = vector.broadcast %c9_i32_216 : i32 to vector<1x128xi32>
    %641 = arith.shrui %639, %640 : vector<1x128xi32>
    %c1065353216_i32_217 = arith.constant 1065353216 : i32
    %642 = vector.broadcast %c1065353216_i32_217 : i32 to vector<1x128xi32>
    %643 = arith.ori %641, %642 : vector<1x128xi32>
    %644 = tpu.bitcast %643 : vector<1x128xi32> -> vector<1x128xf32>
    %cst_218 = arith.constant 2.000000e+00 : f32
    %645 = vector.broadcast %cst_218 : f32 to vector<1x128xf32>
    %646 = arith.subf %645, %644 : vector<1x128xf32>
    %647 = arith.mulf %627, %646 : vector<1x128xf32>
    %648 = arith.cmpf ogt, %647, %121 : vector<1x128xf32>
    %649 = arith.extui %648 : vector<1x128xi1> to vector<1x128xi32>
    %650 = arith.addi %630, %649 : vector<1x128xi32>
    %c13_i32_219 = arith.constant 13 : i32
    %651 = vector.broadcast %c13_i32_219 : i32 to vector<1x128xi32>
    %652 = arith.shli %639, %651 : vector<1x128xi32>
    %653 = arith.xori %639, %652 : vector<1x128xi32>
    %c17_i32_220 = arith.constant 17 : i32
    %654 = vector.broadcast %c17_i32_220 : i32 to vector<1x128xi32>
    %655 = arith.shrui %653, %654 : vector<1x128xi32>
    %656 = arith.xori %653, %655 : vector<1x128xi32>
    %c5_i32_221 = arith.constant 5 : i32
    %657 = vector.broadcast %c5_i32_221 : i32 to vector<1x128xi32>
    %658 = arith.shli %656, %657 : vector<1x128xi32>
    %659 = arith.xori %656, %658 : vector<1x128xi32>
    %c9_i32_222 = arith.constant 9 : i32
    %660 = vector.broadcast %c9_i32_222 : i32 to vector<1x128xi32>
    %661 = arith.shrui %659, %660 : vector<1x128xi32>
    %c1065353216_i32_223 = arith.constant 1065353216 : i32
    %662 = vector.broadcast %c1065353216_i32_223 : i32 to vector<1x128xi32>
    %663 = arith.ori %661, %662 : vector<1x128xi32>
    %664 = tpu.bitcast %663 : vector<1x128xi32> -> vector<1x128xf32>
    %cst_224 = arith.constant 2.000000e+00 : f32
    %665 = vector.broadcast %cst_224 : f32 to vector<1x128xf32>
    %666 = arith.subf %665, %664 : vector<1x128xf32>
    %667 = arith.mulf %647, %666 : vector<1x128xf32>
    %668 = arith.cmpf ogt, %667, %121 : vector<1x128xf32>
    %669 = arith.extui %668 : vector<1x128xi1> to vector<1x128xi32>
    %670 = arith.addi %650, %669 : vector<1x128xi32>
    %c13_i32_225 = arith.constant 13 : i32
    %671 = vector.broadcast %c13_i32_225 : i32 to vector<1x128xi32>
    %672 = arith.shli %659, %671 : vector<1x128xi32>
    %673 = arith.xori %659, %672 : vector<1x128xi32>
    %c17_i32_226 = arith.constant 17 : i32
    %674 = vector.broadcast %c17_i32_226 : i32 to vector<1x128xi32>
    %675 = arith.shrui %673, %674 : vector<1x128xi32>
    %676 = arith.xori %673, %675 : vector<1x128xi32>
    %c5_i32_227 = arith.constant 5 : i32
    %677 = vector.broadcast %c5_i32_227 : i32 to vector<1x128xi32>
    %678 = arith.shli %676, %677 : vector<1x128xi32>
    %679 = arith.xori %676, %678 : vector<1x128xi32>
    %c9_i32_228 = arith.constant 9 : i32
    %680 = vector.broadcast %c9_i32_228 : i32 to vector<1x128xi32>
    %681 = arith.shrui %679, %680 : vector<1x128xi32>
    %c1065353216_i32_229 = arith.constant 1065353216 : i32
    %682 = vector.broadcast %c1065353216_i32_229 : i32 to vector<1x128xi32>
    %683 = arith.ori %681, %682 : vector<1x128xi32>
    %684 = tpu.bitcast %683 : vector<1x128xi32> -> vector<1x128xf32>
    %cst_230 = arith.constant 2.000000e+00 : f32
    %685 = vector.broadcast %cst_230 : f32 to vector<1x128xf32>
    %686 = arith.subf %685, %684 : vector<1x128xf32>
    %687 = arith.mulf %667, %686 : vector<1x128xf32>
    %688 = arith.cmpf ogt, %687, %121 : vector<1x128xf32>
    %689 = arith.extui %688 : vector<1x128xi1> to vector<1x128xi32>
    %690 = arith.addi %670, %689 : vector<1x128xi32>
    %c13_i32_231 = arith.constant 13 : i32
    %691 = vector.broadcast %c13_i32_231 : i32 to vector<1x128xi32>
    %692 = arith.shli %679, %691 : vector<1x128xi32>
    %693 = arith.xori %679, %692 : vector<1x128xi32>
    %c17_i32_232 = arith.constant 17 : i32
    %694 = vector.broadcast %c17_i32_232 : i32 to vector<1x128xi32>
    %695 = arith.shrui %693, %694 : vector<1x128xi32>
    %696 = arith.xori %693, %695 : vector<1x128xi32>
    %c5_i32_233 = arith.constant 5 : i32
    %697 = vector.broadcast %c5_i32_233 : i32 to vector<1x128xi32>
    %698 = arith.shli %696, %697 : vector<1x128xi32>
    %699 = arith.xori %696, %698 : vector<1x128xi32>
    %c9_i32_234 = arith.constant 9 : i32
    %700 = vector.broadcast %c9_i32_234 : i32 to vector<1x128xi32>
    %701 = arith.shrui %699, %700 : vector<1x128xi32>
    %c1065353216_i32_235 = arith.constant 1065353216 : i32
    %702 = vector.broadcast %c1065353216_i32_235 : i32 to vector<1x128xi32>
    %703 = arith.ori %701, %702 : vector<1x128xi32>
    %704 = tpu.bitcast %703 : vector<1x128xi32> -> vector<1x128xf32>
    %cst_236 = arith.constant 2.000000e+00 : f32
    %705 = vector.broadcast %cst_236 : f32 to vector<1x128xf32>
    %706 = arith.subf %705, %704 : vector<1x128xf32>
    %707 = arith.mulf %687, %706 : vector<1x128xf32>
    %708 = arith.cmpf ogt, %707, %121 : vector<1x128xf32>
    %709 = arith.extui %708 : vector<1x128xi1> to vector<1x128xi32>
    %710 = arith.addi %690, %709 : vector<1x128xi32>
    %c13_i32_237 = arith.constant 13 : i32
    %711 = vector.broadcast %c13_i32_237 : i32 to vector<1x128xi32>
    %712 = arith.shli %699, %711 : vector<1x128xi32>
    %713 = arith.xori %699, %712 : vector<1x128xi32>
    %c17_i32_238 = arith.constant 17 : i32
    %714 = vector.broadcast %c17_i32_238 : i32 to vector<1x128xi32>
    %715 = arith.shrui %713, %714 : vector<1x128xi32>
    %716 = arith.xori %713, %715 : vector<1x128xi32>
    %c5_i32_239 = arith.constant 5 : i32
    %717 = vector.broadcast %c5_i32_239 : i32 to vector<1x128xi32>
    %718 = arith.shli %716, %717 : vector<1x128xi32>
    %719 = arith.xori %716, %718 : vector<1x128xi32>
    %c9_i32_240 = arith.constant 9 : i32
    %720 = vector.broadcast %c9_i32_240 : i32 to vector<1x128xi32>
    %721 = arith.shrui %719, %720 : vector<1x128xi32>
    %c1065353216_i32_241 = arith.constant 1065353216 : i32
    %722 = vector.broadcast %c1065353216_i32_241 : i32 to vector<1x128xi32>
    %723 = arith.ori %721, %722 : vector<1x128xi32>
    %724 = tpu.bitcast %723 : vector<1x128xi32> -> vector<1x128xf32>
    %cst_242 = arith.constant 2.000000e+00 : f32
    %725 = vector.broadcast %cst_242 : f32 to vector<1x128xf32>
    %726 = arith.subf %725, %724 : vector<1x128xf32>
    %727 = arith.mulf %707, %726 : vector<1x128xf32>
    %728 = arith.cmpf ogt, %727, %121 : vector<1x128xf32>
    %729 = arith.extui %728 : vector<1x128xi1> to vector<1x128xi32>
    %730 = arith.addi %710, %729 : vector<1x128xi32>
    %c13_i32_243 = arith.constant 13 : i32
    %731 = vector.broadcast %c13_i32_243 : i32 to vector<1x128xi32>
    %732 = arith.shli %719, %731 : vector<1x128xi32>
    %733 = arith.xori %719, %732 : vector<1x128xi32>
    %c17_i32_244 = arith.constant 17 : i32
    %734 = vector.broadcast %c17_i32_244 : i32 to vector<1x128xi32>
    %735 = arith.shrui %733, %734 : vector<1x128xi32>
    %736 = arith.xori %733, %735 : vector<1x128xi32>
    %c5_i32_245 = arith.constant 5 : i32
    %737 = vector.broadcast %c5_i32_245 : i32 to vector<1x128xi32>
    %738 = arith.shli %736, %737 : vector<1x128xi32>
    %739 = arith.xori %736, %738 : vector<1x128xi32>
    %c9_i32_246 = arith.constant 9 : i32
    %740 = vector.broadcast %c9_i32_246 : i32 to vector<1x128xi32>
    %741 = arith.shrui %739, %740 : vector<1x128xi32>
    %c1065353216_i32_247 = arith.constant 1065353216 : i32
    %742 = vector.broadcast %c1065353216_i32_247 : i32 to vector<1x128xi32>
    %743 = arith.ori %741, %742 : vector<1x128xi32>
    %744 = tpu.bitcast %743 : vector<1x128xi32> -> vector<1x128xf32>
    %cst_248 = arith.constant 2.000000e+00 : f32
    %745 = vector.broadcast %cst_248 : f32 to vector<1x128xf32>
    %746 = arith.subf %745, %744 : vector<1x128xf32>
    %747 = arith.mulf %727, %746 : vector<1x128xf32>
    %748 = arith.cmpf ogt, %747, %121 : vector<1x128xf32>
    %749 = arith.extui %748 : vector<1x128xi1> to vector<1x128xi32>
    %750 = arith.addi %730, %749 : vector<1x128xi32>
    %c13_i32_249 = arith.constant 13 : i32
    %751 = vector.broadcast %c13_i32_249 : i32 to vector<1x128xi32>
    %752 = arith.shli %739, %751 : vector<1x128xi32>
    %753 = arith.xori %739, %752 : vector<1x128xi32>
    %c17_i32_250 = arith.constant 17 : i32
    %754 = vector.broadcast %c17_i32_250 : i32 to vector<1x128xi32>
    %755 = arith.shrui %753, %754 : vector<1x128xi32>
    %756 = arith.xori %753, %755 : vector<1x128xi32>
    %c5_i32_251 = arith.constant 5 : i32
    %757 = vector.broadcast %c5_i32_251 : i32 to vector<1x128xi32>
    %758 = arith.shli %756, %757 : vector<1x128xi32>
    %759 = arith.xori %756, %758 : vector<1x128xi32>
    %c9_i32_252 = arith.constant 9 : i32
    %760 = vector.broadcast %c9_i32_252 : i32 to vector<1x128xi32>
    %761 = arith.shrui %759, %760 : vector<1x128xi32>
    %c1065353216_i32_253 = arith.constant 1065353216 : i32
    %762 = vector.broadcast %c1065353216_i32_253 : i32 to vector<1x128xi32>
    %763 = arith.ori %761, %762 : vector<1x128xi32>
    %764 = tpu.bitcast %763 : vector<1x128xi32> -> vector<1x128xf32>
    %cst_254 = arith.constant 2.000000e+00 : f32
    %765 = vector.broadcast %cst_254 : f32 to vector<1x128xf32>
    %766 = arith.subf %765, %764 : vector<1x128xf32>
    %767 = arith.mulf %747, %766 : vector<1x128xf32>
    %768 = arith.cmpf ogt, %767, %121 : vector<1x128xf32>
    %769 = arith.extui %768 : vector<1x128xi1> to vector<1x128xi32>
    %770 = arith.addi %750, %769 : vector<1x128xi32>
    %c13_i32_255 = arith.constant 13 : i32
    %771 = vector.broadcast %c13_i32_255 : i32 to vector<1x128xi32>
    %772 = arith.shli %759, %771 : vector<1x128xi32>
    %773 = arith.xori %759, %772 : vector<1x128xi32>
    %c17_i32_256 = arith.constant 17 : i32
    %774 = vector.broadcast %c17_i32_256 : i32 to vector<1x128xi32>
    %775 = arith.shrui %773, %774 : vector<1x128xi32>
    %776 = arith.xori %773, %775 : vector<1x128xi32>
    %c5_i32_257 = arith.constant 5 : i32
    %777 = vector.broadcast %c5_i32_257 : i32 to vector<1x128xi32>
    %778 = arith.shli %776, %777 : vector<1x128xi32>
    %779 = arith.xori %776, %778 : vector<1x128xi32>
    %c9_i32_258 = arith.constant 9 : i32
    %780 = vector.broadcast %c9_i32_258 : i32 to vector<1x128xi32>
    %781 = arith.shrui %779, %780 : vector<1x128xi32>
    %c1065353216_i32_259 = arith.constant 1065353216 : i32
    %782 = vector.broadcast %c1065353216_i32_259 : i32 to vector<1x128xi32>
    %783 = arith.ori %781, %782 : vector<1x128xi32>
    %784 = tpu.bitcast %783 : vector<1x128xi32> -> vector<1x128xf32>
    %cst_260 = arith.constant 2.000000e+00 : f32
    %785 = vector.broadcast %cst_260 : f32 to vector<1x128xf32>
    %786 = arith.subf %785, %784 : vector<1x128xf32>
    %787 = arith.mulf %767, %786 : vector<1x128xf32>
    %788 = arith.cmpf ogt, %787, %121 : vector<1x128xf32>
    %789 = arith.extui %788 : vector<1x128xi1> to vector<1x128xi32>
    %790 = arith.addi %770, %789 : vector<1x128xi32>
    %c4_i32 = arith.constant 4 : i32
    %c13_i32_261 = arith.constant 13 : i32
    %791 = vector.broadcast %c13_i32_261 : i32 to vector<1x128xi32>
    %792 = arith.shli %779, %791 : vector<1x128xi32>
    %793 = arith.xori %779, %792 : vector<1x128xi32>
    %c17_i32_262 = arith.constant 17 : i32
    %794 = vector.broadcast %c17_i32_262 : i32 to vector<1x128xi32>
    %795 = arith.shrui %793, %794 : vector<1x128xi32>
    %796 = arith.xori %793, %795 : vector<1x128xi32>
    %c5_i32_263 = arith.constant 5 : i32
    %797 = vector.broadcast %c5_i32_263 : i32 to vector<1x128xi32>
    %798 = arith.shli %796, %797 : vector<1x128xi32>
    %799 = arith.xori %796, %798 : vector<1x128xi32>
    %c9_i32_264 = arith.constant 9 : i32
    %800 = vector.broadcast %c9_i32_264 : i32 to vector<1x128xi32>
    %801 = arith.shrui %799, %800 : vector<1x128xi32>
    %c1065353216_i32_265 = arith.constant 1065353216 : i32
    %802 = vector.broadcast %c1065353216_i32_265 : i32 to vector<1x128xi32>
    %803 = arith.ori %801, %802 : vector<1x128xi32>
    %804 = tpu.bitcast %803 : vector<1x128xi32> -> vector<1x128xf32>
    %cst_266 = arith.constant 2.000000e+00 : f32
    %805 = vector.broadcast %cst_266 : f32 to vector<1x128xf32>
    %806 = arith.subf %805, %804 : vector<1x128xf32>
    %807 = arith.mulf %787, %806 : vector<1x128xf32>
    %808 = arith.cmpf ogt, %807, %121 : vector<1x128xf32>
    %809 = arith.extui %808 : vector<1x128xi1> to vector<1x128xi32>
    %810 = arith.addi %790, %809 : vector<1x128xi32>
    %c13_i32_267 = arith.constant 13 : i32
    %811 = vector.broadcast %c13_i32_267 : i32 to vector<1x128xi32>
    %812 = arith.shli %799, %811 : vector<1x128xi32>
    %813 = arith.xori %799, %812 : vector<1x128xi32>
    %c17_i32_268 = arith.constant 17 : i32
    %814 = vector.broadcast %c17_i32_268 : i32 to vector<1x128xi32>
    %815 = arith.shrui %813, %814 : vector<1x128xi32>
    %816 = arith.xori %813, %815 : vector<1x128xi32>
    %c5_i32_269 = arith.constant 5 : i32
    %817 = vector.broadcast %c5_i32_269 : i32 to vector<1x128xi32>
    %818 = arith.shli %816, %817 : vector<1x128xi32>
    %819 = arith.xori %816, %818 : vector<1x128xi32>
    %c9_i32_270 = arith.constant 9 : i32
    %820 = vector.broadcast %c9_i32_270 : i32 to vector<1x128xi32>
    %821 = arith.shrui %819, %820 : vector<1x128xi32>
    %c1065353216_i32_271 = arith.constant 1065353216 : i32
    %822 = vector.broadcast %c1065353216_i32_271 : i32 to vector<1x128xi32>
    %823 = arith.ori %821, %822 : vector<1x128xi32>
    %824 = tpu.bitcast %823 : vector<1x128xi32> -> vector<1x128xf32>
    %cst_272 = arith.constant 2.000000e+00 : f32
    %825 = vector.broadcast %cst_272 : f32 to vector<1x128xf32>
    %826 = arith.subf %825, %824 : vector<1x128xf32>
    %827 = arith.mulf %807, %826 : vector<1x128xf32>
    %828 = arith.cmpf ogt, %827, %121 : vector<1x128xf32>
    %829 = arith.extui %828 : vector<1x128xi1> to vector<1x128xi32>
    %830 = arith.addi %810, %829 : vector<1x128xi32>
    %c13_i32_273 = arith.constant 13 : i32
    %831 = vector.broadcast %c13_i32_273 : i32 to vector<1x128xi32>
    %832 = arith.shli %819, %831 : vector<1x128xi32>
    %833 = arith.xori %819, %832 : vector<1x128xi32>
    %c17_i32_274 = arith.constant 17 : i32
    %834 = vector.broadcast %c17_i32_274 : i32 to vector<1x128xi32>
    %835 = arith.shrui %833, %834 : vector<1x128xi32>
    %836 = arith.xori %833, %835 : vector<1x128xi32>
    %c5_i32_275 = arith.constant 5 : i32
    %837 = vector.broadcast %c5_i32_275 : i32 to vector<1x128xi32>
    %838 = arith.shli %836, %837 : vector<1x128xi32>
    %839 = arith.xori %836, %838 : vector<1x128xi32>
    %c9_i32_276 = arith.constant 9 : i32
    %840 = vector.broadcast %c9_i32_276 : i32 to vector<1x128xi32>
    %841 = arith.shrui %839, %840 : vector<1x128xi32>
    %c1065353216_i32_277 = arith.constant 1065353216 : i32
    %842 = vector.broadcast %c1065353216_i32_277 : i32 to vector<1x128xi32>
    %843 = arith.ori %841, %842 : vector<1x128xi32>
    %844 = tpu.bitcast %843 : vector<1x128xi32> -> vector<1x128xf32>
    %cst_278 = arith.constant 2.000000e+00 : f32
    %845 = vector.broadcast %cst_278 : f32 to vector<1x128xf32>
    %846 = arith.subf %845, %844 : vector<1x128xf32>
    %847 = arith.mulf %827, %846 : vector<1x128xf32>
    %848 = arith.cmpf ogt, %847, %121 : vector<1x128xf32>
    %849 = arith.extui %848 : vector<1x128xi1> to vector<1x128xi32>
    %850 = arith.addi %830, %849 : vector<1x128xi32>
    %c13_i32_279 = arith.constant 13 : i32
    %851 = vector.broadcast %c13_i32_279 : i32 to vector<1x128xi32>
    %852 = arith.shli %839, %851 : vector<1x128xi32>
    %853 = arith.xori %839, %852 : vector<1x128xi32>
    %c17_i32_280 = arith.constant 17 : i32
    %854 = vector.broadcast %c17_i32_280 : i32 to vector<1x128xi32>
    %855 = arith.shrui %853, %854 : vector<1x128xi32>
    %856 = arith.xori %853, %855 : vector<1x128xi32>
    %c5_i32_281 = arith.constant 5 : i32
    %857 = vector.broadcast %c5_i32_281 : i32 to vector<1x128xi32>
    %858 = arith.shli %856, %857 : vector<1x128xi32>
    %859 = arith.xori %856, %858 : vector<1x128xi32>
    %c9_i32_282 = arith.constant 9 : i32
    %860 = vector.broadcast %c9_i32_282 : i32 to vector<1x128xi32>
    %861 = arith.shrui %859, %860 : vector<1x128xi32>
    %c1065353216_i32_283 = arith.constant 1065353216 : i32
    %862 = vector.broadcast %c1065353216_i32_283 : i32 to vector<1x128xi32>
    %863 = arith.ori %861, %862 : vector<1x128xi32>
    %864 = tpu.bitcast %863 : vector<1x128xi32> -> vector<1x128xf32>
    %cst_284 = arith.constant 2.000000e+00 : f32
    %865 = vector.broadcast %cst_284 : f32 to vector<1x128xf32>
    %866 = arith.subf %865, %864 : vector<1x128xf32>
    %867 = arith.mulf %847, %866 : vector<1x128xf32>
    %868 = arith.cmpf ogt, %867, %121 : vector<1x128xf32>
    %869 = arith.extui %868 : vector<1x128xi1> to vector<1x128xi32>
    %870 = arith.addi %850, %869 : vector<1x128xi32>
    %c13_i32_285 = arith.constant 13 : i32
    %871 = vector.broadcast %c13_i32_285 : i32 to vector<1x128xi32>
    %872 = arith.shli %859, %871 : vector<1x128xi32>
    %873 = arith.xori %859, %872 : vector<1x128xi32>
    %c17_i32_286 = arith.constant 17 : i32
    %874 = vector.broadcast %c17_i32_286 : i32 to vector<1x128xi32>
    %875 = arith.shrui %873, %874 : vector<1x128xi32>
    %876 = arith.xori %873, %875 : vector<1x128xi32>
    %c5_i32_287 = arith.constant 5 : i32
    %877 = vector.broadcast %c5_i32_287 : i32 to vector<1x128xi32>
    %878 = arith.shli %876, %877 : vector<1x128xi32>
    %879 = arith.xori %876, %878 : vector<1x128xi32>
    %c9_i32_288 = arith.constant 9 : i32
    %880 = vector.broadcast %c9_i32_288 : i32 to vector<1x128xi32>
    %881 = arith.shrui %879, %880 : vector<1x128xi32>
    %c1065353216_i32_289 = arith.constant 1065353216 : i32
    %882 = vector.broadcast %c1065353216_i32_289 : i32 to vector<1x128xi32>
    %883 = arith.ori %881, %882 : vector<1x128xi32>
    %884 = tpu.bitcast %883 : vector<1x128xi32> -> vector<1x128xf32>
    %cst_290 = arith.constant 2.000000e+00 : f32
    %885 = vector.broadcast %cst_290 : f32 to vector<1x128xf32>
    %886 = arith.subf %885, %884 : vector<1x128xf32>
    %887 = arith.mulf %867, %886 : vector<1x128xf32>
    %888 = arith.cmpf ogt, %887, %121 : vector<1x128xf32>
    %889 = arith.extui %888 : vector<1x128xi1> to vector<1x128xi32>
    %890 = arith.addi %870, %889 : vector<1x128xi32>
    %c13_i32_291 = arith.constant 13 : i32
    %891 = vector.broadcast %c13_i32_291 : i32 to vector<1x128xi32>
    %892 = arith.shli %879, %891 : vector<1x128xi32>
    %893 = arith.xori %879, %892 : vector<1x128xi32>
    %c17_i32_292 = arith.constant 17 : i32
    %894 = vector.broadcast %c17_i32_292 : i32 to vector<1x128xi32>
    %895 = arith.shrui %893, %894 : vector<1x128xi32>
    %896 = arith.xori %893, %895 : vector<1x128xi32>
    %c5_i32_293 = arith.constant 5 : i32
    %897 = vector.broadcast %c5_i32_293 : i32 to vector<1x128xi32>
    %898 = arith.shli %896, %897 : vector<1x128xi32>
    %899 = arith.xori %896, %898 : vector<1x128xi32>
    %c9_i32_294 = arith.constant 9 : i32
    %900 = vector.broadcast %c9_i32_294 : i32 to vector<1x128xi32>
    %901 = arith.shrui %899, %900 : vector<1x128xi32>
    %c1065353216_i32_295 = arith.constant 1065353216 : i32
    %902 = vector.broadcast %c1065353216_i32_295 : i32 to vector<1x128xi32>
    %903 = arith.ori %901, %902 : vector<1x128xi32>
    %904 = tpu.bitcast %903 : vector<1x128xi32> -> vector<1x128xf32>
    %cst_296 = arith.constant 2.000000e+00 : f32
    %905 = vector.broadcast %cst_296 : f32 to vector<1x128xf32>
    %906 = arith.subf %905, %904 : vector<1x128xf32>
    %907 = arith.mulf %887, %906 : vector<1x128xf32>
    %908 = arith.cmpf ogt, %907, %121 : vector<1x128xf32>
    %909 = arith.extui %908 : vector<1x128xi1> to vector<1x128xi32>
    %910 = arith.addi %890, %909 : vector<1x128xi32>
    %c13_i32_297 = arith.constant 13 : i32
    %911 = vector.broadcast %c13_i32_297 : i32 to vector<1x128xi32>
    %912 = arith.shli %899, %911 : vector<1x128xi32>
    %913 = arith.xori %899, %912 : vector<1x128xi32>
    %c17_i32_298 = arith.constant 17 : i32
    %914 = vector.broadcast %c17_i32_298 : i32 to vector<1x128xi32>
    %915 = arith.shrui %913, %914 : vector<1x128xi32>
    %916 = arith.xori %913, %915 : vector<1x128xi32>
    %c5_i32_299 = arith.constant 5 : i32
    %917 = vector.broadcast %c5_i32_299 : i32 to vector<1x128xi32>
    %918 = arith.shli %916, %917 : vector<1x128xi32>
    %919 = arith.xori %916, %918 : vector<1x128xi32>
    %c9_i32_300 = arith.constant 9 : i32
    %920 = vector.broadcast %c9_i32_300 : i32 to vector<1x128xi32>
    %921 = arith.shrui %919, %920 : vector<1x128xi32>
    %c1065353216_i32_301 = arith.constant 1065353216 : i32
    %922 = vector.broadcast %c1065353216_i32_301 : i32 to vector<1x128xi32>
    %923 = arith.ori %921, %922 : vector<1x128xi32>
    %924 = tpu.bitcast %923 : vector<1x128xi32> -> vector<1x128xf32>
    %cst_302 = arith.constant 2.000000e+00 : f32
    %925 = vector.broadcast %cst_302 : f32 to vector<1x128xf32>
    %926 = arith.subf %925, %924 : vector<1x128xf32>
    %927 = arith.mulf %907, %926 : vector<1x128xf32>
    %928 = arith.cmpf ogt, %927, %121 : vector<1x128xf32>
    %929 = arith.extui %928 : vector<1x128xi1> to vector<1x128xi32>
    %930 = arith.addi %910, %929 : vector<1x128xi32>
    %c13_i32_303 = arith.constant 13 : i32
    %931 = vector.broadcast %c13_i32_303 : i32 to vector<1x128xi32>
    %932 = arith.shli %919, %931 : vector<1x128xi32>
    %933 = arith.xori %919, %932 : vector<1x128xi32>
    %c17_i32_304 = arith.constant 17 : i32
    %934 = vector.broadcast %c17_i32_304 : i32 to vector<1x128xi32>
    %935 = arith.shrui %933, %934 : vector<1x128xi32>
    %936 = arith.xori %933, %935 : vector<1x128xi32>
    %c5_i32_305 = arith.constant 5 : i32
    %937 = vector.broadcast %c5_i32_305 : i32 to vector<1x128xi32>
    %938 = arith.shli %936, %937 : vector<1x128xi32>
    %939 = arith.xori %936, %938 : vector<1x128xi32>
    %c9_i32_306 = arith.constant 9 : i32
    %940 = vector.broadcast %c9_i32_306 : i32 to vector<1x128xi32>
    %941 = arith.shrui %939, %940 : vector<1x128xi32>
    %c1065353216_i32_307 = arith.constant 1065353216 : i32
    %942 = vector.broadcast %c1065353216_i32_307 : i32 to vector<1x128xi32>
    %943 = arith.ori %941, %942 : vector<1x128xi32>
    %944 = tpu.bitcast %943 : vector<1x128xi32> -> vector<1x128xf32>
    %cst_308 = arith.constant 2.000000e+00 : f32
    %945 = vector.broadcast %cst_308 : f32 to vector<1x128xf32>
    %946 = arith.subf %945, %944 : vector<1x128xf32>
    %947 = arith.mulf %927, %946 : vector<1x128xf32>
    %948 = arith.cmpf ogt, %947, %121 : vector<1x128xf32>
    %949 = arith.extui %948 : vector<1x128xi1> to vector<1x128xi32>
    %950 = arith.addi %930, %949 : vector<1x128xi32>
    %c5_i32_309 = arith.constant 5 : i32
    %c13_i32_310 = arith.constant 13 : i32
    %951 = vector.broadcast %c13_i32_310 : i32 to vector<1x128xi32>
    %952 = arith.shli %939, %951 : vector<1x128xi32>
    %953 = arith.xori %939, %952 : vector<1x128xi32>
    %c17_i32_311 = arith.constant 17 : i32
    %954 = vector.broadcast %c17_i32_311 : i32 to vector<1x128xi32>
    %955 = arith.shrui %953, %954 : vector<1x128xi32>
    %956 = arith.xori %953, %955 : vector<1x128xi32>
    %c5_i32_312 = arith.constant 5 : i32
    %957 = vector.broadcast %c5_i32_312 : i32 to vector<1x128xi32>
    %958 = arith.shli %956, %957 : vector<1x128xi32>
    %959 = arith.xori %956, %958 : vector<1x128xi32>
    %c9_i32_313 = arith.constant 9 : i32
    %960 = vector.broadcast %c9_i32_313 : i32 to vector<1x128xi32>
    %961 = arith.shrui %959, %960 : vector<1x128xi32>
    %c1065353216_i32_314 = arith.constant 1065353216 : i32
    %962 = vector.broadcast %c1065353216_i32_314 : i32 to vector<1x128xi32>
    %963 = arith.ori %961, %962 : vector<1x128xi32>
    %964 = tpu.bitcast %963 : vector<1x128xi32> -> vector<1x128xf32>
    %cst_315 = arith.constant 2.000000e+00 : f32
    %965 = vector.broadcast %cst_315 : f32 to vector<1x128xf32>
    %966 = arith.subf %965, %964 : vector<1x128xf32>
    %967 = arith.mulf %947, %966 : vector<1x128xf32>
    %968 = arith.cmpf ogt, %967, %121 : vector<1x128xf32>
    %969 = arith.extui %968 : vector<1x128xi1> to vector<1x128xi32>
    %970 = arith.addi %950, %969 : vector<1x128xi32>
    %c13_i32_316 = arith.constant 13 : i32
    %971 = vector.broadcast %c13_i32_316 : i32 to vector<1x128xi32>
    %972 = arith.shli %959, %971 : vector<1x128xi32>
    %973 = arith.xori %959, %972 : vector<1x128xi32>
    %c17_i32_317 = arith.constant 17 : i32
    %974 = vector.broadcast %c17_i32_317 : i32 to vector<1x128xi32>
    %975 = arith.shrui %973, %974 : vector<1x128xi32>
    %976 = arith.xori %973, %975 : vector<1x128xi32>
    %c5_i32_318 = arith.constant 5 : i32
    %977 = vector.broadcast %c5_i32_318 : i32 to vector<1x128xi32>
    %978 = arith.shli %976, %977 : vector<1x128xi32>
    %979 = arith.xori %976, %978 : vector<1x128xi32>
    %c9_i32_319 = arith.constant 9 : i32
    %980 = vector.broadcast %c9_i32_319 : i32 to vector<1x128xi32>
    %981 = arith.shrui %979, %980 : vector<1x128xi32>
    %c1065353216_i32_320 = arith.constant 1065353216 : i32
    %982 = vector.broadcast %c1065353216_i32_320 : i32 to vector<1x128xi32>
    %983 = arith.ori %981, %982 : vector<1x128xi32>
    %984 = tpu.bitcast %983 : vector<1x128xi32> -> vector<1x128xf32>
    %cst_321 = arith.constant 2.000000e+00 : f32
    %985 = vector.broadcast %cst_321 : f32 to vector<1x128xf32>
    %986 = arith.subf %985, %984 : vector<1x128xf32>
    %987 = arith.mulf %967, %986 : vector<1x128xf32>
    %988 = arith.cmpf ogt, %987, %121 : vector<1x128xf32>
    %989 = arith.extui %988 : vector<1x128xi1> to vector<1x128xi32>
    %990 = arith.addi %970, %989 : vector<1x128xi32>
    %c13_i32_322 = arith.constant 13 : i32
    %991 = vector.broadcast %c13_i32_322 : i32 to vector<1x128xi32>
    %992 = arith.shli %979, %991 : vector<1x128xi32>
    %993 = arith.xori %979, %992 : vector<1x128xi32>
    %c17_i32_323 = arith.constant 17 : i32
    %994 = vector.broadcast %c17_i32_323 : i32 to vector<1x128xi32>
    %995 = arith.shrui %993, %994 : vector<1x128xi32>
    %996 = arith.xori %993, %995 : vector<1x128xi32>
    %c5_i32_324 = arith.constant 5 : i32
    %997 = vector.broadcast %c5_i32_324 : i32 to vector<1x128xi32>
    %998 = arith.shli %996, %997 : vector<1x128xi32>
    %999 = arith.xori %996, %998 : vector<1x128xi32>
    %c9_i32_325 = arith.constant 9 : i32
    %1000 = vector.broadcast %c9_i32_325 : i32 to vector<1x128xi32>
    %1001 = arith.shrui %999, %1000 : vector<1x128xi32>
    %c1065353216_i32_326 = arith.constant 1065353216 : i32
    %1002 = vector.broadcast %c1065353216_i32_326 : i32 to vector<1x128xi32>
    %1003 = arith.ori %1001, %1002 : vector<1x128xi32>
    %1004 = tpu.bitcast %1003 : vector<1x128xi32> -> vector<1x128xf32>
    %cst_327 = arith.constant 2.000000e+00 : f32
    %1005 = vector.broadcast %cst_327 : f32 to vector<1x128xf32>
    %1006 = arith.subf %1005, %1004 : vector<1x128xf32>
    %1007 = arith.mulf %987, %1006 : vector<1x128xf32>
    %1008 = arith.cmpf ogt, %1007, %121 : vector<1x128xf32>
    %1009 = arith.extui %1008 : vector<1x128xi1> to vector<1x128xi32>
    %1010 = arith.addi %990, %1009 : vector<1x128xi32>
    %c13_i32_328 = arith.constant 13 : i32
    %1011 = vector.broadcast %c13_i32_328 : i32 to vector<1x128xi32>
    %1012 = arith.shli %999, %1011 : vector<1x128xi32>
    %1013 = arith.xori %999, %1012 : vector<1x128xi32>
    %c17_i32_329 = arith.constant 17 : i32
    %1014 = vector.broadcast %c17_i32_329 : i32 to vector<1x128xi32>
    %1015 = arith.shrui %1013, %1014 : vector<1x128xi32>
    %1016 = arith.xori %1013, %1015 : vector<1x128xi32>
    %c5_i32_330 = arith.constant 5 : i32
    %1017 = vector.broadcast %c5_i32_330 : i32 to vector<1x128xi32>
    %1018 = arith.shli %1016, %1017 : vector<1x128xi32>
    %1019 = arith.xori %1016, %1018 : vector<1x128xi32>
    %c9_i32_331 = arith.constant 9 : i32
    %1020 = vector.broadcast %c9_i32_331 : i32 to vector<1x128xi32>
    %1021 = arith.shrui %1019, %1020 : vector<1x128xi32>
    %c1065353216_i32_332 = arith.constant 1065353216 : i32
    %1022 = vector.broadcast %c1065353216_i32_332 : i32 to vector<1x128xi32>
    %1023 = arith.ori %1021, %1022 : vector<1x128xi32>
    %1024 = tpu.bitcast %1023 : vector<1x128xi32> -> vector<1x128xf32>
    %cst_333 = arith.constant 2.000000e+00 : f32
    %1025 = vector.broadcast %cst_333 : f32 to vector<1x128xf32>
    %1026 = arith.subf %1025, %1024 : vector<1x128xf32>
    %1027 = arith.mulf %1007, %1026 : vector<1x128xf32>
    %1028 = arith.cmpf ogt, %1027, %121 : vector<1x128xf32>
    %1029 = arith.extui %1028 : vector<1x128xi1> to vector<1x128xi32>
    %1030 = arith.addi %1010, %1029 : vector<1x128xi32>
    %c13_i32_334 = arith.constant 13 : i32
    %1031 = vector.broadcast %c13_i32_334 : i32 to vector<1x128xi32>
    %1032 = arith.shli %1019, %1031 : vector<1x128xi32>
    %1033 = arith.xori %1019, %1032 : vector<1x128xi32>
    %c17_i32_335 = arith.constant 17 : i32
    %1034 = vector.broadcast %c17_i32_335 : i32 to vector<1x128xi32>
    %1035 = arith.shrui %1033, %1034 : vector<1x128xi32>
    %1036 = arith.xori %1033, %1035 : vector<1x128xi32>
    %c5_i32_336 = arith.constant 5 : i32
    %1037 = vector.broadcast %c5_i32_336 : i32 to vector<1x128xi32>
    %1038 = arith.shli %1036, %1037 : vector<1x128xi32>
    %1039 = arith.xori %1036, %1038 : vector<1x128xi32>
    %c9_i32_337 = arith.constant 9 : i32
    %1040 = vector.broadcast %c9_i32_337 : i32 to vector<1x128xi32>
    %1041 = arith.shrui %1039, %1040 : vector<1x128xi32>
    %c1065353216_i32_338 = arith.constant 1065353216 : i32
    %1042 = vector.broadcast %c1065353216_i32_338 : i32 to vector<1x128xi32>
    %1043 = arith.ori %1041, %1042 : vector<1x128xi32>
    %1044 = tpu.bitcast %1043 : vector<1x128xi32> -> vector<1x128xf32>
    %cst_339 = arith.constant 2.000000e+00 : f32
    %1045 = vector.broadcast %cst_339 : f32 to vector<1x128xf32>
    %1046 = arith.subf %1045, %1044 : vector<1x128xf32>
    %1047 = arith.mulf %1027, %1046 : vector<1x128xf32>
    %1048 = arith.cmpf ogt, %1047, %121 : vector<1x128xf32>
    %1049 = arith.extui %1048 : vector<1x128xi1> to vector<1x128xi32>
    %1050 = arith.addi %1030, %1049 : vector<1x128xi32>
    %c13_i32_340 = arith.constant 13 : i32
    %1051 = vector.broadcast %c13_i32_340 : i32 to vector<1x128xi32>
    %1052 = arith.shli %1039, %1051 : vector<1x128xi32>
    %1053 = arith.xori %1039, %1052 : vector<1x128xi32>
    %c17_i32_341 = arith.constant 17 : i32
    %1054 = vector.broadcast %c17_i32_341 : i32 to vector<1x128xi32>
    %1055 = arith.shrui %1053, %1054 : vector<1x128xi32>
    %1056 = arith.xori %1053, %1055 : vector<1x128xi32>
    %c5_i32_342 = arith.constant 5 : i32
    %1057 = vector.broadcast %c5_i32_342 : i32 to vector<1x128xi32>
    %1058 = arith.shli %1056, %1057 : vector<1x128xi32>
    %1059 = arith.xori %1056, %1058 : vector<1x128xi32>
    %c9_i32_343 = arith.constant 9 : i32
    %1060 = vector.broadcast %c9_i32_343 : i32 to vector<1x128xi32>
    %1061 = arith.shrui %1059, %1060 : vector<1x128xi32>
    %c1065353216_i32_344 = arith.constant 1065353216 : i32
    %1062 = vector.broadcast %c1065353216_i32_344 : i32 to vector<1x128xi32>
    %1063 = arith.ori %1061, %1062 : vector<1x128xi32>
    %1064 = tpu.bitcast %1063 : vector<1x128xi32> -> vector<1x128xf32>
    %cst_345 = arith.constant 2.000000e+00 : f32
    %1065 = vector.broadcast %cst_345 : f32 to vector<1x128xf32>
    %1066 = arith.subf %1065, %1064 : vector<1x128xf32>
    %1067 = arith.mulf %1047, %1066 : vector<1x128xf32>
    %1068 = arith.cmpf ogt, %1067, %121 : vector<1x128xf32>
    %1069 = arith.extui %1068 : vector<1x128xi1> to vector<1x128xi32>
    %1070 = arith.addi %1050, %1069 : vector<1x128xi32>
    %c13_i32_346 = arith.constant 13 : i32
    %1071 = vector.broadcast %c13_i32_346 : i32 to vector<1x128xi32>
    %1072 = arith.shli %1059, %1071 : vector<1x128xi32>
    %1073 = arith.xori %1059, %1072 : vector<1x128xi32>
    %c17_i32_347 = arith.constant 17 : i32
    %1074 = vector.broadcast %c17_i32_347 : i32 to vector<1x128xi32>
    %1075 = arith.shrui %1073, %1074 : vector<1x128xi32>
    %1076 = arith.xori %1073, %1075 : vector<1x128xi32>
    %c5_i32_348 = arith.constant 5 : i32
    %1077 = vector.broadcast %c5_i32_348 : i32 to vector<1x128xi32>
    %1078 = arith.shli %1076, %1077 : vector<1x128xi32>
    %1079 = arith.xori %1076, %1078 : vector<1x128xi32>
    %c9_i32_349 = arith.constant 9 : i32
    %1080 = vector.broadcast %c9_i32_349 : i32 to vector<1x128xi32>
    %1081 = arith.shrui %1079, %1080 : vector<1x128xi32>
    %c1065353216_i32_350 = arith.constant 1065353216 : i32
    %1082 = vector.broadcast %c1065353216_i32_350 : i32 to vector<1x128xi32>
    %1083 = arith.ori %1081, %1082 : vector<1x128xi32>
    %1084 = tpu.bitcast %1083 : vector<1x128xi32> -> vector<1x128xf32>
    %cst_351 = arith.constant 2.000000e+00 : f32
    %1085 = vector.broadcast %cst_351 : f32 to vector<1x128xf32>
    %1086 = arith.subf %1085, %1084 : vector<1x128xf32>
    %1087 = arith.mulf %1067, %1086 : vector<1x128xf32>
    %1088 = arith.cmpf ogt, %1087, %121 : vector<1x128xf32>
    %1089 = arith.extui %1088 : vector<1x128xi1> to vector<1x128xi32>
    %1090 = arith.addi %1070, %1089 : vector<1x128xi32>
    %c13_i32_352 = arith.constant 13 : i32
    %1091 = vector.broadcast %c13_i32_352 : i32 to vector<1x128xi32>
    %1092 = arith.shli %1079, %1091 : vector<1x128xi32>
    %1093 = arith.xori %1079, %1092 : vector<1x128xi32>
    %c17_i32_353 = arith.constant 17 : i32
    %1094 = vector.broadcast %c17_i32_353 : i32 to vector<1x128xi32>
    %1095 = arith.shrui %1093, %1094 : vector<1x128xi32>
    %1096 = arith.xori %1093, %1095 : vector<1x128xi32>
    %c5_i32_354 = arith.constant 5 : i32
    %1097 = vector.broadcast %c5_i32_354 : i32 to vector<1x128xi32>
    %1098 = arith.shli %1096, %1097 : vector<1x128xi32>
    %1099 = arith.xori %1096, %1098 : vector<1x128xi32>
    %c9_i32_355 = arith.constant 9 : i32
    %1100 = vector.broadcast %c9_i32_355 : i32 to vector<1x128xi32>
    %1101 = arith.shrui %1099, %1100 : vector<1x128xi32>
    %c1065353216_i32_356 = arith.constant 1065353216 : i32
    %1102 = vector.broadcast %c1065353216_i32_356 : i32 to vector<1x128xi32>
    %1103 = arith.ori %1101, %1102 : vector<1x128xi32>
    %1104 = tpu.bitcast %1103 : vector<1x128xi32> -> vector<1x128xf32>
    %cst_357 = arith.constant 2.000000e+00 : f32
    %1105 = vector.broadcast %cst_357 : f32 to vector<1x128xf32>
    %1106 = arith.subf %1105, %1104 : vector<1x128xf32>
    %1107 = arith.mulf %1087, %1106 : vector<1x128xf32>
    %1108 = arith.cmpf ogt, %1107, %121 : vector<1x128xf32>
    %1109 = arith.extui %1108 : vector<1x128xi1> to vector<1x128xi32>
    %1110 = arith.addi %1090, %1109 : vector<1x128xi32>
    %c6_i32 = arith.constant 6 : i32
    %c13_i32_358 = arith.constant 13 : i32
    %1111 = vector.broadcast %c13_i32_358 : i32 to vector<1x128xi32>
    %1112 = arith.shli %1099, %1111 : vector<1x128xi32>
    %1113 = arith.xori %1099, %1112 : vector<1x128xi32>
    %c17_i32_359 = arith.constant 17 : i32
    %1114 = vector.broadcast %c17_i32_359 : i32 to vector<1x128xi32>
    %1115 = arith.shrui %1113, %1114 : vector<1x128xi32>
    %1116 = arith.xori %1113, %1115 : vector<1x128xi32>
    %c5_i32_360 = arith.constant 5 : i32
    %1117 = vector.broadcast %c5_i32_360 : i32 to vector<1x128xi32>
    %1118 = arith.shli %1116, %1117 : vector<1x128xi32>
    %1119 = arith.xori %1116, %1118 : vector<1x128xi32>
    %c9_i32_361 = arith.constant 9 : i32
    %1120 = vector.broadcast %c9_i32_361 : i32 to vector<1x128xi32>
    %1121 = arith.shrui %1119, %1120 : vector<1x128xi32>
    %c1065353216_i32_362 = arith.constant 1065353216 : i32
    %1122 = vector.broadcast %c1065353216_i32_362 : i32 to vector<1x128xi32>
    %1123 = arith.ori %1121, %1122 : vector<1x128xi32>
    %1124 = tpu.bitcast %1123 : vector<1x128xi32> -> vector<1x128xf32>
    %cst_363 = arith.constant 2.000000e+00 : f32
    %1125 = vector.broadcast %cst_363 : f32 to vector<1x128xf32>
    %1126 = arith.subf %1125, %1124 : vector<1x128xf32>
    %1127 = arith.mulf %1107, %1126 : vector<1x128xf32>
    %1128 = arith.cmpf ogt, %1127, %121 : vector<1x128xf32>
    %1129 = arith.extui %1128 : vector<1x128xi1> to vector<1x128xi32>
    %1130 = arith.addi %1110, %1129 : vector<1x128xi32>
    %c13_i32_364 = arith.constant 13 : i32
    %1131 = vector.broadcast %c13_i32_364 : i32 to vector<1x128xi32>
    %1132 = arith.shli %1119, %1131 : vector<1x128xi32>
    %1133 = arith.xori %1119, %1132 : vector<1x128xi32>
    %c17_i32_365 = arith.constant 17 : i32
    %1134 = vector.broadcast %c17_i32_365 : i32 to vector<1x128xi32>
    %1135 = arith.shrui %1133, %1134 : vector<1x128xi32>
    %1136 = arith.xori %1133, %1135 : vector<1x128xi32>
    %c5_i32_366 = arith.constant 5 : i32
    %1137 = vector.broadcast %c5_i32_366 : i32 to vector<1x128xi32>
    %1138 = arith.shli %1136, %1137 : vector<1x128xi32>
    %1139 = arith.xori %1136, %1138 : vector<1x128xi32>
    %c9_i32_367 = arith.constant 9 : i32
    %1140 = vector.broadcast %c9_i32_367 : i32 to vector<1x128xi32>
    %1141 = arith.shrui %1139, %1140 : vector<1x128xi32>
    %c1065353216_i32_368 = arith.constant 1065353216 : i32
    %1142 = vector.broadcast %c1065353216_i32_368 : i32 to vector<1x128xi32>
    %1143 = arith.ori %1141, %1142 : vector<1x128xi32>
    %1144 = tpu.bitcast %1143 : vector<1x128xi32> -> vector<1x128xf32>
    %cst_369 = arith.constant 2.000000e+00 : f32
    %1145 = vector.broadcast %cst_369 : f32 to vector<1x128xf32>
    %1146 = arith.subf %1145, %1144 : vector<1x128xf32>
    %1147 = arith.mulf %1127, %1146 : vector<1x128xf32>
    %1148 = arith.cmpf ogt, %1147, %121 : vector<1x128xf32>
    %1149 = arith.extui %1148 : vector<1x128xi1> to vector<1x128xi32>
    %1150 = arith.addi %1130, %1149 : vector<1x128xi32>
    %c13_i32_370 = arith.constant 13 : i32
    %1151 = vector.broadcast %c13_i32_370 : i32 to vector<1x128xi32>
    %1152 = arith.shli %1139, %1151 : vector<1x128xi32>
    %1153 = arith.xori %1139, %1152 : vector<1x128xi32>
    %c17_i32_371 = arith.constant 17 : i32
    %1154 = vector.broadcast %c17_i32_371 : i32 to vector<1x128xi32>
    %1155 = arith.shrui %1153, %1154 : vector<1x128xi32>
    %1156 = arith.xori %1153, %1155 : vector<1x128xi32>
    %c5_i32_372 = arith.constant 5 : i32
    %1157 = vector.broadcast %c5_i32_372 : i32 to vector<1x128xi32>
    %1158 = arith.shli %1156, %1157 : vector<1x128xi32>
    %1159 = arith.xori %1156, %1158 : vector<1x128xi32>
    %c9_i32_373 = arith.constant 9 : i32
    %1160 = vector.broadcast %c9_i32_373 : i32 to vector<1x128xi32>
    %1161 = arith.shrui %1159, %1160 : vector<1x128xi32>
    %c1065353216_i32_374 = arith.constant 1065353216 : i32
    %1162 = vector.broadcast %c1065353216_i32_374 : i32 to vector<1x128xi32>
    %1163 = arith.ori %1161, %1162 : vector<1x128xi32>
    %1164 = tpu.bitcast %1163 : vector<1x128xi32> -> vector<1x128xf32>
    %cst_375 = arith.constant 2.000000e+00 : f32
    %1165 = vector.broadcast %cst_375 : f32 to vector<1x128xf32>
    %1166 = arith.subf %1165, %1164 : vector<1x128xf32>
    %1167 = arith.mulf %1147, %1166 : vector<1x128xf32>
    %1168 = arith.cmpf ogt, %1167, %121 : vector<1x128xf32>
    %1169 = arith.extui %1168 : vector<1x128xi1> to vector<1x128xi32>
    %1170 = arith.addi %1150, %1169 : vector<1x128xi32>
    %c13_i32_376 = arith.constant 13 : i32
    %1171 = vector.broadcast %c13_i32_376 : i32 to vector<1x128xi32>
    %1172 = arith.shli %1159, %1171 : vector<1x128xi32>
    %1173 = arith.xori %1159, %1172 : vector<1x128xi32>
    %c17_i32_377 = arith.constant 17 : i32
    %1174 = vector.broadcast %c17_i32_377 : i32 to vector<1x128xi32>
    %1175 = arith.shrui %1173, %1174 : vector<1x128xi32>
    %1176 = arith.xori %1173, %1175 : vector<1x128xi32>
    %c5_i32_378 = arith.constant 5 : i32
    %1177 = vector.broadcast %c5_i32_378 : i32 to vector<1x128xi32>
    %1178 = arith.shli %1176, %1177 : vector<1x128xi32>
    %1179 = arith.xori %1176, %1178 : vector<1x128xi32>
    %c9_i32_379 = arith.constant 9 : i32
    %1180 = vector.broadcast %c9_i32_379 : i32 to vector<1x128xi32>
    %1181 = arith.shrui %1179, %1180 : vector<1x128xi32>
    %c1065353216_i32_380 = arith.constant 1065353216 : i32
    %1182 = vector.broadcast %c1065353216_i32_380 : i32 to vector<1x128xi32>
    %1183 = arith.ori %1181, %1182 : vector<1x128xi32>
    %1184 = tpu.bitcast %1183 : vector<1x128xi32> -> vector<1x128xf32>
    %cst_381 = arith.constant 2.000000e+00 : f32
    %1185 = vector.broadcast %cst_381 : f32 to vector<1x128xf32>
    %1186 = arith.subf %1185, %1184 : vector<1x128xf32>
    %1187 = arith.mulf %1167, %1186 : vector<1x128xf32>
    %1188 = arith.cmpf ogt, %1187, %121 : vector<1x128xf32>
    %1189 = arith.extui %1188 : vector<1x128xi1> to vector<1x128xi32>
    %1190 = arith.addi %1170, %1189 : vector<1x128xi32>
    %c13_i32_382 = arith.constant 13 : i32
    %1191 = vector.broadcast %c13_i32_382 : i32 to vector<1x128xi32>
    %1192 = arith.shli %1179, %1191 : vector<1x128xi32>
    %1193 = arith.xori %1179, %1192 : vector<1x128xi32>
    %c17_i32_383 = arith.constant 17 : i32
    %1194 = vector.broadcast %c17_i32_383 : i32 to vector<1x128xi32>
    %1195 = arith.shrui %1193, %1194 : vector<1x128xi32>
    %1196 = arith.xori %1193, %1195 : vector<1x128xi32>
    %c5_i32_384 = arith.constant 5 : i32
    %1197 = vector.broadcast %c5_i32_384 : i32 to vector<1x128xi32>
    %1198 = arith.shli %1196, %1197 : vector<1x128xi32>
    %1199 = arith.xori %1196, %1198 : vector<1x128xi32>
    %c9_i32_385 = arith.constant 9 : i32
    %1200 = vector.broadcast %c9_i32_385 : i32 to vector<1x128xi32>
    %1201 = arith.shrui %1199, %1200 : vector<1x128xi32>
    %c1065353216_i32_386 = arith.constant 1065353216 : i32
    %1202 = vector.broadcast %c1065353216_i32_386 : i32 to vector<1x128xi32>
    %1203 = arith.ori %1201, %1202 : vector<1x128xi32>
    %1204 = tpu.bitcast %1203 : vector<1x128xi32> -> vector<1x128xf32>
    %cst_387 = arith.constant 2.000000e+00 : f32
    %1205 = vector.broadcast %cst_387 : f32 to vector<1x128xf32>
    %1206 = arith.subf %1205, %1204 : vector<1x128xf32>
    %1207 = arith.mulf %1187, %1206 : vector<1x128xf32>
    %1208 = arith.cmpf ogt, %1207, %121 : vector<1x128xf32>
    %1209 = arith.extui %1208 : vector<1x128xi1> to vector<1x128xi32>
    %1210 = arith.addi %1190, %1209 : vector<1x128xi32>
    %c13_i32_388 = arith.constant 13 : i32
    %1211 = vector.broadcast %c13_i32_388 : i32 to vector<1x128xi32>
    %1212 = arith.shli %1199, %1211 : vector<1x128xi32>
    %1213 = arith.xori %1199, %1212 : vector<1x128xi32>
    %c17_i32_389 = arith.constant 17 : i32
    %1214 = vector.broadcast %c17_i32_389 : i32 to vector<1x128xi32>
    %1215 = arith.shrui %1213, %1214 : vector<1x128xi32>
    %1216 = arith.xori %1213, %1215 : vector<1x128xi32>
    %c5_i32_390 = arith.constant 5 : i32
    %1217 = vector.broadcast %c5_i32_390 : i32 to vector<1x128xi32>
    %1218 = arith.shli %1216, %1217 : vector<1x128xi32>
    %1219 = arith.xori %1216, %1218 : vector<1x128xi32>
    %c9_i32_391 = arith.constant 9 : i32
    %1220 = vector.broadcast %c9_i32_391 : i32 to vector<1x128xi32>
    %1221 = arith.shrui %1219, %1220 : vector<1x128xi32>
    %c1065353216_i32_392 = arith.constant 1065353216 : i32
    %1222 = vector.broadcast %c1065353216_i32_392 : i32 to vector<1x128xi32>
    %1223 = arith.ori %1221, %1222 : vector<1x128xi32>
    %1224 = tpu.bitcast %1223 : vector<1x128xi32> -> vector<1x128xf32>
    %cst_393 = arith.constant 2.000000e+00 : f32
    %1225 = vector.broadcast %cst_393 : f32 to vector<1x128xf32>
    %1226 = arith.subf %1225, %1224 : vector<1x128xf32>
    %1227 = arith.mulf %1207, %1226 : vector<1x128xf32>
    %1228 = arith.cmpf ogt, %1227, %121 : vector<1x128xf32>
    %1229 = arith.extui %1228 : vector<1x128xi1> to vector<1x128xi32>
    %1230 = arith.addi %1210, %1229 : vector<1x128xi32>
    %c13_i32_394 = arith.constant 13 : i32
    %1231 = vector.broadcast %c13_i32_394 : i32 to vector<1x128xi32>
    %1232 = arith.shli %1219, %1231 : vector<1x128xi32>
    %1233 = arith.xori %1219, %1232 : vector<1x128xi32>
    %c17_i32_395 = arith.constant 17 : i32
    %1234 = vector.broadcast %c17_i32_395 : i32 to vector<1x128xi32>
    %1235 = arith.shrui %1233, %1234 : vector<1x128xi32>
    %1236 = arith.xori %1233, %1235 : vector<1x128xi32>
    %c5_i32_396 = arith.constant 5 : i32
    %1237 = vector.broadcast %c5_i32_396 : i32 to vector<1x128xi32>
    %1238 = arith.shli %1236, %1237 : vector<1x128xi32>
    %1239 = arith.xori %1236, %1238 : vector<1x128xi32>
    %c9_i32_397 = arith.constant 9 : i32
    %1240 = vector.broadcast %c9_i32_397 : i32 to vector<1x128xi32>
    %1241 = arith.shrui %1239, %1240 : vector<1x128xi32>
    %c1065353216_i32_398 = arith.constant 1065353216 : i32
    %1242 = vector.broadcast %c1065353216_i32_398 : i32 to vector<1x128xi32>
    %1243 = arith.ori %1241, %1242 : vector<1x128xi32>
    %1244 = tpu.bitcast %1243 : vector<1x128xi32> -> vector<1x128xf32>
    %cst_399 = arith.constant 2.000000e+00 : f32
    %1245 = vector.broadcast %cst_399 : f32 to vector<1x128xf32>
    %1246 = arith.subf %1245, %1244 : vector<1x128xf32>
    %1247 = arith.mulf %1227, %1246 : vector<1x128xf32>
    %1248 = arith.cmpf ogt, %1247, %121 : vector<1x128xf32>
    %1249 = arith.extui %1248 : vector<1x128xi1> to vector<1x128xi32>
    %1250 = arith.addi %1230, %1249 : vector<1x128xi32>
    %c13_i32_400 = arith.constant 13 : i32
    %1251 = vector.broadcast %c13_i32_400 : i32 to vector<1x128xi32>
    %1252 = arith.shli %1239, %1251 : vector<1x128xi32>
    %1253 = arith.xori %1239, %1252 : vector<1x128xi32>
    %c17_i32_401 = arith.constant 17 : i32
    %1254 = vector.broadcast %c17_i32_401 : i32 to vector<1x128xi32>
    %1255 = arith.shrui %1253, %1254 : vector<1x128xi32>
    %1256 = arith.xori %1253, %1255 : vector<1x128xi32>
    %c5_i32_402 = arith.constant 5 : i32
    %1257 = vector.broadcast %c5_i32_402 : i32 to vector<1x128xi32>
    %1258 = arith.shli %1256, %1257 : vector<1x128xi32>
    %1259 = arith.xori %1256, %1258 : vector<1x128xi32>
    %c9_i32_403 = arith.constant 9 : i32
    %1260 = vector.broadcast %c9_i32_403 : i32 to vector<1x128xi32>
    %1261 = arith.shrui %1259, %1260 : vector<1x128xi32>
    %c1065353216_i32_404 = arith.constant 1065353216 : i32
    %1262 = vector.broadcast %c1065353216_i32_404 : i32 to vector<1x128xi32>
    %1263 = arith.ori %1261, %1262 : vector<1x128xi32>
    %1264 = tpu.bitcast %1263 : vector<1x128xi32> -> vector<1x128xf32>
    %cst_405 = arith.constant 2.000000e+00 : f32
    %1265 = vector.broadcast %cst_405 : f32 to vector<1x128xf32>
    %1266 = arith.subf %1265, %1264 : vector<1x128xf32>
    %1267 = arith.mulf %1247, %1266 : vector<1x128xf32>
    %1268 = arith.cmpf ogt, %1267, %121 : vector<1x128xf32>
    %1269 = arith.extui %1268 : vector<1x128xi1> to vector<1x128xi32>
    %1270 = arith.addi %1250, %1269 : vector<1x128xi32>
    %c7_i32 = arith.constant 7 : i32
    %c13_i32_406 = arith.constant 13 : i32
    %1271 = vector.broadcast %c13_i32_406 : i32 to vector<1x128xi32>
    %1272 = arith.shli %1259, %1271 : vector<1x128xi32>
    %1273 = arith.xori %1259, %1272 : vector<1x128xi32>
    %c17_i32_407 = arith.constant 17 : i32
    %1274 = vector.broadcast %c17_i32_407 : i32 to vector<1x128xi32>
    %1275 = arith.shrui %1273, %1274 : vector<1x128xi32>
    %1276 = arith.xori %1273, %1275 : vector<1x128xi32>
    %c5_i32_408 = arith.constant 5 : i32
    %1277 = vector.broadcast %c5_i32_408 : i32 to vector<1x128xi32>
    %1278 = arith.shli %1276, %1277 : vector<1x128xi32>
    %1279 = arith.xori %1276, %1278 : vector<1x128xi32>
    %c9_i32_409 = arith.constant 9 : i32
    %1280 = vector.broadcast %c9_i32_409 : i32 to vector<1x128xi32>
    %1281 = arith.shrui %1279, %1280 : vector<1x128xi32>
    %c1065353216_i32_410 = arith.constant 1065353216 : i32
    %1282 = vector.broadcast %c1065353216_i32_410 : i32 to vector<1x128xi32>
    %1283 = arith.ori %1281, %1282 : vector<1x128xi32>
    %1284 = tpu.bitcast %1283 : vector<1x128xi32> -> vector<1x128xf32>
    %cst_411 = arith.constant 2.000000e+00 : f32
    %1285 = vector.broadcast %cst_411 : f32 to vector<1x128xf32>
    %1286 = arith.subf %1285, %1284 : vector<1x128xf32>
    %1287 = arith.mulf %1267, %1286 : vector<1x128xf32>
    %1288 = arith.cmpf ogt, %1287, %121 : vector<1x128xf32>
    %1289 = arith.extui %1288 : vector<1x128xi1> to vector<1x128xi32>
    %1290 = arith.addi %1270, %1289 : vector<1x128xi32>
    %c13_i32_412 = arith.constant 13 : i32
    %1291 = vector.broadcast %c13_i32_412 : i32 to vector<1x128xi32>
    %1292 = arith.shli %1279, %1291 : vector<1x128xi32>
    %1293 = arith.xori %1279, %1292 : vector<1x128xi32>
    %c17_i32_413 = arith.constant 17 : i32
    %1294 = vector.broadcast %c17_i32_413 : i32 to vector<1x128xi32>
    %1295 = arith.shrui %1293, %1294 : vector<1x128xi32>
    %1296 = arith.xori %1293, %1295 : vector<1x128xi32>
    %c5_i32_414 = arith.constant 5 : i32
    %1297 = vector.broadcast %c5_i32_414 : i32 to vector<1x128xi32>
    %1298 = arith.shli %1296, %1297 : vector<1x128xi32>
    %1299 = arith.xori %1296, %1298 : vector<1x128xi32>
    %c9_i32_415 = arith.constant 9 : i32
    %1300 = vector.broadcast %c9_i32_415 : i32 to vector<1x128xi32>
    %1301 = arith.shrui %1299, %1300 : vector<1x128xi32>
    %c1065353216_i32_416 = arith.constant 1065353216 : i32
    %1302 = vector.broadcast %c1065353216_i32_416 : i32 to vector<1x128xi32>
    %1303 = arith.ori %1301, %1302 : vector<1x128xi32>
    %1304 = tpu.bitcast %1303 : vector<1x128xi32> -> vector<1x128xf32>
    %cst_417 = arith.constant 2.000000e+00 : f32
    %1305 = vector.broadcast %cst_417 : f32 to vector<1x128xf32>
    %1306 = arith.subf %1305, %1304 : vector<1x128xf32>
    %1307 = arith.mulf %1287, %1306 : vector<1x128xf32>
    %1308 = arith.cmpf ogt, %1307, %121 : vector<1x128xf32>
    %1309 = arith.extui %1308 : vector<1x128xi1> to vector<1x128xi32>
    %1310 = arith.addi %1290, %1309 : vector<1x128xi32>
    %c13_i32_418 = arith.constant 13 : i32
    %1311 = vector.broadcast %c13_i32_418 : i32 to vector<1x128xi32>
    %1312 = arith.shli %1299, %1311 : vector<1x128xi32>
    %1313 = arith.xori %1299, %1312 : vector<1x128xi32>
    %c17_i32_419 = arith.constant 17 : i32
    %1314 = vector.broadcast %c17_i32_419 : i32 to vector<1x128xi32>
    %1315 = arith.shrui %1313, %1314 : vector<1x128xi32>
    %1316 = arith.xori %1313, %1315 : vector<1x128xi32>
    %c5_i32_420 = arith.constant 5 : i32
    %1317 = vector.broadcast %c5_i32_420 : i32 to vector<1x128xi32>
    %1318 = arith.shli %1316, %1317 : vector<1x128xi32>
    %1319 = arith.xori %1316, %1318 : vector<1x128xi32>
    %c9_i32_421 = arith.constant 9 : i32
    %1320 = vector.broadcast %c9_i32_421 : i32 to vector<1x128xi32>
    %1321 = arith.shrui %1319, %1320 : vector<1x128xi32>
    %c1065353216_i32_422 = arith.constant 1065353216 : i32
    %1322 = vector.broadcast %c1065353216_i32_422 : i32 to vector<1x128xi32>
    %1323 = arith.ori %1321, %1322 : vector<1x128xi32>
    %1324 = tpu.bitcast %1323 : vector<1x128xi32> -> vector<1x128xf32>
    %cst_423 = arith.constant 2.000000e+00 : f32
    %1325 = vector.broadcast %cst_423 : f32 to vector<1x128xf32>
    %1326 = arith.subf %1325, %1324 : vector<1x128xf32>
    %1327 = arith.mulf %1307, %1326 : vector<1x128xf32>
    %1328 = arith.cmpf ogt, %1327, %121 : vector<1x128xf32>
    %1329 = arith.extui %1328 : vector<1x128xi1> to vector<1x128xi32>
    %1330 = arith.addi %1310, %1329 : vector<1x128xi32>
    %c13_i32_424 = arith.constant 13 : i32
    %1331 = vector.broadcast %c13_i32_424 : i32 to vector<1x128xi32>
    %1332 = arith.shli %1319, %1331 : vector<1x128xi32>
    %1333 = arith.xori %1319, %1332 : vector<1x128xi32>
    %c17_i32_425 = arith.constant 17 : i32
    %1334 = vector.broadcast %c17_i32_425 : i32 to vector<1x128xi32>
    %1335 = arith.shrui %1333, %1334 : vector<1x128xi32>
    %1336 = arith.xori %1333, %1335 : vector<1x128xi32>
    %c5_i32_426 = arith.constant 5 : i32
    %1337 = vector.broadcast %c5_i32_426 : i32 to vector<1x128xi32>
    %1338 = arith.shli %1336, %1337 : vector<1x128xi32>
    %1339 = arith.xori %1336, %1338 : vector<1x128xi32>
    %c9_i32_427 = arith.constant 9 : i32
    %1340 = vector.broadcast %c9_i32_427 : i32 to vector<1x128xi32>
    %1341 = arith.shrui %1339, %1340 : vector<1x128xi32>
    %c1065353216_i32_428 = arith.constant 1065353216 : i32
    %1342 = vector.broadcast %c1065353216_i32_428 : i32 to vector<1x128xi32>
    %1343 = arith.ori %1341, %1342 : vector<1x128xi32>
    %1344 = tpu.bitcast %1343 : vector<1x128xi32> -> vector<1x128xf32>
    %cst_429 = arith.constant 2.000000e+00 : f32
    %1345 = vector.broadcast %cst_429 : f32 to vector<1x128xf32>
    %1346 = arith.subf %1345, %1344 : vector<1x128xf32>
    %1347 = arith.mulf %1327, %1346 : vector<1x128xf32>
    %1348 = arith.cmpf ogt, %1347, %121 : vector<1x128xf32>
    %1349 = arith.extui %1348 : vector<1x128xi1> to vector<1x128xi32>
    %1350 = arith.addi %1330, %1349 : vector<1x128xi32>
    %c13_i32_430 = arith.constant 13 : i32
    %1351 = vector.broadcast %c13_i32_430 : i32 to vector<1x128xi32>
    %1352 = arith.shli %1339, %1351 : vector<1x128xi32>
    %1353 = arith.xori %1339, %1352 : vector<1x128xi32>
    %c17_i32_431 = arith.constant 17 : i32
    %1354 = vector.broadcast %c17_i32_431 : i32 to vector<1x128xi32>
    %1355 = arith.shrui %1353, %1354 : vector<1x128xi32>
    %1356 = arith.xori %1353, %1355 : vector<1x128xi32>
    %c5_i32_432 = arith.constant 5 : i32
    %1357 = vector.broadcast %c5_i32_432 : i32 to vector<1x128xi32>
    %1358 = arith.shli %1356, %1357 : vector<1x128xi32>
    %1359 = arith.xori %1356, %1358 : vector<1x128xi32>
    %c9_i32_433 = arith.constant 9 : i32
    %1360 = vector.broadcast %c9_i32_433 : i32 to vector<1x128xi32>
    %1361 = arith.shrui %1359, %1360 : vector<1x128xi32>
    %c1065353216_i32_434 = arith.constant 1065353216 : i32
    %1362 = vector.broadcast %c1065353216_i32_434 : i32 to vector<1x128xi32>
    %1363 = arith.ori %1361, %1362 : vector<1x128xi32>
    %1364 = tpu.bitcast %1363 : vector<1x128xi32> -> vector<1x128xf32>
    %cst_435 = arith.constant 2.000000e+00 : f32
    %1365 = vector.broadcast %cst_435 : f32 to vector<1x128xf32>
    %1366 = arith.subf %1365, %1364 : vector<1x128xf32>
    %1367 = arith.mulf %1347, %1366 : vector<1x128xf32>
    %1368 = arith.cmpf ogt, %1367, %121 : vector<1x128xf32>
    %1369 = arith.extui %1368 : vector<1x128xi1> to vector<1x128xi32>
    %1370 = arith.addi %1350, %1369 : vector<1x128xi32>
    %c13_i32_436 = arith.constant 13 : i32
    %1371 = vector.broadcast %c13_i32_436 : i32 to vector<1x128xi32>
    %1372 = arith.shli %1359, %1371 : vector<1x128xi32>
    %1373 = arith.xori %1359, %1372 : vector<1x128xi32>
    %c17_i32_437 = arith.constant 17 : i32
    %1374 = vector.broadcast %c17_i32_437 : i32 to vector<1x128xi32>
    %1375 = arith.shrui %1373, %1374 : vector<1x128xi32>
    %1376 = arith.xori %1373, %1375 : vector<1x128xi32>
    %c5_i32_438 = arith.constant 5 : i32
    %1377 = vector.broadcast %c5_i32_438 : i32 to vector<1x128xi32>
    %1378 = arith.shli %1376, %1377 : vector<1x128xi32>
    %1379 = arith.xori %1376, %1378 : vector<1x128xi32>
    %c9_i32_439 = arith.constant 9 : i32
    %1380 = vector.broadcast %c9_i32_439 : i32 to vector<1x128xi32>
    %1381 = arith.shrui %1379, %1380 : vector<1x128xi32>
    %c1065353216_i32_440 = arith.constant 1065353216 : i32
    %1382 = vector.broadcast %c1065353216_i32_440 : i32 to vector<1x128xi32>
    %1383 = arith.ori %1381, %1382 : vector<1x128xi32>
    %1384 = tpu.bitcast %1383 : vector<1x128xi32> -> vector<1x128xf32>
    %cst_441 = arith.constant 2.000000e+00 : f32
    %1385 = vector.broadcast %cst_441 : f32 to vector<1x128xf32>
    %1386 = arith.subf %1385, %1384 : vector<1x128xf32>
    %1387 = arith.mulf %1367, %1386 : vector<1x128xf32>
    %1388 = arith.cmpf ogt, %1387, %121 : vector<1x128xf32>
    %1389 = arith.extui %1388 : vector<1x128xi1> to vector<1x128xi32>
    %1390 = arith.addi %1370, %1389 : vector<1x128xi32>
    %c13_i32_442 = arith.constant 13 : i32
    %1391 = vector.broadcast %c13_i32_442 : i32 to vector<1x128xi32>
    %1392 = arith.shli %1379, %1391 : vector<1x128xi32>
    %1393 = arith.xori %1379, %1392 : vector<1x128xi32>
    %c17_i32_443 = arith.constant 17 : i32
    %1394 = vector.broadcast %c17_i32_443 : i32 to vector<1x128xi32>
    %1395 = arith.shrui %1393, %1394 : vector<1x128xi32>
    %1396 = arith.xori %1393, %1395 : vector<1x128xi32>
    %c5_i32_444 = arith.constant 5 : i32
    %1397 = vector.broadcast %c5_i32_444 : i32 to vector<1x128xi32>
    %1398 = arith.shli %1396, %1397 : vector<1x128xi32>
    %1399 = arith.xori %1396, %1398 : vector<1x128xi32>
    %c9_i32_445 = arith.constant 9 : i32
    %1400 = vector.broadcast %c9_i32_445 : i32 to vector<1x128xi32>
    %1401 = arith.shrui %1399, %1400 : vector<1x128xi32>
    %c1065353216_i32_446 = arith.constant 1065353216 : i32
    %1402 = vector.broadcast %c1065353216_i32_446 : i32 to vector<1x128xi32>
    %1403 = arith.ori %1401, %1402 : vector<1x128xi32>
    %1404 = tpu.bitcast %1403 : vector<1x128xi32> -> vector<1x128xf32>
    %cst_447 = arith.constant 2.000000e+00 : f32
    %1405 = vector.broadcast %cst_447 : f32 to vector<1x128xf32>
    %1406 = arith.subf %1405, %1404 : vector<1x128xf32>
    %1407 = arith.mulf %1387, %1406 : vector<1x128xf32>
    %1408 = arith.cmpf ogt, %1407, %121 : vector<1x128xf32>
    %1409 = arith.extui %1408 : vector<1x128xi1> to vector<1x128xi32>
    %1410 = arith.addi %1390, %1409 : vector<1x128xi32>
    %c13_i32_448 = arith.constant 13 : i32
    %1411 = vector.broadcast %c13_i32_448 : i32 to vector<1x128xi32>
    %1412 = arith.shli %1399, %1411 : vector<1x128xi32>
    %1413 = arith.xori %1399, %1412 : vector<1x128xi32>
    %c17_i32_449 = arith.constant 17 : i32
    %1414 = vector.broadcast %c17_i32_449 : i32 to vector<1x128xi32>
    %1415 = arith.shrui %1413, %1414 : vector<1x128xi32>
    %1416 = arith.xori %1413, %1415 : vector<1x128xi32>
    %c5_i32_450 = arith.constant 5 : i32
    %1417 = vector.broadcast %c5_i32_450 : i32 to vector<1x128xi32>
    %1418 = arith.shli %1416, %1417 : vector<1x128xi32>
    %1419 = arith.xori %1416, %1418 : vector<1x128xi32>
    %c9_i32_451 = arith.constant 9 : i32
    %1420 = vector.broadcast %c9_i32_451 : i32 to vector<1x128xi32>
    %1421 = arith.shrui %1419, %1420 : vector<1x128xi32>
    %c1065353216_i32_452 = arith.constant 1065353216 : i32
    %1422 = vector.broadcast %c1065353216_i32_452 : i32 to vector<1x128xi32>
    %1423 = arith.ori %1421, %1422 : vector<1x128xi32>
    %1424 = tpu.bitcast %1423 : vector<1x128xi32> -> vector<1x128xf32>
    %cst_453 = arith.constant 2.000000e+00 : f32
    %1425 = vector.broadcast %cst_453 : f32 to vector<1x128xf32>
    %1426 = arith.subf %1425, %1424 : vector<1x128xf32>
    %1427 = arith.mulf %1407, %1426 : vector<1x128xf32>
    %1428 = arith.cmpf ogt, %1427, %121 : vector<1x128xf32>
    %1429 = arith.extui %1428 : vector<1x128xi1> to vector<1x128xi32>
    %1430 = arith.addi %1410, %1429 : vector<1x128xi32>
    %1431 = arith.sitofp %1430 : vector<1x128xi32> to vector<1x128xf32>
    %c0_454 = arith.constant 0 : index
    %c0_455 = arith.constant 0 : index
    %1432 = vector.load %arg4[%c0_454, %c0_455] : memref<1x128xf32, #tpu.memory_space<vmem>>, vector<1x128xf32>
    tpu.vector_store %arg4[%c0_454, %c0_455], %1431 {strides = array<i32>} : memref<1x128xf32, #tpu.memory_space<vmem>>, vector<1x128xf32>,
    return
  }
  func.func @transform_0(%arg0: i32, %arg1: memref<1xi32, #tpu.memory_space<smem>>) -> (i32, i32, i32) {
    %c0_i32 = arith.constant 0 : i32
    %c0_i32_0 = arith.constant 0 : i32
    %c0_i32_1 = arith.constant 0 : i32
    return %c0_i32, %arg0, %c0_i32_0 : i32, i32, i32
  }
  func.func @transform_1(%arg0: i32, %arg1: memref<1xi32, #tpu.memory_space<smem>>) -> (i32, i32) {
    %c0_i32 = arith.constant 0 : i32
    %c0_i32_0 = arith.constant 0 : i32
    %c0_i32_1 = arith.constant 0 : i32
    return %c0_i32, %c0_i32_0 : i32, i32
  }
  func.func @transform_2(%arg0: i32, %arg1: memref<1xi32, #tpu.memory_space<smem>>) -> (i32, i32) {
    %c0_i32 = arith.constant 0 : i32
    %c0_i32_0 = arith.constant 0 : i32
    return %arg0, %c0_i32 : i32, i32
  }
}

</mosaic_0001>

<bundles_post_ra>
// kernel: tpu_custom_call.1
= control target key start
LH: loop header
LB: loop body
LE: loop exit
PB: predicated region body
PF: predicated region fallthrough
CT: control target
= control target key end

     0   :  { %9 = vsyncpa [#allocation5], 0  ;;  %s1312_s0 = inlined_call_operand.<no memory space> [shape: s32[1], index: 0, kind: input, shape index: {}]   ;;  %s1313_s1 = inlined_call_operand.hbm [shape: f32[17,1,128], index: 1, kind: input, shape index: {}]   ;;  %s1314_s2 = inlined_call_operand.hbm [shape: f32[17,128], index: 2, kind: input, shape index: {}]   ;;  %s1315_s3 = inlined_call_operand.hbm [shape: f32[1,128], index: 3, kind: output, shape index: {}]  }
   0x1   :  { %10 = vsyncpa [#allocation8], 0 }
   0x2   :  { %11 = vsyncpa [#allocation6], 0  ;;  %s1142_s12 = smov [#allocation4]  }
   0x3   :  { %s17_s13 = sshll.u32 %s1142_s12, 4  ;;  %s18_s13 = int_to_ptr.vmem [resolvable:$true] %s17_s13 }
   0x4   :  { %s1084_s14 = scalar_lea.vmem %s18_s13, 272  ;;  %s1088_s15 = scalar_lea.vmem %s18_s13, 288 }
   0x5   :  { %p1085_p0 = scmp.ne.s32.totalorder %s18_s13, %s1084_s14  ;;  %p1089_p1 = scmp.lt.s32.totalorder %s18_s13, %s18_s13 }
   0x6   :  { %p1090_p2 = scmp.lt.s32.totalorder %s1088_s15, %s1084_s14 }
   0x8   :  { %p1091_p3 = por %p1090_p2, %p1089_p1 }
   0xa   :  { %p1092_p4 = pnand %p1091_p3, %p1085_p0 }
   0xc   :  { %1095 = shalt.err (!%p1092_p4)
}
   0xd   :  { %s1143_s16 = smov 16   ;;  %s1144_s17 = smov 1  }
   0xe   :  { %23 = dma.hbm_to_vmem [thread:$0]  %s1313_s1, 272, %s18_s13, [#allocation5], %s1143_s16, %s1143_s16, %s1144_s17  }
   0xf   :  { %s1145_s20 = smov [#allocation7]  }
  0x10   :  { %s29_s21 = sshll.u32 %s1145_s20, 4  ;;  %s30_s21 = int_to_ptr.vmem [resolvable:$true] %s29_s21 }
  0x11   :  { %s1104_s22 = scalar_lea.vmem %s30_s21, 384  ;;  %p1109_p6 = scmp.lt.s32.totalorder %s30_s21, %s30_s21 }
  0x12   :  { %p1105_p5 = scmp.ne.s32.totalorder %s30_s21, %s1104_s22  ;;  %p1110_p7 = scmp.lt.s32.totalorder %s1104_s22, %s1104_s22 }
  0x14   :  { %p1111_p8 = por %p1110_p7, %p1109_p6 }
  0x16   :  { %p1112_p9 = pnand %p1111_p8, %p1105_p5 }
  0x18   :  { %1115 = shalt.err (!%p1112_p9)
}
  0x19   :  { %s1146_s23 = smov 128   ;;  %s1147_s24 = smov 8  }
  0x1a   :  { %35 = dma.hbm_to_vmem [thread:$0]  %s1314_s2, 384, %s30_s21, [#allocation8], %s1146_s23, %s1146_s23, %s1147_s24  }
  0x1b   :  { %1136 = dma.done.wait [#allocation5], 272  }
  0x1c   :  { %1137 = vsyncadd [#allocation5], 4294967024 }
  0x1d   :  { %1138 = dma.done.wait [#allocation8], 384  }
  0x1e   :  { %1139 = vsyncadd [#allocation8], 4294966912  ;;  %v130_v0 = vlaneseq  ;;  %s140_s28 = smul.u32 2654435769, %s1312_s0  ;;  %v42_v4 = vld [vmem:[#allocation4] sm:$0x1] }
  0x1f   :  { %v43_v5 = vld [vmem:[#allocation7] sm:$0x1]  ;;  %v46_v6 = vld [vmem:[#allocation4 + $0x1] sm:$0x1]  ;;  %v47_v8 = vld [vmem:[#allocation7 + $0x1] sm:$0x1] }
  0x20   :  { %v131_v1 = vshrl.u32 %v130_v0, 7  ;;  %v133_v2 = vand.u32 127, %v130_v0  ;;  %v44_v7 = vmul.f32 %v43_v5, %v42_v4  ;;  %v51_v9 = vld [vmem:[#allocation4 + $0x2] sm:$0x1]  ;;  %v52_v10 = vld [vmem:[#allocation7 + $0x2] sm:$0x1]  ;;  %v48_v11 = vmul.f32 %v47_v8, %v46_v6 }
  0x21   :  { %v53_v12 = vmul.f32 %v52_v10, %v51_v9  ;;  %v56_v13 = vld [vmem:[#allocation4 + $0x3] sm:$0x1]  ;;  %v57_v14 = vld [vmem:[#allocation7 + $0x3] sm:$0x1]  ;;  %v61_v15 = vld [vmem:[#allocation4 + $0x4] sm:$0x1]  ;;  %v141_v20 = vstv %s140_s28 }
  0x22   :  { %v135_v3 = vmul.u32 128, %v131_v1  ;;  %v62_v16 = vld [vmem:[#allocation7 + $0x4] sm:$0x1]  ;;  %v49_v18 = vadd.f32 %v48_v11, %v44_v7  ;;  %v58_v19 = vmul.f32 %v57_v14, %v56_v13  ;;  %v66_v21 = vld [vmem:[#allocation4 + $0x5] sm:$0x1]  ;;  %s1149_s0 = smov [#allocation9]  }
  0x23   :  { %v67_v22 = vld [vmem:[#allocation7 + $0x5] sm:$0x1]  ;;  %v63_v24 = vmul.f32 %v62_v16, %v61_v15  ;;  %v71_v25 = vld [vmem:[#allocation4 + $0x6] sm:$0x1]  ;;  %v72_v26 = vld [vmem:[#allocation7 + $0x6] sm:$0x1] }
  0x24   :  { %v138_v17 = vadd.s32 %v135_v3, %v133_v2  ;;  %v54_v23 = vadd.f32 %v53_v12, %v49_v18  ;;  %v68_v29 = vmul.f32 %v67_v22, %v66_v21  ;;  %v76_v30 = vld [vmem:[#allocation4 + $0x7] sm:$0x1]  ;;  %v77_v31 = vld [vmem:[#allocation7 + $0x7] sm:$0x1]  ;;  %v73_v33 = vmul.f32 %v72_v26, %v71_v25  ;;  %v81_v34 = vld [vmem:[#allocation4 + $0x8] sm:$0x1] }
  0x25   :  { %v82_v35 = vld [vmem:[#allocation7 + $0x8] sm:$0x1]  ;;  %v78_v38 = vmul.f32 %v77_v31, %v76_v30  ;;  %v86_v39 = vld [vmem:[#allocation4 + $0x9] sm:$0x1]  ;;  %v87_v40 = vld [vmem:[#allocation7 + $0x9] sm:$0x1] }
  0x26   :  { %v142_v27 = vxor.u32 %v141_v20, %v138_v17  ;;  %v59_v28 = vadd.f32 %v58_v19, %v54_v23  ;;  %v83_v43 = vmul.f32 %v82_v35, %v81_v34  ;;  %v91_v44 = vld [vmem:[#allocation4 + $0xa] sm:$0x1]  ;;  %v92_v45 = vld [vmem:[#allocation7 + $0xa] sm:$0x1]  ;;  %v88_v48 = vmul.f32 %v87_v40, %v86_v39  ;;  %v96_v49 = vld [vmem:[#allocation4 + $0xb] sm:$0x1] }
  0x27   :  { %v97_v50 = vld [vmem:[#allocation7 + $0xb] sm:$0x1]  ;;  %v93_v53 = vmul.f32 %v92_v45, %v91_v44  ;;  %v101_v54 = vld [vmem:[#allocation4 + $0xc] sm:$0x1]  ;;  %v102_v55 = vld [vmem:[#allocation7 + $0xc] sm:$0x1] }
  0x28   :  { %v64_v32 = vadd.f32 %v63_v24, %v59_v28  ;;  %v143_v36 = vshrl.u32 %v142_v27, 16  ;;  %v98_v58 = vmul.f32 %v97_v50, %v96_v49  ;;  %v106_v59 = vld [vmem:[#allocation4 + $0xd] sm:$0x1]  ;;  %v107_v60 = vld [vmem:[#allocation7 + $0xd] sm:$0x1]  ;;  %v103_v63 = vmul.f32 %v102_v55, %v101_v54  ;;  %s1054_s2 = sshll.u32 %s1149_s0, 4  ;;  %s1055_s2 = int_to_ptr.vmem [resolvable:$true] %s1054_s2 }
  0x29   :  { %v111_v0 = vld [vmem:[#allocation4 + $0xe] sm:$0x1]  ;;  %v112_v1 = vld [vmem:[#allocation7 + $0xe] sm:$0x1]  ;;  %v108_v4 = vmul.f32 %v107_v60, %v106_v59  ;;  %v116_v5 = vld [vmem:[#allocation4 + $0xf] sm:$0x1]  ;;  %p1121_p11 = scmp.lt.s32.totalorder %s1055_s2, %s1055_s2 }
  0x2a   :  { %v69_v37 = vadd.f32 %v68_v29, %v64_v32  ;;  %v144_v41 = vxor.u32 %v143_v36, %v142_v27  ;;  %v117_v6 = vld [vmem:[#allocation7 + $0xf] sm:$0x1]  ;;  %v113_v9 = vmul.f32 %v112_v1, %v111_v0  ;;  %v121_v10 = vld [vmem:[#allocation4 + $0x10] sm:$0x1]  ;;  %v122_v11 = vld [vmem:[#allocation7 + $0x10] sm:$0x1] }
  0x2b   :  { %v118_v14 = vmul.f32 %v117_v6, %v116_v5  ;;  %v123_v17 = vmul.f32 %v122_v11, %v121_v10  ;;  %v1148_v55 = vmov 0   ;;  %s1116_s29 = scalar_lea.vmem %s1055_s2, 16  ;;  %s1120_s30 = scalar_lea.vmem %s1055_s2, 32 }
  0x2c   :  { %v74_v42 = vadd.f32 %v73_v33, %v69_v37  ;;  %v145_v46 = vmul.u32 2146121005, %v144_v41  ;;  %p1117_p10 = scmp.ne.s32.totalorder %s1055_s2, %s1116_s29  ;;  %p1122_p12 = scmp.lt.s32.totalorder %s1120_s30, %s1116_s29 }
  0x2e   :  { %v79_v47 = vadd.f32 %v78_v38, %v74_v42  ;;  %v146_v51 = vshrl.u32 %v145_v46, 15  ;;  %p1123_p13 = por %p1122_p12, %p1121_p11 }
  0x30   :  { %v84_v52 = vadd.f32 %v83_v43, %v79_v47  ;;  %v147_v56 = vxor.u32 %v146_v51, %v145_v46  ;;  %p1124_p0 = pnand %p1123_p13, %p1117_p10 }
  0x32   :  { %v89_v57 = vadd.f32 %v88_v48, %v84_v52  ;;  %v148_v61 = vmul.u32 2221713035, %v147_v56 }
  0x34   :  { %v94_v62 = vadd.f32 %v93_v53, %v89_v57  ;;  %v149_v2 = vshrl.u32 %v148_v61, 16 }
  0x36   :  { %v99_v3 = vadd.f32 %v98_v58, %v94_v62  ;;  %v150_v7 = vxor.u32 %v149_v2, %v148_v61 }
  0x38   :  { %v104_v8 = vadd.f32 %v103_v63, %v99_v3  ;;  %v151_v12 = vor.u32 1, %v150_v7 }
  0x3a   :  { %v109_v13 = vadd.f32 %v108_v4, %v104_v8  ;;  %v152_v15 = vshll.u32 %v151_v12, 13 }
  0x3c   :  { %v114_v16 = vadd.f32 %v113_v9, %v109_v13  ;;  %v153_v18 = vxor.u32 %v152_v15, %v151_v12 }
  0x3e   :  { %v119_v19 = vadd.f32 %v118_v14, %v114_v16  ;;  %v154_v20 = vshrl.u32 %v153_v18, 17 }
  0x40   :  { %v124_v21 = vadd.f32 %v123_v17, %v119_v19  ;;  %v155_v22 = vxor.u32 %v154_v20, %v153_v18 }
  0x42   :  { %v125_v23 = vmul.f32 1.442695, %v124_v21  ;;  %v156_v24 = vshll.u32 %v155_v22, 5 }
  0x44   :  { %1072 = vpow2.f32 %v125_v23  ;;  %v157_v25 = vxor.u32 %v156_v24, %v155_v22 }
  0x46   :  { %v164_v26 = vshll.u32 %v157_v25, 13  ;;  %v158_v29 = vshrl.u32 %v157_v25, 9 }
  0x48   :  { %v165_v27 = vxor.u32 %v164_v26, %v157_v25  ;;  %v159_v33 = vor.u32 1065353216, %v158_v29 }
  0x4a   :  { %v166_v28 = vshrl.u32 %v165_v27, 17  ;;  %v161_v39 = vsub.f32 2.0, %v159_v33 }
  0x4c   :  { %v167_v30 = vxor.u32 %v166_v28, %v165_v27 }
  0x4e   :  { %v168_v31 = vshll.u32 %v167_v30, 5 }
  0x50   :  { %v169_v34 = vxor.u32 %v168_v31, %v167_v30 }
  0x51   :  { %v1073_v32 = vpop.eup %1072 }
  0x52   :  { %v127_v35 = vsub.f32 0.0, %v1073_v32  ;;  %v170_v36 = vshrl.u32 %v169_v34, 9  ;;  %v178_v37 = vshll.u32 %v169_v34, 13 }
  0x54   :  { %v128_v38 = vmul.f32 1.442695, %v127_v35  ;;  %v171_v40 = vor.u32 1065353216, %v170_v36  ;;  %v179_v41 = vxor.u32 %v178_v37, %v169_v34 }
  0x56   :  { %1074 = vpow2.f32 %v128_v38  ;;  %v173_v42 = vsub.f32 2.0, %v171_v40  ;;  %v180_v43 = vshrl.u32 %v179_v41, 17 }
  0x58   :  { %v174_v44 = vmul.f32 %v173_v42, %v161_v39  ;;  %v181_v45 = vxor.u32 %v180_v43, %v179_v41 }
  0x5a   :  { %v182_v46 = vshll.u32 %v181_v45, 5 }
  0x5c   :  { %v183_v47 = vxor.u32 %v182_v46, %v181_v45 }
  0x5e   :  { %v184_v48 = vshrl.u32 %v183_v47, 9  ;;  %v192_v49 = vshll.u32 %v183_v47, 13 }
  0x60   :  { %v185_v50 = vor.u32 1065353216, %v184_v48  ;;  %v193_v51 = vxor.u32 %v192_v49, %v183_v47 }
  0x62   :  { %v187_v53 = vsub.f32 2.0, %v185_v50  ;;  %v194_v54 = vshrl.u32 %v193_v51, 17 }
  0x63   :  { %v1179_v52 = vpop.eup %1074 }
  0x64   :  { %vm162_vm0 = vcmp.gt.f32.partialorder %v161_v39, %v1179_v52  ;;  %vm175_vm1 = vcmp.gt.f32.partialorder %v174_v44, %v1179_v52  ;;  %v188_v58 = vmul.f32 %v187_v53, %v174_v44  ;;  %v195_v59 = vxor.u32 %v194_v54, %v193_v51 }
  0x65   :  { %v163_v56 = vsel %vm162_vm0, 1, %v1148_v55  ;;  %v176_v57 = vsel %vm175_vm1, 1, %v1148_v55 }
  0x66   :  { %v177_v60 = vadd.s32 %v176_v57, %v163_v56  ;;  %vm189_vm2 = vcmp.gt.f32.partialorder %v188_v58, %v1179_v52  ;;  %v196_v61 = vshll.u32 %v195_v59, 5 }
  0x67   :  { %v190_v62 = vsel %vm189_vm2, 1, %v1148_v55 }
  0x68   :  { %v191_v63 = vadd.s32 %v190_v62, %v177_v60  ;;  %v197_v0 = vxor.u32 %v196_v61, %v195_v59 }
  0x6a   :  { %v198_v1 = vshrl.u32 %v197_v0, 9  ;;  %v206_v2 = vshll.u32 %v197_v0, 13 }
  0x6c   :  { %v199_v3 = vor.u32 1065353216, %v198_v1  ;;  %v207_v4 = vxor.u32 %v206_v2, %v197_v0 }
  0x6e   :  { %v201_v5 = vsub.f32 2.0, %v199_v3  ;;  %v208_v6 = vshrl.u32 %v207_v4, 17 }
  0x70   :  { %v202_v7 = vmul.f32 %v201_v5, %v188_v58  ;;  %v209_v8 = vxor.u32 %v208_v6, %v207_v4 }
  0x72   :  { %vm203_vm3 = vcmp.gt.f32.partialorder %v202_v7, %v1179_v52  ;;  %v210_v9 = vshll.u32 %v209_v8, 5 }
  0x73   :  { %v204_v10 = vsel %vm203_vm3, 1, %v1148_v55 }
  0x74   :  { %v205_v11 = vadd.s32 %v204_v10, %v191_v63  ;;  %v211_v12 = vxor.u32 %v210_v9, %v209_v8 }
  0x76   :  { %v212_v13 = vshrl.u32 %v211_v12, 9  ;;  %v220_v14 = vshll.u32 %v211_v12, 13 }
  0x78   :  { %v213_v15 = vor.u32 1065353216, %v212_v13  ;;  %v221_v16 = vxor.u32 %v220_v14, %v211_v12 }
  0x7a   :  { %v215_v17 = vsub.f32 2.0, %v213_v15  ;;  %v222_v18 = vshrl.u32 %v221_v16, 17 }
  0x7c   :  { %v216_v19 = vmul.f32 %v215_v17, %v202_v7  ;;  %v223_v20 = vxor.u32 %v222_v18, %v221_v16 }
  0x7e   :  { %vm217_vm4 = vcmp.gt.f32.partialorder %v216_v19, %v1179_v52  ;;  %v224_v21 = vshll.u32 %v223_v20, 5 }
  0x7f   :  { %v218_v22 = vsel %vm217_vm4, 1, %v1148_v55 }
  0x80   :  { %v219_v23 = vadd.s32 %v218_v22, %v205_v11  ;;  %v225_v24 = vxor.u32 %v224_v21, %v223_v20 }
  0x82   :  { %v226_v25 = vshrl.u32 %v225_v24, 9  ;;  %v234_v26 = vshll.u32 %v225_v24, 13 }
  0x84   :  { %v227_v27 = vor.u32 1065353216, %v226_v25  ;;  %v235_v28 = vxor.u32 %v234_v26, %v225_v24 }
  0x86   :  { %v229_v29 = vsub.f32 2.0, %v227_v27  ;;  %v236_v30 = vshrl.u32 %v235_v28, 17 }
  0x88   :  { %v230_v31 = vmul.f32 %v229_v29, %v216_v19  ;;  %v237_v32 = vxor.u32 %v236_v30, %v235_v28 }
  0x8a   :  { %vm231_vm5 = vcmp.gt.f32.partialorder %v230_v31, %v1179_v52  ;;  %v238_v33 = vshll.u32 %v237_v32, 5 }
  0x8b   :  { %v232_v34 = vsel %vm231_vm5, 1, %v1148_v55 }
  0x8c   :  { %v233_v35 = vadd.s32 %v232_v34, %v219_v23  ;;  %v239_v36 = vxor.u32 %v238_v33, %v237_v32 }
  0x8e   :  { %v240_v37 = vshrl.u32 %v239_v36, 9  ;;  %v248_v38 = vshll.u32 %v239_v36, 13 }
  0x90   :  { %v241_v39 = vor.u32 1065353216, %v240_v37  ;;  %v249_v40 = vxor.u32 %v248_v38, %v239_v36 }
  0x92   :  { %v243_v41 = vsub.f32 2.0, %v241_v39  ;;  %v250_v42 = vshrl.u32 %v249_v40, 17 }
  0x94   :  { %v244_v43 = vmul.f32 %v243_v41, %v230_v31  ;;  %v251_v44 = vxor.u32 %v250_v42, %v249_v40 }
  0x96   :  { %vm245_vm6 = vcmp.gt.f32.partialorder %v244_v43, %v1179_v52  ;;  %v252_v45 = vshll.u32 %v251_v44, 5 }
  0x97   :  { %v246_v46 = vsel %vm245_vm6, 1, %v1148_v55 }
  0x98   :  { %v247_v47 = vadd.s32 %v246_v46, %v233_v35  ;;  %v253_v48 = vxor.u32 %v252_v45, %v251_v44 }
  0x9a   :  { %v254_v49 = vshrl.u32 %v253_v48, 9  ;;  %v262_v50 = vshll.u32 %v253_v48, 13 }
  0x9c   :  { %v255_v51 = vor.u32 1065353216, %v254_v49  ;;  %v263_v53 = vxor.u32 %v262_v50, %v253_v48 }
  0x9e   :  { %v257_v54 = vsub.f32 2.0, %v255_v51  ;;  %v264_v56 = vshrl.u32 %v263_v53, 17 }
  0xa0   :  { %v258_v57 = vmul.f32 %v257_v54, %v244_v43  ;;  %v265_v58 = vxor.u32 %v264_v56, %v263_v53 }
  0xa2   :  { %vm259_vm7 = vcmp.gt.f32.partialorder %v258_v57, %v1179_v52  ;;  %v266_v59 = vshll.u32 %v265_v58, 5 }
  0xa3   :  { %v260_v60 = vsel %vm259_vm7, 1, %v1148_v55 }
  0xa4   :  { %v261_v61 = vadd.s32 %v260_v60, %v247_v47  ;;  %v267_v62 = vxor.u32 %v266_v59, %v265_v58 }
  0xa6   :  { %v268_v63 = vshrl.u32 %v267_v62, 9  ;;  %v276_v0 = vshll.u32 %v267_v62, 13 }
  0xa8   :  { %v269_v1 = vor.u32 1065353216, %v268_v63  ;;  %v277_v2 = vxor.u32 %v276_v0, %v267_v62 }
  0xaa   :  { %v271_v3 = vsub.f32 2.0, %v269_v1  ;;  %v278_v4 = vshrl.u32 %v277_v2, 17 }
  0xac   :  { %v272_v5 = vmul.f32 %v271_v3, %v258_v57  ;;  %v279_v6 = vxor.u32 %v278_v4, %v277_v2 }
  0xae   :  { %vm273_vm8 = vcmp.gt.f32.partialorder %v272_v5, %v1179_v52  ;;  %v280_v7 = vshll.u32 %v279_v6, 5 }
  0xaf   :  { %v274_v8 = vsel %vm273_vm8, 1, %v1148_v55 }
  0xb0   :  { %v275_v9 = vadd.s32 %v274_v8, %v261_v61  ;;  %v281_v10 = vxor.u32 %v280_v7, %v279_v6 }
  0xb2   :  { %v282_v11 = vshrl.u32 %v281_v10, 9  ;;  %v290_v12 = vshll.u32 %v281_v10, 13 }
  0xb4   :  { %v283_v13 = vor.u32 1065353216, %v282_v11  ;;  %v291_v14 = vxor.u32 %v290_v12, %v281_v10 }
  0xb6   :  { %v285_v15 = vsub.f32 2.0, %v283_v13  ;;  %v292_v16 = vshrl.u32 %v291_v14, 17 }
  0xb8   :  { %v286_v17 = vmul.f32 %v285_v15, %v272_v5  ;;  %v293_v18 = vxor.u32 %v292_v16, %v291_v14 }
  0xba   :  { %vm287_vm9 = vcmp.gt.f32.partialorder %v286_v17, %v1179_v52  ;;  %v294_v19 = vshll.u32 %v293_v18, 5 }
  0xbb   :  { %v288_v20 = vsel %vm287_vm9, 1, %v1148_v55 }
  0xbc   :  { %v289_v21 = vadd.s32 %v288_v20, %v275_v9  ;;  %v295_v22 = vxor.u32 %v294_v19, %v293_v18 }
  0xbe   :  { %v296_v23 = vshrl.u32 %v295_v22, 9  ;;  %v304_v24 = vshll.u32 %v295_v22, 13 }
  0xc0   :  { %v297_v25 = vor.u32 1065353216, %v296_v23  ;;  %v305_v26 = vxor.u32 %v304_v24, %v295_v22 }
  0xc2   :  { %v299_v27 = vsub.f32 2.0, %v297_v25  ;;  %v306_v28 = vshrl.u32 %v305_v26, 17 }
  0xc4   :  { %v300_v29 = vmul.f32 %v299_v27, %v286_v17  ;;  %v307_v30 = vxor.u32 %v306_v28, %v305_v26 }
  0xc6   :  { %vm301_vm10 = vcmp.gt.f32.partialorder %v300_v29, %v1179_v52  ;;  %v308_v31 = vshll.u32 %v307_v30, 5 }
  0xc7   :  { %v302_v32 = vsel %vm301_vm10, 1, %v1148_v55 }
  0xc8   :  { %v303_v33 = vadd.s32 %v302_v32, %v289_v21  ;;  %v309_v34 = vxor.u32 %v308_v31, %v307_v30 }
  0xca   :  { %v310_v35 = vshrl.u32 %v309_v34, 9  ;;  %v318_v36 = vshll.u32 %v309_v34, 13 }
  0xcc   :  { %v311_v37 = vor.u32 1065353216, %v310_v35  ;;  %v319_v38 = vxor.u32 %v318_v36, %v309_v34 }
  0xce   :  { %v313_v39 = vsub.f32 2.0, %v311_v37  ;;  %v320_v40 = vshrl.u32 %v319_v38, 17 }
  0xd0   :  { %v314_v41 = vmul.f32 %v313_v39, %v300_v29  ;;  %v321_v42 = vxor.u32 %v320_v40, %v319_v38 }
  0xd2   :  { %vm315_vm11 = vcmp.gt.f32.partialorder %v314_v41, %v1179_v52  ;;  %v322_v43 = vshll.u32 %v321_v42, 5 }
  0xd3   :  { %v316_v44 = vsel %vm315_vm11, 1, %v1148_v55 }
  0xd4   :  { %v317_v45 = vadd.s32 %v316_v44, %v303_v33  ;;  %v323_v46 = vxor.u32 %v322_v43, %v321_v42 }
  0xd6   :  { %v324_v47 = vshrl.u32 %v323_v46, 9  ;;  %v332_v48 = vshll.u32 %v323_v46, 13 }
  0xd8   :  { %v325_v49 = vor.u32 1065353216, %v324_v47  ;;  %v333_v50 = vxor.u32 %v332_v48, %v323_v46 }
  0xda   :  { %v327_v51 = vsub.f32 2.0, %v325_v49  ;;  %v334_v53 = vshrl.u32 %v333_v50, 17 }
  0xdc   :  { %v328_v54 = vmul.f32 %v327_v51, %v314_v41  ;;  %v335_v56 = vxor.u32 %v334_v53, %v333_v50 }
  0xde   :  { %vm329_vm12 = vcmp.gt.f32.partialorder %v328_v54, %v1179_v52  ;;  %v336_v57 = vshll.u32 %v335_v56, 5 }
  0xdf   :  { %v330_v58 = vsel %vm329_vm12, 1, %v1148_v55 }
  0xe0   :  { %v331_v59 = vadd.s32 %v330_v58, %v317_v45  ;;  %v337_v60 = vxor.u32 %v336_v57, %v335_v56 }
  0xe2   :  { %v338_v61 = vshrl.u32 %v337_v60, 9  ;;  %v346_v62 = vshll.u32 %v337_v60, 13 }
  0xe4   :  { %v339_v63 = vor.u32 1065353216, %v338_v61  ;;  %v347_v0 = vxor.u32 %v346_v62, %v337_v60 }
  0xe6   :  { %v341_v1 = vsub.f32 2.0, %v339_v63  ;;  %v348_v2 = vshrl.u32 %v347_v0, 17 }
  0xe8   :  { %v342_v3 = vmul.f32 %v341_v1, %v328_v54  ;;  %v349_v4 = vxor.u32 %v348_v2, %v347_v0 }
  0xea   :  { %vm343_vm13 = vcmp.gt.f32.partialorder %v342_v3, %v1179_v52  ;;  %v350_v5 = vshll.u32 %v349_v4, 5 }
  0xeb   :  { %v344_v6 = vsel %vm343_vm13, 1, %v1148_v55 }
  0xec   :  { %v345_v7 = vadd.s32 %v344_v6, %v331_v59  ;;  %v351_v8 = vxor.u32 %v350_v5, %v349_v4 }
  0xee   :  { %v352_v9 = vshrl.u32 %v351_v8, 9  ;;  %v360_v10 = vshll.u32 %v351_v8, 13 }
  0xf0   :  { %v353_v11 = vor.u32 1065353216, %v352_v9  ;;  %v361_v12 = vxor.u32 %v360_v10, %v351_v8 }
  0xf2   :  { %v355_v13 = vsub.f32 2.0, %v353_v11  ;;  %v362_v14 = vshrl.u32 %v361_v12, 17 }
  0xf4   :  { %v356_v15 = vmul.f32 %v355_v13, %v342_v3  ;;  %v363_v16 = vxor.u32 %v362_v14, %v361_v12 }
  0xf6   :  { %vm357_vm14 = vcmp.gt.f32.partialorder %v356_v15, %v1179_v52  ;;  %v364_v17 = vshll.u32 %v363_v16, 5 }
  0xf7   :  { %v358_v18 = vsel %vm357_vm14, 1, %v1148_v55 }
  0xf8   :  { %v359_v19 = vadd.s32 %v358_v18, %v345_v7  ;;  %v365_v20 = vxor.u32 %v364_v17, %v363_v16 }
  0xfa   :  { %v366_v21 = vshrl.u32 %v365_v20, 9  ;;  %v374_v22 = vshll.u32 %v365_v20, 13 }
  0xfc   :  { %v367_v23 = vor.u32 1065353216, %v366_v21  ;;  %v375_v24 = vxor.u32 %v374_v22, %v365_v20 }
  0xfe   :  { %v369_v25 = vsub.f32 2.0, %v367_v23  ;;  %v376_v26 = vshrl.u32 %v375_v24, 17 }
 0x100   :  { %v370_v27 = vmul.f32 %v369_v25, %v356_v15  ;;  %v377_v28 = vxor.u32 %v376_v26, %v375_v24 }
 0x102   :  { %vm371_vm15 = vcmp.gt.f32.partialorder %v370_v27, %v1179_v52  ;;  %v378_v29 = vshll.u32 %v377_v28, 5 }
 0x103   :  { %v372_v30 = vsel %vm371_vm15, 1, %v1148_v55 }
 0x104   :  { %v373_v31 = vadd.s32 %v372_v30, %v359_v19  ;;  %v379_v32 = vxor.u32 %v378_v29, %v377_v28 }
 0x106   :  { %v380_v33 = vshrl.u32 %v379_v32, 9  ;;  %v388_v34 = vshll.u32 %v379_v32, 13 }
 0x108   :  { %v381_v35 = vor.u32 1065353216, %v380_v33  ;;  %v389_v36 = vxor.u32 %v388_v34, %v379_v32 }
 0x10a   :  { %v383_v37 = vsub.f32 2.0, %v381_v35  ;;  %v390_v38 = vshrl.u32 %v389_v36, 17 }
 0x10c   :  { %v384_v39 = vmul.f32 %v383_v37, %v370_v27  ;;  %v391_v40 = vxor.u32 %v390_v38, %v389_v36 }
 0x10e   :  { %vm385_vm0 = vcmp.gt.f32.partialorder %v384_v39, %v1179_v52  ;;  %v392_v41 = vshll.u32 %v391_v40, 5 }
 0x10f   :  { %v386_v42 = vsel %vm385_vm0, 1, %v1148_v55 }
 0x110   :  { %v387_v43 = vadd.s32 %v386_v42, %v373_v31  ;;  %v393_v44 = vxor.u32 %v392_v41, %v391_v40 }
 0x112   :  { %v394_v45 = vshrl.u32 %v393_v44, 9  ;;  %v402_v46 = vshll.u32 %v393_v44, 13 }
 0x114   :  { %v395_v47 = vor.u32 1065353216, %v394_v45  ;;  %v403_v48 = vxor.u32 %v402_v46, %v393_v44 }
 0x116   :  { %v397_v49 = vsub.f32 2.0, %v395_v47  ;;  %v404_v50 = vshrl.u32 %v403_v48, 17 }
 0x118   :  { %v398_v51 = vmul.f32 %v397_v49, %v384_v39  ;;  %v405_v53 = vxor.u32 %v404_v50, %v403_v48 }
 0x11a   :  { %vm399_vm1 = vcmp.gt.f32.partialorder %v398_v51, %v1179_v52  ;;  %v406_v54 = vshll.u32 %v405_v53, 5 }
 0x11b   :  { %v400_v56 = vsel %vm399_vm1, 1, %v1148_v55 }
 0x11c   :  { %v401_v57 = vadd.s32 %v400_v56, %v387_v43  ;;  %v407_v58 = vxor.u32 %v406_v54, %v405_v53 }
 0x11e   :  { %v408_v59 = vshrl.u32 %v407_v58, 9  ;;  %v416_v60 = vshll.u32 %v407_v58, 13 }
 0x120   :  { %v409_v61 = vor.u32 1065353216, %v408_v59  ;;  %v417_v62 = vxor.u32 %v416_v60, %v407_v58 }
 0x122   :  { %v411_v63 = vsub.f32 2.0, %v409_v61  ;;  %v418_v0 = vshrl.u32 %v417_v62, 17 }
 0x124   :  { %v412_v1 = vmul.f32 %v411_v63, %v398_v51  ;;  %v419_v2 = vxor.u32 %v418_v0, %v417_v62 }
 0x126   :  { %vm413_vm2 = vcmp.gt.f32.partialorder %v412_v1, %v1179_v52  ;;  %v420_v3 = vshll.u32 %v419_v2, 5 }
 0x127   :  { %v414_v4 = vsel %vm413_vm2, 1, %v1148_v55 }
 0x128   :  { %v415_v5 = vadd.s32 %v414_v4, %v401_v57  ;;  %v421_v6 = vxor.u32 %v420_v3, %v419_v2 }
 0x12a   :  { %v422_v7 = vshrl.u32 %v421_v6, 9  ;;  %v430_v8 = vshll.u32 %v421_v6, 13 }
 0x12c   :  { %v423_v9 = vor.u32 1065353216, %v422_v7  ;;  %v431_v10 = vxor.u32 %v430_v8, %v421_v6 }
 0x12e   :  { %v425_v11 = vsub.f32 2.0, %v423_v9  ;;  %v432_v12 = vshrl.u32 %v431_v10, 17 }
 0x130   :  { %v426_v13 = vmul.f32 %v425_v11, %v412_v1  ;;  %v433_v14 = vxor.u32 %v432_v12, %v431_v10 }
 0x132   :  { %vm427_vm3 = vcmp.gt.f32.partialorder %v426_v13, %v1179_v52  ;;  %v434_v15 = vshll.u32 %v433_v14, 5 }
 0x133   :  { %v428_v16 = vsel %vm427_vm3, 1, %v1148_v55 }
 0x134   :  { %v429_v17 = vadd.s32 %v428_v16, %v415_v5  ;;  %v435_v18 = vxor.u32 %v434_v15, %v433_v14 }
 0x136   :  { %v436_v19 = vshrl.u32 %v435_v18, 9  ;;  %v444_v20 = vshll.u32 %v435_v18, 13 }
 0x138   :  { %v437_v21 = vor.u32 1065353216, %v436_v19  ;;  %v445_v22 = vxor.u32 %v444_v20, %v435_v18 }
 0x13a   :  { %v439_v23 = vsub.f32 2.0, %v437_v21  ;;  %v446_v24 = vshrl.u32 %v445_v22, 17 }
 0x13c   :  { %v440_v25 = vmul.f32 %v439_v23, %v426_v13  ;;  %v447_v26 = vxor.u32 %v446_v24, %v445_v22 }
 0x13e   :  { %vm441_vm4 = vcmp.gt.f32.partialorder %v440_v25, %v1179_v52  ;;  %v448_v27 = vshll.u32 %v447_v26, 5 }
 0x13f   :  { %v442_v28 = vsel %vm441_vm4, 1, %v1148_v55 }
 0x140   :  { %v443_v29 = vadd.s32 %v442_v28, %v429_v17  ;;  %v449_v30 = vxor.u32 %v448_v27, %v447_v26 }
 0x142   :  { %v450_v31 = vshrl.u32 %v449_v30, 9  ;;  %v458_v32 = vshll.u32 %v449_v30, 13 }
 0x144   :  { %v451_v33 = vor.u32 1065353216, %v450_v31  ;;  %v459_v34 = vxor.u32 %v458_v32, %v449_v30 }
 0x146   :  { %v453_v35 = vsub.f32 2.0, %v451_v33  ;;  %v460_v36 = vshrl.u32 %v459_v34, 17 }
 0x148   :  { %v454_v37 = vmul.f32 %v453_v35, %v440_v25  ;;  %v461_v38 = vxor.u32 %v460_v36, %v459_v34 }
 0x14a   :  { %vm455_vm5 = vcmp.gt.f32.partialorder %v454_v37, %v1179_v52  ;;  %v462_v39 = vshll.u32 %v461_v38, 5 }
 0x14b   :  { %v456_v40 = vsel %vm455_vm5, 1, %v1148_v55 }
 0x14c   :  { %v457_v41 = vadd.s32 %v456_v40, %v443_v29  ;;  %v463_v42 = vxor.u32 %v462_v39, %v461_v38 }
 0x14e   :  { %v464_v43 = vshrl.u32 %v463_v42, 9  ;;  %v472_v44 = vshll.u32 %v463_v42, 13 }
 0x150   :  { %v465_v45 = vor.u32 1065353216, %v464_v43  ;;  %v473_v46 = vxor.u32 %v472_v44, %v463_v42 }
 0x152   :  { %v467_v47 = vsub.f32 2.0, %v465_v45  ;;  %v474_v48 = vshrl.u32 %v473_v46, 17 }
 0x154   :  { %v468_v49 = vmul.f32 %v467_v47, %v454_v37  ;;  %v475_v50 = vxor.u32 %v474_v48, %v473_v46 }
 0x156   :  { %vm469_vm6 = vcmp.gt.f32.partialorder %v468_v49, %v1179_v52  ;;  %v476_v51 = vshll.u32 %v475_v50, 5 }
 0x157   :  { %v470_v53 = vsel %vm469_vm6, 1, %v1148_v55 }
 0x158   :  { %v471_v54 = vadd.s32 %v470_v53, %v457_v41  ;;  %v477_v56 = vxor.u32 %v476_v51, %v475_v50 }
 0x15a   :  { %v478_v57 = vshrl.u32 %v477_v56, 9  ;;  %v486_v58 = vshll.u32 %v477_v56, 13 }
 0x15c   :  { %v479_v59 = vor.u32 1065353216, %v478_v57  ;;  %v487_v60 = vxor.u32 %v486_v58, %v477_v56 }
 0x15e   :  { %v481_v61 = vsub.f32 2.0, %v479_v59  ;;  %v488_v62 = vshrl.u32 %v487_v60, 17 }
 0x160   :  { %v482_v63 = vmul.f32 %v481_v61, %v468_v49  ;;  %v489_v0 = vxor.u32 %v488_v62, %v487_v60 }
 0x162   :  { %vm483_vm7 = vcmp.gt.f32.partialorder %v482_v63, %v1179_v52  ;;  %v490_v1 = vshll.u32 %v489_v0, 5 }
 0x163   :  { %v484_v2 = vsel %vm483_vm7, 1, %v1148_v55 }
 0x164   :  { %v485_v3 = vadd.s32 %v484_v2, %v471_v54  ;;  %v491_v4 = vxor.u32 %v490_v1, %v489_v0 }
 0x166   :  { %v492_v5 = vshrl.u32 %v491_v4, 9  ;;  %v500_v6 = vshll.u32 %v491_v4, 13 }
 0x168   :  { %v493_v7 = vor.u32 1065353216, %v492_v5  ;;  %v501_v8 = vxor.u32 %v500_v6, %v491_v4 }
 0x16a   :  { %v495_v9 = vsub.f32 2.0, %v493_v7  ;;  %v502_v10 = vshrl.u32 %v501_v8, 17 }
 0x16c   :  { %v496_v11 = vmul.f32 %v495_v9, %v482_v63  ;;  %v503_v12 = vxor.u32 %v502_v10, %v501_v8 }
 0x16e   :  { %vm497_vm8 = vcmp.gt.f32.partialorder %v496_v11, %v1179_v52  ;;  %v504_v13 = vshll.u32 %v503_v12, 5 }
 0x16f   :  { %v498_v14 = vsel %vm497_vm8, 1, %v1148_v55 }
 0x170   :  { %v499_v15 = vadd.s32 %v498_v14, %v485_v3  ;;  %v505_v16 = vxor.u32 %v504_v13, %v503_v12 }
 0x172   :  { %v506_v17 = vshrl.u32 %v505_v16, 9  ;;  %v514_v18 = vshll.u32 %v505_v16, 13 }
 0x174   :  { %v507_v19 = vor.u32 1065353216, %v506_v17  ;;  %v515_v20 = vxor.u32 %v514_v18, %v505_v16 }
 0x176   :  { %v509_v21 = vsub.f32 2.0, %v507_v19  ;;  %v516_v22 = vshrl.u32 %v515_v20, 17 }
 0x178   :  { %v510_v23 = vmul.f32 %v509_v21, %v496_v11  ;;  %v517_v24 = vxor.u32 %v516_v22, %v515_v20 }
 0x17a   :  { %vm511_vm9 = vcmp.gt.f32.partialorder %v510_v23, %v1179_v52  ;;  %v518_v25 = vshll.u32 %v517_v24, 5 }
 0x17b   :  { %v512_v26 = vsel %vm511_vm9, 1, %v1148_v55 }
 0x17c   :  { %v513_v27 = vadd.s32 %v512_v26, %v499_v15  ;;  %v519_v28 = vxor.u32 %v518_v25, %v517_v24 }
 0x17e   :  { %v520_v29 = vshrl.u32 %v519_v28, 9  ;;  %v528_v30 = vshll.u32 %v519_v28, 13 }
 0x180   :  { %v521_v31 = vor.u32 1065353216, %v520_v29  ;;  %v529_v32 = vxor.u32 %v528_v30, %v519_v28 }
 0x182   :  { %v523_v33 = vsub.f32 2.0, %v521_v31  ;;  %v530_v34 = vshrl.u32 %v529_v32, 17 }
 0x184   :  { %v524_v35 = vmul.f32 %v523_v33, %v510_v23  ;;  %v531_v36 = vxor.u32 %v530_v34, %v529_v32 }
 0x186   :  { %vm525_vm10 = vcmp.gt.f32.partialorder %v524_v35, %v1179_v52  ;;  %v532_v37 = vshll.u32 %v531_v36, 5 }
 0x187   :  { %v526_v38 = vsel %vm525_vm10, 1, %v1148_v55 }
 0x188   :  { %v527_v39 = vadd.s32 %v526_v38, %v513_v27  ;;  %v533_v40 = vxor.u32 %v532_v37, %v531_v36 }
 0x18a   :  { %v534_v41 = vshrl.u32 %v533_v40, 9  ;;  %v542_v42 = vshll.u32 %v533_v40, 13 }
 0x18c   :  { %v535_v43 = vor.u32 1065353216, %v534_v41  ;;  %v543_v44 = vxor.u32 %v542_v42, %v533_v40 }
 0x18e   :  { %v537_v45 = vsub.f32 2.0, %v535_v43  ;;  %v544_v46 = vshrl.u32 %v543_v44, 17 }
 0x190   :  { %v538_v47 = vmul.f32 %v537_v45, %v524_v35  ;;  %v545_v48 = vxor.u32 %v544_v46, %v543_v44 }
 0x192   :  { %vm539_vm11 = vcmp.gt.f32.partialorder %v538_v47, %v1179_v52  ;;  %v546_v49 = vshll.u32 %v545_v48, 5 }
 0x193   :  { %v540_v50 = vsel %vm539_vm11, 1, %v1148_v55 }
 0x194   :  { %v541_v51 = vadd.s32 %v540_v50, %v527_v39  ;;  %v547_v53 = vxor.u32 %v546_v49, %v545_v48 }
 0x196   :  { %v548_v54 = vshrl.u32 %v547_v53, 9  ;;  %v556_v56 = vshll.u32 %v547_v53, 13 }
 0x198   :  { %v549_v57 = vor.u32 1065353216, %v548_v54  ;;  %v557_v58 = vxor.u32 %v556_v56, %v547_v53 }
 0x19a   :  { %v551_v59 = vsub.f32 2.0, %v549_v57  ;;  %v558_v60 = vshrl.u32 %v557_v58, 17 }
 0x19c   :  { %v552_v61 = vmul.f32 %v551_v59, %v538_v47  ;;  %v559_v62 = vxor.u32 %v558_v60, %v557_v58 }
 0x19e   :  { %vm553_vm12 = vcmp.gt.f32.partialorder %v552_v61, %v1179_v52  ;;  %v560_v63 = vshll.u32 %v559_v62, 5 }
 0x19f   :  { %v554_v0 = vsel %vm553_vm12, 1, %v1148_v55 }
 0x1a0   :  { %v555_v1 = vadd.s32 %v554_v0, %v541_v51  ;;  %v561_v2 = vxor.u32 %v560_v63, %v559_v62 }
 0x1a2   :  { %v562_v3 = vshrl.u32 %v561_v2, 9  ;;  %v570_v4 = vshll.u32 %v561_v2, 13 }
 0x1a4   :  { %v563_v5 = vor.u32 1065353216, %v562_v3  ;;  %v571_v6 = vxor.u32 %v570_v4, %v561_v2 }
 0x1a6   :  { %v565_v7 = vsub.f32 2.0, %v563_v5  ;;  %v572_v8 = vshrl.u32 %v571_v6, 17 }
 0x1a8   :  { %v566_v9 = vmul.f32 %v565_v7, %v552_v61  ;;  %v573_v10 = vxor.u32 %v572_v8, %v571_v6 }
 0x1aa   :  { %vm567_vm13 = vcmp.gt.f32.partialorder %v566_v9, %v1179_v52  ;;  %v574_v11 = vshll.u32 %v573_v10, 5 }
 0x1ab   :  { %v568_v12 = vsel %vm567_vm13, 1, %v1148_v55 }
 0x1ac   :  { %v569_v13 = vadd.s32 %v568_v12, %v555_v1  ;;  %v575_v14 = vxor.u32 %v574_v11, %v573_v10 }
 0x1ae   :  { %v576_v15 = vshrl.u32 %v575_v14, 9  ;;  %v584_v16 = vshll.u32 %v575_v14, 13 }
 0x1b0   :  { %v577_v17 = vor.u32 1065353216, %v576_v15  ;;  %v585_v18 = vxor.u32 %v584_v16, %v575_v14 }
 0x1b2   :  { %v579_v19 = vsub.f32 2.0, %v577_v17  ;;  %v586_v20 = vshrl.u32 %v585_v18, 17 }
 0x1b4   :  { %v580_v21 = vmul.f32 %v579_v19, %v566_v9  ;;  %v587_v22 = vxor.u32 %v586_v20, %v585_v18 }
 0x1b6   :  { %vm581_vm14 = vcmp.gt.f32.partialorder %v580_v21, %v1179_v52  ;;  %v588_v23 = vshll.u32 %v587_v22, 5 }
 0x1b7   :  { %v582_v24 = vsel %vm581_vm14, 1, %v1148_v55 }
 0x1b8   :  { %v583_v25 = vadd.s32 %v582_v24, %v569_v13  ;;  %v589_v26 = vxor.u32 %v588_v23, %v587_v22 }
 0x1ba   :  { %v590_v27 = vshrl.u32 %v589_v26, 9  ;;  %v598_v28 = vshll.u32 %v589_v26, 13 }
 0x1bc   :  { %v591_v29 = vor.u32 1065353216, %v590_v27  ;;  %v599_v30 = vxor.u32 %v598_v28, %v589_v26 }
 0x1be   :  { %v593_v31 = vsub.f32 2.0, %v591_v29  ;;  %v600_v32 = vshrl.u32 %v599_v30, 17 }
 0x1c0   :  { %v594_v33 = vmul.f32 %v593_v31, %v580_v21  ;;  %v601_v34 = vxor.u32 %v600_v32, %v599_v30 }
 0x1c2   :  { %vm595_vm15 = vcmp.gt.f32.partialorder %v594_v33, %v1179_v52  ;;  %v602_v35 = vshll.u32 %v601_v34, 5 }
 0x1c3   :  { %v596_v36 = vsel %vm595_vm15, 1, %v1148_v55 }
 0x1c4   :  { %v597_v37 = vadd.s32 %v596_v36, %v583_v25  ;;  %v603_v38 = vxor.u32 %v602_v35, %v601_v34 }
 0x1c6   :  { %v604_v39 = vshrl.u32 %v603_v38, 9  ;;  %v612_v40 = vshll.u32 %v603_v38, 13 }
 0x1c8   :  { %v605_v41 = vor.u32 1065353216, %v604_v39  ;;  %v613_v42 = vxor.u32 %v612_v40, %v603_v38 }
 0x1ca   :  { %v607_v43 = vsub.f32 2.0, %v605_v41  ;;  %v614_v44 = vshrl.u32 %v613_v42, 17 }
 0x1cc   :  { %v608_v45 = vmul.f32 %v607_v43, %v594_v33  ;;  %v615_v46 = vxor.u32 %v614_v44, %v613_v42 }
 0x1ce   :  { %vm609_vm0 = vcmp.gt.f32.partialorder %v608_v45, %v1179_v52  ;;  %v616_v47 = vshll.u32 %v615_v46, 5 }
 0x1cf   :  { %v610_v48 = vsel %vm609_vm0, 1, %v1148_v55 }
 0x1d0   :  { %v611_v49 = vadd.s32 %v610_v48, %v597_v37  ;;  %v617_v50 = vxor.u32 %v616_v47, %v615_v46 }
 0x1d2   :  { %v618_v51 = vshrl.u32 %v617_v50, 9  ;;  %v626_v53 = vshll.u32 %v617_v50, 13 }
 0x1d4   :  { %v619_v54 = vor.u32 1065353216, %v618_v51  ;;  %v627_v56 = vxor.u32 %v626_v53, %v617_v50 }
 0x1d6   :  { %v621_v57 = vsub.f32 2.0, %v619_v54  ;;  %v628_v58 = vshrl.u32 %v627_v56, 17 }
 0x1d8   :  { %v622_v59 = vmul.f32 %v621_v57, %v608_v45  ;;  %v629_v60 = vxor.u32 %v628_v58, %v627_v56 }
 0x1da   :  { %vm623_vm1 = vcmp.gt.f32.partialorder %v622_v59, %v1179_v52  ;;  %v630_v61 = vshll.u32 %v629_v60, 5 }
 0x1db   :  { %v624_v62 = vsel %vm623_vm1, 1, %v1148_v55 }
 0x1dc   :  { %v625_v63 = vadd.s32 %v624_v62, %v611_v49  ;;  %v631_v0 = vxor.u32 %v630_v61, %v629_v60 }
 0x1de   :  { %v632_v1 = vshrl.u32 %v631_v0, 9  ;;  %v640_v2 = vshll.u32 %v631_v0, 13 }
 0x1e0   :  { %v633_v3 = vor.u32 1065353216, %v632_v1  ;;  %v641_v4 = vxor.u32 %v640_v2, %v631_v0 }
 0x1e2   :  { %v635_v5 = vsub.f32 2.0, %v633_v3  ;;  %v642_v6 = vshrl.u32 %v641_v4, 17 }
 0x1e4   :  { %v636_v7 = vmul.f32 %v635_v5, %v622_v59  ;;  %v643_v8 = vxor.u32 %v642_v6, %v641_v4 }
 0x1e6   :  { %vm637_vm2 = vcmp.gt.f32.partialorder %v636_v7, %v1179_v52  ;;  %v644_v9 = vshll.u32 %v643_v8, 5 }
 0x1e7   :  { %v638_v10 = vsel %vm637_vm2, 1, %v1148_v55 }
 0x1e8   :  { %v639_v11 = vadd.s32 %v638_v10, %v625_v63  ;;  %v645_v12 = vxor.u32 %v644_v9, %v643_v8 }
 0x1ea   :  { %v646_v13 = vshrl.u32 %v645_v12, 9  ;;  %v654_v14 = vshll.u32 %v645_v12, 13 }
 0x1ec   :  { %v647_v15 = vor.u32 1065353216, %v646_v13  ;;  %v655_v16 = vxor.u32 %v654_v14, %v645_v12 }
 0x1ee   :  { %v649_v17 = vsub.f32 2.0, %v647_v15  ;;  %v656_v18 = vshrl.u32 %v655_v16, 17 }
 0x1f0   :  { %v650_v19 = vmul.f32 %v649_v17, %v636_v7  ;;  %v657_v20 = vxor.u32 %v656_v18, %v655_v16 }
 0x1f2   :  { %vm651_vm3 = vcmp.gt.f32.partialorder %v650_v19, %v1179_v52  ;;  %v658_v21 = vshll.u32 %v657_v20, 5 }
 0x1f3   :  { %v652_v22 = vsel %vm651_vm3, 1, %v1148_v55 }
 0x1f4   :  { %v653_v23 = vadd.s32 %v652_v22, %v639_v11  ;;  %v659_v24 = vxor.u32 %v658_v21, %v657_v20 }
 0x1f6   :  { %v660_v25 = vshrl.u32 %v659_v24, 9  ;;  %v668_v26 = vshll.u32 %v659_v24, 13 }
 0x1f8   :  { %v661_v27 = vor.u32 1065353216, %v660_v25  ;;  %v669_v28 = vxor.u32 %v668_v26, %v659_v24 }
 0x1fa   :  { %v663_v29 = vsub.f32 2.0, %v661_v27  ;;  %v670_v30 = vshrl.u32 %v669_v28, 17 }
 0x1fc   :  { %v664_v31 = vmul.f32 %v663_v29, %v650_v19  ;;  %v671_v32 = vxor.u32 %v670_v30, %v669_v28 }
 0x1fe   :  { %vm665_vm4 = vcmp.gt.f32.partialorder %v664_v31, %v1179_v52  ;;  %v672_v33 = vshll.u32 %v671_v32, 5 }
 0x1ff   :  { %v666_v34 = vsel %vm665_vm4, 1, %v1148_v55 }
 0x200   :  { %v667_v35 = vadd.s32 %v666_v34, %v653_v23  ;;  %v673_v36 = vxor.u32 %v672_v33, %v671_v32 }
 0x202   :  { %v674_v37 = vshrl.u32 %v673_v36, 9  ;;  %v682_v38 = vshll.u32 %v673_v36, 13 }
 0x204   :  { %v675_v39 = vor.u32 1065353216, %v674_v37  ;;  %v683_v40 = vxor.u32 %v682_v38, %v673_v36 }
 0x206   :  { %v677_v41 = vsub.f32 2.0, %v675_v39  ;;  %v684_v42 = vshrl.u32 %v683_v40, 17 }
 0x208   :  { %v678_v43 = vmul.f32 %v677_v41, %v664_v31  ;;  %v685_v44 = vxor.u32 %v684_v42, %v683_v40 }
 0x20a   :  { %vm679_vm5 = vcmp.gt.f32.partialorder %v678_v43, %v1179_v52  ;;  %v686_v45 = vshll.u32 %v685_v44, 5 }
 0x20b   :  { %v680_v46 = vsel %vm679_vm5, 1, %v1148_v55 }
 0x20c   :  { %v681_v47 = vadd.s32 %v680_v46, %v667_v35  ;;  %v687_v48 = vxor.u32 %v686_v45, %v685_v44 }
 0x20e   :  { %v688_v49 = vshrl.u32 %v687_v48, 9  ;;  %v696_v50 = vshll.u32 %v687_v48, 13 }
 0x210   :  { %v689_v51 = vor.u32 1065353216, %v688_v49  ;;  %v697_v53 = vxor.u32 %v696_v50, %v687_v48 }
 0x212   :  { %v691_v54 = vsub.f32 2.0, %v689_v51  ;;  %v698_v56 = vshrl.u32 %v697_v53, 17 }
 0x214   :  { %v692_v57 = vmul.f32 %v691_v54, %v678_v43  ;;  %v699_v58 = vxor.u32 %v698_v56, %v697_v53 }
 0x216   :  { %vm693_vm6 = vcmp.gt.f32.partialorder %v692_v57, %v1179_v52  ;;  %v700_v59 = vshll.u32 %v699_v58, 5 }
 0x217   :  { %v694_v60 = vsel %vm693_vm6, 1, %v1148_v55 }
 0x218   :  { %v695_v61 = vadd.s32 %v694_v60, %v681_v47  ;;  %v701_v62 = vxor.u32 %v700_v59, %v699_v58 }
 0x21a   :  { %v702_v63 = vshrl.u32 %v701_v62, 9  ;;  %v710_v0 = vshll.u32 %v701_v62, 13 }
 0x21c   :  { %v703_v1 = vor.u32 1065353216, %v702_v63  ;;  %v711_v2 = vxor.u32 %v710_v0, %v701_v62 }
 0x21e   :  { %v705_v3 = vsub.f32 2.0, %v703_v1  ;;  %v712_v4 = vshrl.u32 %v711_v2, 17 }
 0x220   :  { %v706_v5 = vmul.f32 %v705_v3, %v692_v57  ;;  %v713_v6 = vxor.u32 %v712_v4, %v711_v2 }
 0x222   :  { %vm707_vm7 = vcmp.gt.f32.partialorder %v706_v5, %v1179_v52  ;;  %v714_v7 = vshll.u32 %v713_v6, 5 }
 0x223   :  { %v708_v8 = vsel %vm707_vm7, 1, %v1148_v55 }
 0x224   :  { %v709_v9 = vadd.s32 %v708_v8, %v695_v61  ;;  %v715_v10 = vxor.u32 %v714_v7, %v713_v6 }
 0x226   :  { %v716_v11 = vshrl.u32 %v715_v10, 9  ;;  %v724_v12 = vshll.u32 %v715_v10, 13 }
 0x228   :  { %v717_v13 = vor.u32 1065353216, %v716_v11  ;;  %v725_v14 = vxor.u32 %v724_v12, %v715_v10 }
 0x22a   :  { %v719_v15 = vsub.f32 2.0, %v717_v13  ;;  %v726_v16 = vshrl.u32 %v725_v14, 17 }
 0x22c   :  { %v720_v17 = vmul.f32 %v719_v15, %v706_v5  ;;  %v727_v18 = vxor.u32 %v726_v16, %v725_v14 }
 0x22e   :  { %vm721_vm8 = vcmp.gt.f32.partialorder %v720_v17, %v1179_v52  ;;  %v728_v19 = vshll.u32 %v727_v18, 5 }
 0x22f   :  { %v722_v20 = vsel %vm721_vm8, 1, %v1148_v55 }
 0x230   :  { %v723_v21 = vadd.s32 %v722_v20, %v709_v9  ;;  %v729_v22 = vxor.u32 %v728_v19, %v727_v18 }
 0x232   :  { %v730_v23 = vshrl.u32 %v729_v22, 9  ;;  %v738_v24 = vshll.u32 %v729_v22, 13 }
 0x234   :  { %v731_v25 = vor.u32 1065353216, %v730_v23  ;;  %v739_v26 = vxor.u32 %v738_v24, %v729_v22 }
 0x236   :  { %v733_v27 = vsub.f32 2.0, %v731_v25  ;;  %v740_v28 = vshrl.u32 %v739_v26, 17 }
 0x238   :  { %v734_v29 = vmul.f32 %v733_v27, %v720_v17  ;;  %v741_v30 = vxor.u32 %v740_v28, %v739_v26 }
 0x23a   :  { %vm735_vm9 = vcmp.gt.f32.partialorder %v734_v29, %v1179_v52  ;;  %v742_v31 = vshll.u32 %v741_v30, 5 }
 0x23b   :  { %v736_v32 = vsel %vm735_vm9, 1, %v1148_v55 }
 0x23c   :  { %v737_v33 = vadd.s32 %v736_v32, %v723_v21  ;;  %v743_v34 = vxor.u32 %v742_v31, %v741_v30 }
 0x23e   :  { %v744_v35 = vshrl.u32 %v743_v34, 9  ;;  %v752_v36 = vshll.u32 %v743_v34, 13 }
 0x240   :  { %v745_v37 = vor.u32 1065353216, %v744_v35  ;;  %v753_v38 = vxor.u32 %v752_v36, %v743_v34 }
 0x242   :  { %v747_v39 = vsub.f32 2.0, %v745_v37  ;;  %v754_v40 = vshrl.u32 %v753_v38, 17 }
 0x244   :  { %v748_v41 = vmul.f32 %v747_v39, %v734_v29  ;;  %v755_v42 = vxor.u32 %v754_v40, %v753_v38 }
 0x246   :  { %vm749_vm10 = vcmp.gt.f32.partialorder %v748_v41, %v1179_v52  ;;  %v756_v43 = vshll.u32 %v755_v42, 5 }
 0x247   :  { %v750_v44 = vsel %vm749_vm10, 1, %v1148_v55 }
 0x248   :  { %v751_v45 = vadd.s32 %v750_v44, %v737_v33  ;;  %v757_v46 = vxor.u32 %v756_v43, %v755_v42 }
 0x24a   :  { %v758_v47 = vshrl.u32 %v757_v46, 9  ;;  %v766_v48 = vshll.u32 %v757_v46, 13 }
 0x24c   :  { %v759_v49 = vor.u32 1065353216, %v758_v47  ;;  %v767_v50 = vxor.u32 %v766_v48, %v757_v46 }
 0x24e   :  { %v761_v51 = vsub.f32 2.0, %v759_v49  ;;  %v768_v53 = vshrl.u32 %v767_v50, 17 }
 0x250   :  { %v762_v54 = vmul.f32 %v761_v51, %v748_v41  ;;  %v769_v56 = vxor.u32 %v768_v53, %v767_v50 }
 0x252   :  { %vm763_vm11 = vcmp.gt.f32.partialorder %v762_v54, %v1179_v52  ;;  %v770_v57 = vshll.u32 %v769_v56, 5 }
 0x253   :  { %v764_v58 = vsel %vm763_vm11, 1, %v1148_v55 }
 0x254   :  { %v765_v59 = vadd.s32 %v764_v58, %v751_v45  ;;  %v771_v60 = vxor.u32 %v770_v57, %v769_v56 }
 0x256   :  { %v772_v61 = vshrl.u32 %v771_v60, 9  ;;  %v780_v62 = vshll.u32 %v771_v60, 13 }
 0x258   :  { %v773_v63 = vor.u32 1065353216, %v772_v61  ;;  %v781_v0 = vxor.u32 %v780_v62, %v771_v60 }
 0x25a   :  { %v775_v1 = vsub.f32 2.0, %v773_v63  ;;  %v782_v2 = vshrl.u32 %v781_v0, 17 }
 0x25c   :  { %v776_v3 = vmul.f32 %v775_v1, %v762_v54  ;;  %v783_v4 = vxor.u32 %v782_v2, %v781_v0 }
 0x25e   :  { %vm777_vm12 = vcmp.gt.f32.partialorder %v776_v3, %v1179_v52  ;;  %v784_v5 = vshll.u32 %v783_v4, 5 }
 0x25f   :  { %v778_v6 = vsel %vm777_vm12, 1, %v1148_v55 }
 0x260   :  { %v779_v7 = vadd.s32 %v778_v6, %v765_v59  ;;  %v785_v8 = vxor.u32 %v784_v5, %v783_v4 }
 0x262   :  { %v786_v9 = vshrl.u32 %v785_v8, 9  ;;  %v794_v10 = vshll.u32 %v785_v8, 13 }
 0x264   :  { %v787_v11 = vor.u32 1065353216, %v786_v9  ;;  %v795_v12 = vxor.u32 %v794_v10, %v785_v8 }
 0x266   :  { %v789_v13 = vsub.f32 2.0, %v787_v11  ;;  %v796_v14 = vshrl.u32 %v795_v12, 17 }
 0x268   :  { %v790_v15 = vmul.f32 %v789_v13, %v776_v3  ;;  %v797_v16 = vxor.u32 %v796_v14, %v795_v12 }
 0x26a   :  { %vm791_vm13 = vcmp.gt.f32.partialorder %v790_v15, %v1179_v52  ;;  %v798_v17 = vshll.u32 %v797_v16, 5 }
 0x26b   :  { %v792_v18 = vsel %vm791_vm13, 1, %v1148_v55 }
 0x26c   :  { %v793_v19 = vadd.s32 %v792_v18, %v779_v7  ;;  %v799_v20 = vxor.u32 %v798_v17, %v797_v16 }
 0x26e   :  { %v800_v21 = vshrl.u32 %v799_v20, 9  ;;  %v808_v22 = vshll.u32 %v799_v20, 13 }
 0x270   :  { %v801_v23 = vor.u32 1065353216, %v800_v21  ;;  %v809_v24 = vxor.u32 %v808_v22, %v799_v20 }
 0x272   :  { %v803_v25 = vsub.f32 2.0, %v801_v23  ;;  %v810_v26 = vshrl.u32 %v809_v24, 17 }
 0x274   :  { %v804_v27 = vmul.f32 %v803_v25, %v790_v15  ;;  %v811_v28 = vxor.u32 %v810_v26, %v809_v24 }
 0x276   :  { %vm805_vm14 = vcmp.gt.f32.partialorder %v804_v27, %v1179_v52  ;;  %v812_v29 = vshll.u32 %v811_v28, 5 }
 0x277   :  { %v806_v30 = vsel %vm805_vm14, 1, %v1148_v55 }
 0x278   :  { %v807_v31 = vadd.s32 %v806_v30, %v793_v19  ;;  %v813_v32 = vxor.u32 %v812_v29, %v811_v28 }
 0x27a   :  { %v814_v33 = vshrl.u32 %v813_v32, 9  ;;  %v822_v34 = vshll.u32 %v813_v32, 13 }
 0x27c   :  { %v815_v35 = vor.u32 1065353216, %v814_v33  ;;  %v823_v36 = vxor.u32 %v822_v34, %v813_v32 }
 0x27e   :  { %v817_v37 = vsub.f32 2.0, %v815_v35  ;;  %v824_v38 = vshrl.u32 %v823_v36, 17 }
 0x280   :  { %v818_v39 = vmul.f32 %v817_v37, %v804_v27  ;;  %v825_v40 = vxor.u32 %v824_v38, %v823_v36 }
 0x282   :  { %vm819_vm15 = vcmp.gt.f32.partialorder %v818_v39, %v1179_v52  ;;  %v826_v41 = vshll.u32 %v825_v40, 5 }
 0x283   :  { %v820_v42 = vsel %vm819_vm15, 1, %v1148_v55 }
 0x284   :  { %v821_v43 = vadd.s32 %v820_v42, %v807_v31  ;;  %v827_v44 = vxor.u32 %v826_v41, %v825_v40 }
 0x286   :  { %v828_v45 = vshrl.u32 %v827_v44, 9  ;;  %v836_v46 = vshll.u32 %v827_v44, 13 }
 0x288   :  { %v829_v47 = vor.u32 1065353216, %v828_v45  ;;  %v837_v48 = vxor.u32 %v836_v46, %v827_v44 }
 0x28a   :  { %v831_v49 = vsub.f32 2.0, %v829_v47  ;;  %v838_v50 = vshrl.u32 %v837_v48, 17 }
 0x28c   :  { %v832_v51 = vmul.f32 %v831_v49, %v818_v39  ;;  %v839_v53 = vxor.u32 %v838_v50, %v837_v48 }
 0x28e   :  { %vm833_vm0 = vcmp.gt.f32.partialorder %v832_v51, %v1179_v52  ;;  %v840_v54 = vshll.u32 %v839_v53, 5 }
 0x28f   :  { %v834_v56 = vsel %vm833_vm0, 1, %v1148_v55 }
 0x290   :  { %v835_v57 = vadd.s32 %v834_v56, %v821_v43  ;;  %v841_v58 = vxor.u32 %v840_v54, %v839_v53 }
 0x292   :  { %v842_v59 = vshrl.u32 %v841_v58, 9  ;;  %v850_v60 = vshll.u32 %v841_v58, 13 }
 0x294   :  { %v843_v61 = vor.u32 1065353216, %v842_v59  ;;  %v851_v62 = vxor.u32 %v850_v60, %v841_v58 }
 0x296   :  { %v845_v63 = vsub.f32 2.0, %v843_v61  ;;  %v852_v0 = vshrl.u32 %v851_v62, 17 }
 0x298   :  { %v846_v1 = vmul.f32 %v845_v63, %v832_v51  ;;  %v853_v2 = vxor.u32 %v852_v0, %v851_v62 }
 0x29a   :  { %vm847_vm1 = vcmp.gt.f32.partialorder %v846_v1, %v1179_v52  ;;  %v854_v3 = vshll.u32 %v853_v2, 5 }
 0x29b   :  { %v848_v4 = vsel %vm847_vm1, 1, %v1148_v55 }
 0x29c   :  { %v849_v5 = vadd.s32 %v848_v4, %v835_v57  ;;  %v855_v6 = vxor.u32 %v854_v3, %v853_v2 }
 0x29e   :  { %v856_v7 = vshrl.u32 %v855_v6, 9  ;;  %v864_v8 = vshll.u32 %v855_v6, 13 }
 0x2a0   :  { %v857_v9 = vor.u32 1065353216, %v856_v7  ;;  %v865_v10 = vxor.u32 %v864_v8, %v855_v6 }
 0x2a2   :  { %v859_v11 = vsub.f32 2.0, %v857_v9  ;;  %v866_v12 = vshrl.u32 %v865_v10, 17 }
 0x2a4   :  { %v860_v13 = vmul.f32 %v859_v11, %v846_v1  ;;  %v867_v14 = vxor.u32 %v866_v12, %v865_v10 }
 0x2a6   :  { %vm861_vm2 = vcmp.gt.f32.partialorder %v860_v13, %v1179_v52  ;;  %v868_v15 = vshll.u32 %v867_v14, 5 }
 0x2a7   :  { %v862_v16 = vsel %vm861_vm2, 1, %v1148_v55 }
 0x2a8   :  { %v863_v17 = vadd.s32 %v862_v16, %v849_v5  ;;  %v869_v18 = vxor.u32 %v868_v15, %v867_v14 }
 0x2aa   :  { %v870_v19 = vshrl.u32 %v869_v18, 9  ;;  %v878_v20 = vshll.u32 %v869_v18, 13 }
 0x2ac   :  { %v871_v21 = vor.u32 1065353216, %v870_v19  ;;  %v879_v22 = vxor.u32 %v878_v20, %v869_v18 }
 0x2ae   :  { %v873_v23 = vsub.f32 2.0, %v871_v21  ;;  %v880_v24 = vshrl.u32 %v879_v22, 17 }
 0x2b0   :  { %v874_v25 = vmul.f32 %v873_v23, %v860_v13  ;;  %v881_v26 = vxor.u32 %v880_v24, %v879_v22 }
 0x2b2   :  { %vm875_vm3 = vcmp.gt.f32.partialorder %v874_v25, %v1179_v52  ;;  %v882_v27 = vshll.u32 %v881_v26, 5 }
 0x2b3   :  { %v876_v28 = vsel %vm875_vm3, 1, %v1148_v55 }
 0x2b4   :  { %v877_v29 = vadd.s32 %v876_v28, %v863_v17  ;;  %v883_v30 = vxor.u32 %v882_v27, %v881_v26 }
 0x2b6   :  { %v884_v31 = vshrl.u32 %v883_v30, 9  ;;  %v892_v32 = vshll.u32 %v883_v30, 13 }
 0x2b8   :  { %v885_v33 = vor.u32 1065353216, %v884_v31  ;;  %v893_v34 = vxor.u32 %v892_v32, %v883_v30 }
 0x2ba   :  { %v887_v35 = vsub.f32 2.0, %v885_v33  ;;  %v894_v36 = vshrl.u32 %v893_v34, 17 }
 0x2bc   :  { %v888_v37 = vmul.f32 %v887_v35, %v874_v25  ;;  %v895_v38 = vxor.u32 %v894_v36, %v893_v34 }
 0x2be   :  { %vm889_vm4 = vcmp.gt.f32.partialorder %v888_v37, %v1179_v52  ;;  %v896_v39 = vshll.u32 %v895_v38, 5 }
 0x2bf   :  { %v890_v40 = vsel %vm889_vm4, 1, %v1148_v55 }
 0x2c0   :  { %v891_v41 = vadd.s32 %v890_v40, %v877_v29  ;;  %v897_v42 = vxor.u32 %v896_v39, %v895_v38 }
 0x2c2   :  { %v898_v43 = vshrl.u32 %v897_v42, 9  ;;  %v906_v44 = vshll.u32 %v897_v42, 13 }
 0x2c4   :  { %v899_v45 = vor.u32 1065353216, %v898_v43  ;;  %v907_v46 = vxor.u32 %v906_v44, %v897_v42 }
 0x2c6   :  { %v901_v47 = vsub.f32 2.0, %v899_v45  ;;  %v908_v48 = vshrl.u32 %v907_v46, 17 }
 0x2c8   :  { %v902_v49 = vmul.f32 %v901_v47, %v888_v37  ;;  %v909_v50 = vxor.u32 %v908_v48, %v907_v46 }
 0x2ca   :  { %vm903_vm5 = vcmp.gt.f32.partialorder %v902_v49, %v1179_v52  ;;  %v910_v51 = vshll.u32 %v909_v50, 5 }
 0x2cb   :  { %v904_v53 = vsel %vm903_vm5, 1, %v1148_v55 }
 0x2cc   :  { %v905_v54 = vadd.s32 %v904_v53, %v891_v41  ;;  %v911_v56 = vxor.u32 %v910_v51, %v909_v50 }
 0x2ce   :  { %v912_v57 = vshrl.u32 %v911_v56, 9  ;;  %v920_v58 = vshll.u32 %v911_v56, 13 }
 0x2d0   :  { %v913_v59 = vor.u32 1065353216, %v912_v57  ;;  %v921_v60 = vxor.u32 %v920_v58, %v911_v56 }
 0x2d2   :  { %v915_v61 = vsub.f32 2.0, %v913_v59  ;;  %v922_v62 = vshrl.u32 %v921_v60, 17 }
 0x2d4   :  { %v916_v63 = vmul.f32 %v915_v61, %v902_v49  ;;  %v923_v0 = vxor.u32 %v922_v62, %v921_v60 }
 0x2d6   :  { %vm917_vm6 = vcmp.gt.f32.partialorder %v916_v63, %v1179_v52  ;;  %v924_v1 = vshll.u32 %v923_v0, 5 }
 0x2d7   :  { %v918_v2 = vsel %vm917_vm6, 1, %v1148_v55 }
 0x2d8   :  { %v919_v3 = vadd.s32 %v918_v2, %v905_v54  ;;  %v925_v4 = vxor.u32 %v924_v1, %v923_v0 }
 0x2da   :  { %v926_v5 = vshrl.u32 %v925_v4, 9  ;;  %v934_v6 = vshll.u32 %v925_v4, 13 }
 0x2dc   :  { %v927_v7 = vor.u32 1065353216, %v926_v5  ;;  %v935_v8 = vxor.u32 %v934_v6, %v925_v4 }
 0x2de   :  { %v929_v9 = vsub.f32 2.0, %v927_v7  ;;  %v936_v10 = vshrl.u32 %v935_v8, 17 }
 0x2e0   :  { %v930_v11 = vmul.f32 %v929_v9, %v916_v63  ;;  %v937_v12 = vxor.u32 %v936_v10, %v935_v8 }
 0x2e2   :  { %vm931_vm7 = vcmp.gt.f32.partialorder %v930_v11, %v1179_v52  ;;  %v938_v13 = vshll.u32 %v937_v12, 5 }
 0x2e3   :  { %v932_v14 = vsel %vm931_vm7, 1, %v1148_v55 }
 0x2e4   :  { %v933_v15 = vadd.s32 %v932_v14, %v919_v3  ;;  %v939_v16 = vxor.u32 %v938_v13, %v937_v12 }
 0x2e6   :  { %v940_v17 = vshrl.u32 %v939_v16, 9  ;;  %v948_v18 = vshll.u32 %v939_v16, 13 }
 0x2e8   :  { %v941_v19 = vor.u32 1065353216, %v940_v17  ;;  %v949_v20 = vxor.u32 %v948_v18, %v939_v16 }
 0x2ea   :  { %v943_v21 = vsub.f32 2.0, %v941_v19  ;;  %v950_v22 = vshrl.u32 %v949_v20, 17 }
 0x2ec   :  { %v944_v23 = vmul.f32 %v943_v21, %v930_v11  ;;  %v951_v24 = vxor.u32 %v950_v22, %v949_v20 }
 0x2ee   :  { %vm945_vm8 = vcmp.gt.f32.partialorder %v944_v23, %v1179_v52  ;;  %v952_v25 = vshll.u32 %v951_v24, 5 }
 0x2ef   :  { %v946_v26 = vsel %vm945_vm8, 1, %v1148_v55 }
 0x2f0   :  { %v947_v27 = vadd.s32 %v946_v26, %v933_v15  ;;  %v953_v28 = vxor.u32 %v952_v25, %v951_v24 }
 0x2f2   :  { %v954_v29 = vshrl.u32 %v953_v28, 9  ;;  %v962_v30 = vshll.u32 %v953_v28, 13 }
 0x2f4   :  { %v955_v31 = vor.u32 1065353216, %v954_v29  ;;  %v963_v32 = vxor.u32 %v962_v30, %v953_v28 }
 0x2f6   :  { %v957_v33 = vsub.f32 2.0, %v955_v31  ;;  %v964_v34 = vshrl.u32 %v963_v32, 17 }
 0x2f8   :  { %v958_v35 = vmul.f32 %v957_v33, %v944_v23  ;;  %v965_v36 = vxor.u32 %v964_v34, %v963_v32 }
 0x2fa   :  { %vm959_vm9 = vcmp.gt.f32.partialorder %v958_v35, %v1179_v52  ;;  %v966_v37 = vshll.u32 %v965_v36, 5 }
 0x2fb   :  { %v960_v38 = vsel %vm959_vm9, 1, %v1148_v55 }
 0x2fc   :  { %v961_v39 = vadd.s32 %v960_v38, %v947_v27  ;;  %v967_v40 = vxor.u32 %v966_v37, %v965_v36 }
 0x2fe   :  { %v968_v41 = vshrl.u32 %v967_v40, 9  ;;  %v976_v42 = vshll.u32 %v967_v40, 13 }
 0x300   :  { %v969_v43 = vor.u32 1065353216, %v968_v41  ;;  %v977_v44 = vxor.u32 %v976_v42, %v967_v40 }
 0x302   :  { %v971_v45 = vsub.f32 2.0, %v969_v43  ;;  %v978_v46 = vshrl.u32 %v977_v44, 17 }
 0x304   :  { %v972_v47 = vmul.f32 %v971_v45, %v958_v35  ;;  %v979_v48 = vxor.u32 %v978_v46, %v977_v44 }
 0x306   :  { %vm973_vm10 = vcmp.gt.f32.partialorder %v972_v47, %v1179_v52  ;;  %v980_v49 = vshll.u32 %v979_v48, 5 }
 0x307   :  { %v974_v50 = vsel %vm973_vm10, 1, %v1148_v55 }
 0x308   :  { %v975_v51 = vadd.s32 %v974_v50, %v961_v39  ;;  %v981_v53 = vxor.u32 %v980_v49, %v979_v48 }
 0x30a   :  { %v982_v54 = vshrl.u32 %v981_v53, 9  ;;  %v990_v56 = vshll.u32 %v981_v53, 13 }
 0x30c   :  { %v983_v57 = vor.u32 1065353216, %v982_v54  ;;  %v991_v58 = vxor.u32 %v990_v56, %v981_v53 }
 0x30e   :  { %v985_v59 = vsub.f32 2.0, %v983_v57  ;;  %v992_v60 = vshrl.u32 %v991_v58, 17 }
 0x310   :  { %v986_v61 = vmul.f32 %v985_v59, %v972_v47  ;;  %v993_v62 = vxor.u32 %v992_v60, %v991_v58 }
 0x312   :  { %vm987_vm11 = vcmp.gt.f32.partialorder %v986_v61, %v1179_v52  ;;  %v994_v63 = vshll.u32 %v993_v62, 5 }
 0x313   :  { %v988_v0 = vsel %vm987_vm11, 1, %v1148_v55 }
 0x314   :  { %v989_v1 = vadd.s32 %v988_v0, %v975_v51  ;;  %v995_v2 = vxor.u32 %v994_v63, %v993_v62 }
 0x316   :  { %v996_v3 = vshrl.u32 %v995_v2, 9  ;;  %v1004_v4 = vshll.u32 %v995_v2, 13 }
 0x318   :  { %v997_v5 = vor.u32 1065353216, %v996_v3  ;;  %v1005_v6 = vxor.u32 %v1004_v4, %v995_v2 }
 0x31a   :  { %v999_v7 = vsub.f32 2.0, %v997_v5  ;;  %v1006_v8 = vshrl.u32 %v1005_v6, 17 }
 0x31c   :  { %v1000_v9 = vmul.f32 %v999_v7, %v986_v61  ;;  %v1007_v10 = vxor.u32 %v1006_v8, %v1005_v6 }
 0x31e   :  { %vm1001_vm12 = vcmp.gt.f32.partialorder %v1000_v9, %v1179_v52  ;;  %v1008_v11 = vshll.u32 %v1007_v10, 5 }
 0x31f   :  { %v1002_v12 = vsel %vm1001_vm12, 1, %v1148_v55 }
 0x320   :  { %v1003_v13 = vadd.s32 %v1002_v12, %v989_v1  ;;  %v1009_v14 = vxor.u32 %v1008_v11, %v1007_v10 }
 0x322   :  { %v1010_v15 = vshrl.u32 %v1009_v14, 9  ;;  %v1018_v16 = vshll.u32 %v1009_v14, 13 }
 0x324   :  { %v1011_v17 = vor.u32 1065353216, %v1010_v15  ;;  %v1019_v18 = vxor.u32 %v1018_v16, %v1009_v14 }
 0x326   :  { %v1013_v19 = vsub.f32 2.0, %v1011_v17  ;;  %v1020_v20 = vshrl.u32 %v1019_v18, 17 }
 0x328   :  { %v1014_v21 = vmul.f32 %v1013_v19, %v1000_v9  ;;  %v1021_v22 = vxor.u32 %v1020_v20, %v1019_v18 }
 0x32a   :  { %vm1015_vm13 = vcmp.gt.f32.partialorder %v1014_v21, %v1179_v52  ;;  %v1022_v23 = vshll.u32 %v1021_v22, 5 }
 0x32b   :  { %v1016_v24 = vsel %vm1015_vm13, 1, %v1148_v55 }
 0x32c   :  { %v1017_v25 = vadd.s32 %v1016_v24, %v1003_v13  ;;  %v1023_v26 = vxor.u32 %v1022_v23, %v1021_v22 }
 0x32e   :  { %v1024_v27 = vshrl.u32 %v1023_v26, 9  ;;  %v1032_v28 = vshll.u32 %v1023_v26, 13 }
 0x330   :  { %v1025_v29 = vor.u32 1065353216, %v1024_v27  ;;  %v1033_v30 = vxor.u32 %v1032_v28, %v1023_v26 }
 0x332   :  { %v1027_v31 = vsub.f32 2.0, %v1025_v29  ;;  %v1034_v32 = vshrl.u32 %v1033_v30, 17 }
 0x334   :  { %v1028_v33 = vmul.f32 %v1027_v31, %v1014_v21  ;;  %v1035_v34 = vxor.u32 %v1034_v32, %v1033_v30 }
 0x336   :  { %vm1029_vm14 = vcmp.gt.f32.partialorder %v1028_v33, %v1179_v52  ;;  %v1036_v35 = vshll.u32 %v1035_v34, 5 }
 0x337   :  { %v1030_v36 = vsel %vm1029_vm14, 1, %v1148_v55 }
 0x338   :  { %v1031_v37 = vadd.s32 %v1030_v36, %v1017_v25  ;;  %v1037_v38 = vxor.u32 %v1036_v35, %v1035_v34 }
 0x33a   :  { %v1038_v39 = vshrl.u32 %v1037_v38, 9 }
 0x33c   :  { %v1039_v40 = vor.u32 1065353216, %v1038_v39 }
 0x33e   :  { %v1041_v41 = vsub.f32 2.0, %v1039_v40 }
 0x340   :  { %v1042_v42 = vmul.f32 %v1041_v41, %v1028_v33 }
 0x342   :  { %vm1043_vm15 = vcmp.gt.f32.partialorder %v1042_v42, %v1179_v52 }
 0x343   :  { %v1044_v43 = vsel %vm1043_vm15, 1, %v1148_v55 }
 0x344   :  { %v1045_v44 = vadd.s32 %v1044_v43, %v1031_v37 }
 0x346   :  { %v1046_v45 = vcvt.s32.f32 %v1045_v44 }
 0x348   :  { %1047 = vst [vmem:[#allocation9] sm:$0x1] %v1046_v45 }
 0x349   :  { %1127 = shalt.err (!%p1124_p0)
}
 0x34a   :  { %1057 = dma.vmem_to_hbm [thread:$0]  %s1055_s2, 16, %s1315_s3, [#allocation6]  }
 0x34b   :  { %1140 = dma.done.wait [#allocation6], 16  }
 0x34c   :  { %1141 = vsyncadd [#allocation6], 4294967280 }
 0x34d   :  { %1061 = vsyncpa [#allocation5], 1 }
 0x34e   :  { %1062 = vsyncpa [#allocation8], 1 }
 0x34f   :  { %1063 = vsyncpa [#allocation6], 1 }

</bundles_post_ra>
